<compile_context>
chip_gen: v6e
topology: v6e:2x2x1
jax: 0.10.0
libtpu: 0.0.40
codegen_flags: <defaults>
</compile_context>

<pallas_src>
import functools

import jax
import jax.numpy as jnp
from jax import lax
from jax.experimental import pallas as pl
from jax.experimental.pallas import tpu as pltpu

_LANES = 128


# --------------------------------------------------------------------------
# VMEM-aware tiling helpers
# --------------------------------------------------------------------------
def _vmem_capacity_bytes():
    try:
        return int(pltpu.get_tpu_info().vmem_capacity_bytes)
    except Exception:
        return 64 << 20                       # conservative (v7x-sized) fallback


_VMEM_CAP = _vmem_capacity_bytes()
_VMEM_LIMIT = int(min(_VMEM_CAP * 3 // 4, 96 << 20))
_BIG_BUDGET = int(min(24 << 20, _VMEM_LIMIT // 2))
_SMALL_BUDGET = int(min(8 << 20, _VMEM_LIMIT // 4))


def _params(*sem):
    return pltpu.CompilerParams(dimension_semantics=sem,
                                vmem_limit_bytes=_VMEM_LIMIT)


def _pad_up(x, m):
    return (x + m - 1) // m * m


def _pick_rows(n, bytes_per_row, budget, align=8):
    """Largest tile t with t == n, or (t % align == 0, t | n, t*bpr <= budget).

    bytes_per_row must already include (8,128) lane/sublane padding and the x2
    double-buffering factor."""
    if n * bytes_per_row <= budget:
        return n
    cap = max(align, int(budget // max(bytes_per_row, 1)) // align * align)
    t = min(cap, (n // align) * align)
    while t >= align:
        if n % t == 0:
            return t
        t -= align
    return n  # pathological (prime) sizes: whole array, still correct


def _img_blocks(x, pad_value=0.0):
    """(B, C, H, W) -> lane-dense (B, C, R, 128) with a masked-safe pad tail."""
    B, C = x.shape[0], x.shape[1]
    hw = x.shape[2] * x.shape[3]
    xf = x.reshape(B, C, hw)
    pad = (-hw) % _LANES
    if pad:
        xf = jnp.pad(xf, ((0, 0), (0, 0), (0, pad)), constant_values=pad_value)
    return xf.reshape(B, C, (hw + pad) // _LANES, _LANES)


def _vec_blocks(x2, pad_value=0.0):
    """(B, N) -> (B, R, 128) with a pad tail."""
    B, n = x2.shape
    pad = (-n) % _LANES
    if pad:
        x2 = jnp.pad(x2, ((0, 0), (0, pad)), constant_values=pad_value)
    return x2.reshape(B, (n + pad) // _LANES, _LANES)


# --------------------------------------------------------------------------
# Pallas kernels
# --------------------------------------------------------------------------
def _comp_msr_kernel(in_ref, gen_ref, x3_ref, gt_ref, m_ref,
                     comp_ref, oh_ref, ov_ref, o3h_ref, o3v_ref):
    """Fused composite tile + hole/valid L1 sums + x_o3 msr L1 sums.

    Grid = (P parallel cores, spatial tiles).  Accumulators are lane-wide
    (1, 1, 128) blocks indexed by the parallel axis."""
    @pl.when(pl.program_id(1) == 0)
    def _init():
        for r in (oh_ref, ov_ref, o3h_ref, o3v_ref):
            r[...] = jnp.zeros_like(r)

    m = m_ref[...]                          # (B, 1, TR, 128): broadcast over C
    o = gen_ref[...]
    g = gt_ref[...]
    comp_ref[...] = m * in_ref[...] + (1.0 - m) * o

    def part(v):                            # (B, C, TR, 128) -> (1, 1, 128)
        s = jnp.sum(v, axis=(0, 1))         # VPU adds over leading dims
        return jnp.sum(s, axis=0, keepdims=True)[None]

    d = jnp.abs(o - g)
    md = m * d
    ov_ref[...] += part(md)                 # valid:   mask   * |out - gt|
    oh_ref[...] += part(d - md)             # hole:  (1-mask) * |out - gt|

    d3 = jnp.abs(x3_ref[...] - g)
    md3 = m * d3
    o3v_ref[...] += part(md3)
    o3h_ref[...] += part(d3 - md3)


def _masked_l1_pair_kernel(a_ref, b_ref, m_ref, om_ref, ou_ref):
    """One pass producing both sum(m*|a-b|) and sum((1-m)*|a-b|)."""
    @pl.when(pl.program_id(1) == 0)
    def _init():
        om_ref[...] = jnp.zeros_like(om_ref)
        ou_ref[...] = jnp.zeros_like(ou_ref)

    d = jnp.abs(a_ref[...] - b_ref[...])
    md = m_ref[...] * d

    def part(v):
        s = jnp.sum(v, axis=(0, 1))
        return jnp.sum(s, axis=0, keepdims=True)[None]

    om_ref[...] += part(md)
    ou_ref[...] += part(d - md)


def _dice_kernel(x_ref, m_ref, oa_ref, ob_ref, oc_ref):
    """Per-batch partial sums for dice_loss(mm, 1 - mask)."""
    @pl.when(pl.program_id(0) == 0)
    def _init():
        oa_ref[...] = jnp.zeros_like(oa_ref)
        ob_ref[...] = jnp.zeros_like(ob_ref)
        oc_ref[...] = jnp.zeros_like(oc_ref)

    s = jax.nn.sigmoid(x_ref[...])          # (B, TR, 128)
    t = 1.0 - m_ref[...]
    oa_ref[...] += jnp.sum(s * t, axis=1, keepdims=True)
    ob_ref[...] += jnp.sum(s * s, axis=1, keepdims=True)
    oc_ref[...] += jnp.sum(t * t, axis=1, keepdims=True)


def _mm_bias_act_kernel(x_ref, w_ref, b_ref, o_ref, *, act):
    """Row-tiled conv-as-matmul (grouped, lane-dense output; weights resident)."""
    y = jnp.dot(x_ref[...], w_ref[...], preferred_element_type=jnp.float32)
    y = y + b_ref[...]
    if act == "relu":
        y = jnp.maximum(y, 0.0)
    elif act == "leaky":
        y = jnp.where(y > 0.0, y, 0.2 * y)
    o_ref[...] = y


def _disc_kernel(p_ref, w1_ref, b1_ref, w2_ref, b2_ref, w3_ref, b3_ref,
                 wh_ref, out_ref):
    """Entire discriminator: conv1/2/3 (block-diag weights) + leaky ReLU + 1x1
    head applied to the row-sum + per-half accumulation.  Grid = (2 halves
    [parallel], row tiles [arbitrary]); intermediates never touch HBM."""
    @pl.when(pl.program_id(1) == 0)
    def _init():
        out_ref[...] = jnp.zeros_like(out_ref)

    def leaky(v):
        return jnp.where(v > 0.0, v, 0.2 * v)

    y = jnp.dot(p_ref[...], w1_ref[...], preferred_element_type=jnp.float32)
    y = leaky(y + b1_ref[...])
    y = jnp.dot(y.astype(w2_ref.dtype), w2_ref[...],
                preferred_element_type=jnp.float32)
    y = leaky(y + b2_ref[...])
    y = jnp.dot(y.astype(w3_ref.dtype), w3_ref[...],
                preferred_element_type=jnp.float32)
    y = leaky(y + b3_ref[...])                               # (Tm, 16)
    rs = jnp.sum(y, axis=0, keepdims=True)                   # (1, 16) row-sum
    ts = jnp.sum(rs * wh_ref[...], axis=1, keepdims=True)    # (1, 1) head sum
    out_ref[...] += ts[None]


def _feat_loss_kernel(c_ref, o_ref, g_ref, po_ref, pc_ref, so_ref, sc_ref,
                      gc_sc, go_sc, gg_sc):
    """Fused perceptual + style partial sums for one feature level.

    Grid = (B [parallel], spatial tiles [arbitrary]).  Gram matrices accumulate
    in VMEM scratch; each feature map is read from HBM exactly once."""
    t = pl.program_id(1)

    @pl.when(t == 0)
    def _init():
        for r in (po_ref, pc_ref, so_ref, sc_ref):
            r[...] = jnp.zeros_like(r)
        for r in (gc_sc, go_sc, gg_sc):
            r[...] = jnp.zeros_like(r)

    fc = c_ref[...]
    fo = o_ref[...]
    fg = g_ref[...]
    po_ref[...] += jnp.sum(jnp.abs(fo - fg), axis=(0, 1), keepdims=True)[None]
    pc_ref[...] += jnp.sum(jnp.abs(fc - fg), axis=(0, 1), keepdims=True)[None]

    dims = (((0,), (0,)), ((), ()))                          # f^T @ f over space
    gc_sc[...] += lax.dot_general(fc, fc, dims, preferred_element_type=jnp.float32)
    go_sc[...] += lax.dot_general(fo, fo, dims, preferred_element_type=jnp.float32)
    gg_sc[...] += lax.dot_general(fg, fg, dims, preferred_element_type=jnp.float32)

    @pl.when(t == pl.num_programs(1) - 1)
    def _finish():
        gg = gg_sc[...]
        so_ref[...] += jnp.sum(jnp.abs(go_sc[...] - gg), axis=(0, 1),
                               keepdims=True)[None]
        sc_ref[...] += jnp.sum(jnp.abs(gc_sc[...] - gg), axis=(0, 1),
                               keepdims=True)[None]


# --------------------------------------------------------------------------
# Pallas wrappers
# --------------------------------------------------------------------------
def comp_and_l1(inp, output, x_o3, gt, mask):
    """Fused composite + hole/valid sums + x_o3 msr sums over full-res tensors."""
    B, C, H, W = inp.shape
    hw = H * W
    ib = _img_blocks(inp)
    ob = _img_blocks(output)
    xb = _img_blocks(x_o3)
    gb = _img_blocks(gt)
    mb = _img_blocks(mask, pad_value=1.0)
    R, L = ib.shape[2], ib.shape[3]

    # padded bytes per row of blocks across all streams, x2 for double buffering
    row_bytes = 2 * 4 * L * (5 * B * C + B)
    TR = _pick_rows(R, row_bytes, _BIG_BUDGET)
    nt = R // TR
    P = 2 if (nt >= 2 and nt % 2 == 0) else 1     # engage both v7x TensorCores
    npc = nt // P

    img_spec = pl.BlockSpec((B, C, TR, L), lambda p, t: (0, 0, p * npc + t, 0))
    msk_spec = pl.BlockSpec((B, 1, TR, L), lambda p, t: (0, 0, p * npc + t, 0))
    acc_spec = pl.BlockSpec((1, 1, L), lambda p, t: (p, 0, 0))
    acc_shape = jax.ShapeDtypeStruct((P, 1, L), jnp.float32)

    comp, oh, ov, o3h, o3v = pl.pallas_call(
        _comp_msr_kernel,
        grid=(P, npc),
        in_specs=[img_spec, img_spec, img_spec, img_spec, msk_spec],
        out_specs=(img_spec, acc_spec, acc_spec, acc_spec, acc_spec),
        out_shape=(jax.ShapeDtypeStruct((B, C, R, L), jnp.float32),
                   acc_shape, acc_shape, acc_shape, acc_shape),
        compiler_params=_params("parallel", "arbitrary"),
    )(ib, ob, xb, gb, mb)

    comp = comp.reshape(B, C, R * L)[:, :, :hw].reshape(B, C, H, W)
    return comp, jnp.sum(oh), jnp.sum(ov), jnp.sum(o3h), jnp.sum(o3v)


def masked_l1_pair_sums(a, b, mask):
    """Returns (sum(mask*|a-b|), sum((1-mask)*|a-b|)) in one HBM pass."""
    B, C = a.shape[0], a.shape[1]
    ab = _img_blocks(a)
    bb = _img_blocks(b)
    mb = _img_blocks(mask, pad_value=1.0)
    R, L = ab.shape[2], ab.shape[3]

    row_bytes = 2 * 4 * L * (2 * B * C + B)
    TR = _pick_rows(R, row_bytes, _SMALL_BUDGET)
    nt = R // TR
    P = 2 if (nt >= 2 and nt % 2 == 0) else 1
    npc = nt // P

    img_spec = pl.BlockSpec((B, C, TR, L), lambda p, t: (0, 0, p * npc + t, 0))
    msk_spec = pl.BlockSpec((B, 1, TR, L), lambda p, t: (0, 0, p * npc + t, 0))
    acc_spec = pl.BlockSpec((1, 1, L), lambda p, t: (p, 0, 0))
    acc_shape = jax.ShapeDtypeStruct((P, 1, L), jnp.float32)

    sm, su = pl.pallas_call(
        _masked_l1_pair_kernel,
        grid=(P, npc),
        in_specs=[img_spec, img_spec, msk_spec],
        out_specs=(acc_spec, acc_spec),
        out_shape=(acc_shape, acc_shape),
        compiler_params=_params("parallel", "arbitrary"),
    )(ab, bb, mb)
    return jnp.sum(sm), jnp.sum(su)


def dice_loss_fn(mm, mask):
    """dice_loss(mm, 1 - mask): per-batch partial sums computed in Pallas."""
    B = mm.shape[0]
    hw = mm.size // B
    # pad mm with a large negative (sigmoid -> 0) and mask with 1 (target -> 0)
    x = _vec_blocks(mm.reshape(B, hw), pad_value=-1e9)
    m = _vec_blocks(mask.reshape(B, hw), pad_value=1.0)
    R, L = x.shape[1], x.shape[2]

    row_bytes = 2 * 4 * L * (2 * B)
    TR = _pick_rows(R, row_bytes, _SMALL_BUDGET)
    nt = R // TR

    blk = pl.BlockSpec((B, TR, L), lambda t: (0, t, 0))
    acc_spec = pl.BlockSpec((B, 1, L), lambda t: (0, 0, 0))
    acc_shape = jax.ShapeDtypeStruct((B, 1, L), jnp.float32)

    a, b, c = pl.pallas_call(
        _dice_kernel,
        grid=(nt,),
        in_specs=[blk, blk],
        out_specs=(acc_spec, acc_spec, acc_spec),
        out_shape=(acc_shape, acc_shape, acc_shape),
        compiler_params=_params("arbitrary"),
    )(x, m)
    a = jnp.sum(a, axis=(1, 2))
    b = jnp.sum(b, axis=(1, 2))
    c = jnp.sum(c, axis=(1, 2))
    d = 2.0 * a / ((b + 0.001) + (c + 0.001))
    return 1.0 - jnp.mean(d)


def _space_to_depth(x):
    """(N, H, W, C) -> (N, H/2, W/2, 4C), channel order (dh, dw, c)."""
    N, H, W, C = x.shape
    x = x.reshape(N, H // 2, 2, W // 2, 2, C)
    x = jnp.transpose(x, (0, 1, 3, 2, 4, 5))
    return x.reshape(N, H // 2, W // 2, 4 * C)


def _pick_group(m_rows, n_out):
    """Pick a power-of-two spatial group so the conv output is >=128 lanes wide."""
    g = 1
    while g * n_out < _LANES and m_rows % (g * 2) == 0:
        g *= 2
    return g


def patch_conv(x_nhwc, w, b, act):
    """2x2/stride-2 conv as a grouped, lane-dense Pallas matmul (NHWC->NHWC)."""
    N, H, W, C = x_nhwc.shape
    H2, W2 = H // 2, W // 2
    n_out = w.shape[1]
    M = N * H2 * W2
    g = _pick_group(M, n_out)

    p = _space_to_depth(x_nhwc).reshape(M // g, g * 4 * C)   # contiguous regroup
    Mg, Kg = p.shape
    Ng = g * n_out

    use_bf16 = (Mg % 16 == 0)             # 16-aligned sublanes for packed dtype
    cdt = jnp.bfloat16 if use_bf16 else jnp.float32
    align = 16 if use_bf16 else 8
    p = p.astype(cdt)
    wg = jnp.kron(jnp.eye(g, dtype=jnp.float32), w).astype(cdt)   # (Kg, Ng)
    bg = jnp.tile(b, (1, g))                                      # (1, Ng)

    dtb = 2 if use_bf16 else 4
    row_bytes = 2 * (_pad_up(Kg, _LANES) * dtb + _pad_up(Ng, _LANES) * 4)
    resident = 4 * (_pad_up(Kg, 8) * _pad_up(Ng, _LANES) * dtb
                    + _pad_up(Ng, _LANES) * 4)
    Tm = _pick_rows(Mg, row_bytes, max(1 << 20, _BIG_BUDGET - resident), align)

    out = pl.pallas_call(
        functools.partial(_mm_bias_act_kernel, act=act),
        grid=(Mg // Tm,),
        in_specs=[pl.BlockSpec((Tm, Kg), lambda i: (i, 0)),
                  pl.BlockSpec((Kg, Ng), lambda i: (0, 0)),
                  pl.BlockSpec((1, Ng), lambda i: (0, 0))],
        out_specs=pl.BlockSpec((Tm, Ng), lambda i: (i, 0)),
        out_shape=jax.ShapeDtypeStruct((Mg, Ng), jnp.float32),
        compiler_params=_params("parallel"),
    )(p, wg, bg)
    return out.reshape(N, H2, W2, n_out)     # contiguous: free metadata reshape


def discriminator_sums(x_nhwc, dp):
    """Fully fused discriminator on a (2B, H, W, C) stacked [real, fake] input.

    Returns raw per-half sums of the 1x1 head output (bias excluded)."""
    N2, H, W, C = x_nhwc.shape
    H8, W8 = H // 8, W // 8
    p = _space_to_depth(_space_to_depth(_space_to_depth(x_nhwc)))  # (N2,H8,W8,64C)
    p = p.reshape(N2 * H8 * W8, 64 * C)
    M, K = p.shape
    Mh = M // 2

    use_bf16 = (Mh % 16 == 0)
    cdt = jnp.bfloat16 if use_bf16 else jnp.float32
    align = 16 if use_bf16 else 8
    p = p.astype(cdt)
    w1g = jnp.kron(jnp.eye(16, dtype=jnp.float32), dp["w1"]).astype(cdt)  # (64C,128)
    b1g = jnp.tile(dp["b1"], (1, 16))
    w2g = jnp.kron(jnp.eye(4, dtype=jnp.float32), dp["w2"]).astype(cdt)   # (128,64)
    b2g = jnp.tile(dp["b2"], (1, 4))
    w3 = dp["w3"].astype(cdt)
    b3 = dp["b3"]
    whT = dp["wh"].T                                                      # (1,16)

    dtb = 2 if use_bf16 else 4
    row_bytes = 2 * _pad_up(K, _LANES) * dtb
    Tm = _pick_rows(Mh, row_bytes, _SMALL_BUDGET, align)
    nb = Mh // Tm

    const = lambda shape: pl.BlockSpec(shape, lambda s, i: (0, 0))
    sums = pl.pallas_call(
        _disc_kernel,
        grid=(2, nb),
        in_specs=[pl.BlockSpec((Tm, K), lambda s, i: (s * nb + i, 0)),
                  const(w1g.shape), const(b1g.shape),
                  const(w2g.shape), const(b2g.shape),
                  const(w3.shape), const(b3.shape), const(whT.shape)],
        out_specs=pl.BlockSpec((1, 1, 1), lambda s, i: (s, 0, 0)),
        out_shape=jax.ShapeDtypeStruct((2, 1, 1), jnp.float32),
        compiler_params=_params("parallel", "arbitrary"),
    )(p, w1g, b1g, w2g, b2g, w3, b3, whT)
    return sums[0, 0, 0], sums[1, 0, 0]


def feat_loss_sums(feat, B):
    """Fused perceptual + style sums for one feature level.

    feat: (3B, Hl, Wl, Cl) stacked [comp, out, gt] features.
    Returns (sum|fo-fg|, sum|fc-fg|, sum|gram_o-gram_g|, sum|gram_c-gram_g|)
    with grams un-normalized."""
    _, Hl, Wl, Cl = feat.shape
    HW = Hl * Wl
    fv = feat.reshape(3, B, HW, Cl)

    row_bytes = 2 * 3 * _pad_up(Cl, _LANES) * 4
    T = _pick_rows(HW, row_bytes, _SMALL_BUDGET)
    nt = HW // T

    def spec(k):
        return pl.BlockSpec((None, None, T, Cl), lambda b, t, _k=k: (_k, b, t, 0))

    acc_spec = pl.BlockSpec((1, 1, 1), lambda b, t: (b, 0, 0))
    acc_shape = jax.ShapeDtypeStruct((B, 1, 1), jnp.float32)

    po, pc, so, sc = pl.pallas_call(
        _feat_loss_kernel,
        grid=(B, nt),
        in_specs=[spec(0), spec(1), spec(2)],
        out_specs=(acc_spec, acc_spec, acc_spec, acc_spec),
        out_shape=(acc_shape, acc_shape, acc_shape, acc_shape),
        scratch_shapes=[pltpu.VMEM((Cl, Cl), jnp.float32)] * 3,
        compiler_params=_params("parallel", "arbitrary"),
    )(fv, fv, fv)
    return jnp.sum(po), jnp.sum(pc), jnp.sum(so), jnp.sum(sc)


# --------------------------------------------------------------------------
# Synthetic extractor / discriminator parameters (stand-ins for the injected
# pretrained VGG-like `extractor` and Discriminator_STE).
# --------------------------------------------------------------------------
def init_params(key):
    ks = jax.random.split(key, 7)

    def w(k, kin, kout):
        return (0.1 * jax.random.normal(k, (kin, kout))).astype(jnp.float32)

    ext = {
        "w1": w(ks[0], 12, 8),  "b1": jnp.zeros((1, 8), jnp.float32),
        "w2": w(ks[1], 32, 16), "b2": jnp.zeros((1, 16), jnp.float32),
        "w3": w(ks[2], 64, 32), "b3": jnp.zeros((1, 32), jnp.float32),
    }
    disc = {
        "w1": w(ks[3], 12, 8),  "b1": jnp.zeros((1, 8), jnp.float32),
        "w2": w(ks[4], 32, 16), "b2": jnp.zeros((1, 16), jnp.float32),
        "w3": w(ks[5], 64, 16), "b3": jnp.zeros((1, 16), jnp.float32),
        "wh": w(ks[6], 16, 1),  "bh": jnp.zeros((1, 1), jnp.float32),
    }
    return {"ext": ext, "disc": disc}


def _to_nhwc(x):
    return jnp.transpose(x, (0, 2, 3, 1))


# --------------------------------------------------------------------------
# LossWithGAN_STE.forward
# --------------------------------------------------------------------------
@jax.jit
def loss_with_gan_ste_forward(params, inp, mask, x_o1, x_o2, x_o3, output, mm_in, gt):
    ep, dp = params["ext"], params["disc"]
    B, C, H, W = inp.shape
    assert H % 8 == 0 and W % 8 == 0, "nearest-downsample / disc strides need /8"

    # --- fused composite + hole/valid + x_o3 msr sums ------------------------
    output_comp, s_hole, s_valid, s3_hole, s3_valid = comp_and_l1(
        inp, output, x_o3, gt, mask)
    n_full = float(B * C * H * W)
    holeLoss = 10.0 * s_hole / n_full
    validAreaLoss = 2.0 * s_valid / n_full
    mask_loss = dice_loss_fn(mm_in, mask)

    # F.interpolate(..., scale_factor={0.25, 0.5}) with default nearest mode
    masks_b = mask[:, :, ::2, ::2]
    imgs2 = gt[:, :, ::2, ::2]
    masks_a = mask[:, :, ::4, ::4]
    imgs1 = gt[:, :, ::4, ::4]

    s2_m, s2_u = masked_l1_pair_sums(x_o2, imgs2, masks_b)
    s1_m, s1_u = masked_l1_pair_sums(x_o1, imgs1, masks_a)
    msrloss = ((8.0 * s3_hole + 0.8 * s3_valid) / n_full
               + (6.0 * s2_u + 1.0 * s2_m) / float(x_o2.size)
               + (5.0 * s1_u + 0.8 * s1_m) / float(x_o1.size))

    # --- discriminator path (real & fake fused into one kernel) --------------
    mask_nhwc = _to_nhwc(mask)
    d_in = jnp.concatenate([_to_nhwc(gt) * mask_nhwc,
                            _to_nhwc(output) * mask_nhwc], axis=0)   # one fused copy
    sum_real, sum_fake = discriminator_sums(d_in, dp)
    n_head = float(B * (H // 8) * (W // 8))
    bh = dp["bh"][0, 0]
    D_real = -(sum_real / n_head + bh)
    D_fake_mean = sum_fake / n_head + bh
    D_loss = jax.nn.relu(1.0 + D_real) + jax.nn.relu(1.0 + D_fake_mean)
    # TODO(synk): D_loss.backward() + Adam step on the discriminator and the
    # SummaryWriter logging are training-time side effects, not part of the
    # returned value; they are intentionally not replicated here.
    del D_loss
    D_fake = -D_fake_mean

    # --- perceptual / style losses (extractor runs once on a 3B stack) -------
    stacked = jnp.concatenate([output_comp, output, gt], axis=0)      # (3B,C,H,W)
    fx = _to_nhwc(stacked)                                            # one fused copy
    f1 = patch_conv(fx, ep["w1"], ep["b1"], "relu")                   # (3B,H/2,W/2, 8)
    f2 = patch_conv(f1, ep["w2"], ep["b2"], "relu")                   # (3B,H/4,W/4,16)
    f3 = patch_conv(f2, ep["w3"], ep["b3"], "relu")                   # (3B,H/8,W/8,32)

    prcLoss = 0.0
    styleLoss = 0.0
    for f in (f1, f2, f3):
        _, Hl, Wl, Cl = f.shape
        po, pc, so, sc = feat_loss_sums(f, B)
        prcLoss += 0.01 * (po + pc) / float(B * Hl * Wl * Cl)
        gram_denom = float(Cl * Hl * Wl)
        styleLoss += 120.0 * (so + sc) / (gram_denom * float(B * Cl * Cl))

    GLoss = (msrloss + holeLoss + validAreaLoss + prcLoss + styleLoss
             + 0.1 * D_fake + 1.0 * mask_loss)
    return jnp.sum(GLoss)


# --------------------------------------------------------------------------
if __name__ == "__main__":
    key = jax.random.PRNGKey(0)
    B, C, H, W = 2, 3, 16, 16
    ks = jax.random.split(key, 9)

    inp = jax.random.normal(ks[0], (B, C, H, W), jnp.float32)
    mask = (jax.random.uniform(ks[1], (B, 1, H, W)) > 0.5).astype(jnp.float32)
    x_o1 = jax.random.normal(ks[2], (B, C, H // 4, W // 4), jnp.float32)
    x_o2 = jax.random.normal(ks[3], (B, C, H // 2, W // 2), jnp.float32)
    x_o3 = jax.random.normal(ks[4], (B, C, H, W), jnp.float32)
    output = jax.random.normal(ks[5], (B, C, H, W), jnp.float32)
    mm_in = jax.random.normal(ks[6], (B, 1, H, W), jnp.float32)
    gt = jax.random.normal(ks[7], (B, C, H, W), jnp.float32)

    params = init_params(ks[8])

    gloss = loss_with_gan_ste_forward(params, inp, mask, x_o1, x_o2, x_o3,
                                      output, mm_in, gt)
    jax.block_until_ready(gloss)
    assert gloss.shape == () and bool(jnp.isfinite(gloss))
    print("KERNEL_OK")
</pallas_src>

<mosaic_0001>
module attributes {stable_mosaic.version = 11 : i64} {
  func.func @_comp_msr_kernel(%arg0: i32, %arg1: i32, %arg2: memref<2x3x2x128xf32, #tpu.memory_space<vmem>>, %arg3: memref<2x3x2x128xf32, #tpu.memory_space<vmem>>, %arg4: memref<2x3x2x128xf32, #tpu.memory_space<vmem>>, %arg5: memref<2x3x2x128xf32, #tpu.memory_space<vmem>>, %arg6: memref<2x1x2x128xf32, #tpu.memory_space<vmem>>, %arg7: memref<2x3x2x128xf32, #tpu.memory_space<vmem>>, %arg8: memref<1x1x128xf32, #tpu.memory_space<vmem>>, %arg9: memref<1x1x128xf32, #tpu.memory_space<vmem>>, %arg10: memref<1x1x128xf32, #tpu.memory_space<vmem>>, %arg11: memref<1x1x128xf32, #tpu.memory_space<vmem>>) attributes {dimension_semantics = [#tpu.dimension_semantics<parallel>, #tpu.dimension_semantics<arbitrary>], iteration_bounds = array<i64: 1, 1>, scalar_prefetch = 0 : i64, scratch_operands = 0 : i64, tpu.core_type = #tpu.core_type<tc>, window_params = [{transform_indices = @transform_0, window_bounds = array<i64: 2, 3, 2, 128>}, {transform_indices = @transform_1, window_bounds = array<i64: 2, 3, 2, 128>}, {transform_indices = @transform_2, window_bounds = array<i64: 2, 3, 2, 128>}, {transform_indices = @transform_3, window_bounds = array<i64: 2, 3, 2, 128>}, {transform_indices = @transform_4, window_bounds = array<i64: 2, 1, 2, 128>}, {transform_indices = @transform_5, window_bounds = array<i64: 2, 3, 2, 128>}, {transform_indices = @transform_6, window_bounds = array<i64: 1, 1, 128>}, {transform_indices = @transform_7, window_bounds = array<i64: 1, 1, 128>}, {transform_indices = @transform_8, window_bounds = array<i64: 1, 1, 128>}, {transform_indices = @transform_9, window_bounds = array<i64: 1, 1, 128>}]} {
    %c0_i32 = arith.constant 0 : i32
    %0 = arith.cmpi eq, %arg1, %c0_i32 : i32
    %1 = arith.extui %0 : i1 to i32
    %c0_i32_0 = arith.constant 0 : i32
    %2 = arith.cmpi ne, %1, %c0_i32_0 : i32
    scf.if %2 {
      %cst_56 = arith.constant 0.000000e+00 : f32
      %54 = vector.broadcast %cst_56 : f32 to vector<1x1x128xf32>
      %c0_57 = arith.constant 0 : index
      %c0_58 = arith.constant 0 : index
      %c0_59 = arith.constant 0 : index
      %55 = vector.load %arg8[%c0_57, %c0_58, %c0_59] : memref<1x1x128xf32, #tpu.memory_space<vmem>>, vector<1x1x128xf32>
      tpu.vector_store %arg8[%c0_57, %c0_58, %c0_59], %54 {strides = array<i32>} : memref<1x1x128xf32, #tpu.memory_space<vmem>>, vector<1x1x128xf32>,
      %cst_60 = arith.constant 0.000000e+00 : f32
      %56 = vector.broadcast %cst_60 : f32 to vector<1x1x128xf32>
      %c0_61 = arith.constant 0 : index
      %c0_62 = arith.constant 0 : index
      %c0_63 = arith.constant 0 : index
      %57 = vector.load %arg9[%c0_61, %c0_62, %c0_63] : memref<1x1x128xf32, #tpu.memory_space<vmem>>, vector<1x1x128xf32>
      tpu.vector_store %arg9[%c0_61, %c0_62, %c0_63], %56 {strides = array<i32>} : memref<1x1x128xf32, #tpu.memory_space<vmem>>, vector<1x1x128xf32>,
      %cst_64 = arith.constant 0.000000e+00 : f32
      %58 = vector.broadcast %cst_64 : f32 to vector<1x1x128xf32>
      %c0_65 = arith.constant 0 : index
      %c0_66 = arith.constant 0 : index
      %c0_67 = arith.constant 0 : index
      %59 = vector.load %arg10[%c0_65, %c0_66, %c0_67] : memref<1x1x128xf32, #tpu.memory_space<vmem>>, vector<1x1x128xf32>
      tpu.vector_store %arg10[%c0_65, %c0_66, %c0_67], %58 {strides = array<i32>} : memref<1x1x128xf32, #tpu.memory_space<vmem>>, vector<1x1x128xf32>,
      %cst_68 = arith.constant 0.000000e+00 : f32
      %60 = vector.broadcast %cst_68 : f32 to vector<1x1x128xf32>
      %c0_69 = arith.constant 0 : index
      %c0_70 = arith.constant 0 : index
      %c0_71 = arith.constant 0 : index
      %61 = vector.load %arg11[%c0_69, %c0_70, %c0_71] : memref<1x1x128xf32, #tpu.memory_space<vmem>>, vector<1x1x128xf32>
      tpu.vector_store %arg11[%c0_69, %c0_70, %c0_71], %60 {strides = array<i32>} : memref<1x1x128xf32, #tpu.memory_space<vmem>>, vector<1x1x128xf32>,
    } else {
    }
    %c0 = arith.constant 0 : index
    %c0_1 = arith.constant 0 : index
    %c0_2 = arith.constant 0 : index
    %c0_3 = arith.constant 0 : index
    %3 = vector.load %arg6[%c0, %c0_1, %c0_2, %c0_3] : memref<2x1x2x128xf32, #tpu.memory_space<vmem>>, vector<2x1x2x128xf32>
    %c0_4 = arith.constant 0 : index
    %c0_5 = arith.constant 0 : index
    %c0_6 = arith.constant 0 : index
    %c0_7 = arith.constant 0 : index
    %4 = vector.load %arg3[%c0_4, %c0_5, %c0_6, %c0_7] : memref<2x3x2x128xf32, #tpu.memory_space<vmem>>, vector<2x3x2x128xf32>
    %c0_8 = arith.constant 0 : index
    %c0_9 = arith.constant 0 : index
    %c0_10 = arith.constant 0 : index
    %c0_11 = arith.constant 0 : index
    %5 = vector.load %arg5[%c0_8, %c0_9, %c0_10, %c0_11] : memref<2x3x2x128xf32, #tpu.memory_space<vmem>>, vector<2x3x2x128xf32>
    %c0_12 = arith.constant 0 : index
    %c0_13 = arith.constant 0 : index
    %c0_14 = arith.constant 0 : index
    %c0_15 = arith.constant 0 : index
    %6 = vector.load %arg2[%c0_12, %c0_13, %c0_14, %c0_15] : memref<2x3x2x128xf32, #tpu.memory_space<vmem>>, vector<2x3x2x128xf32>
    %7 = vector.broadcast %3 : vector<2x1x2x128xf32> to vector<2x3x2x128xf32>
    %8 = arith.mulf %7, %6 : vector<2x3x2x128xf32>
    %cst = arith.constant 1.000000e+00 : f32
    %9 = vector.broadcast %cst : f32 to vector<2x1x2x128xf32>
    %10 = arith.subf %9, %3 : vector<2x1x2x128xf32>
    %11 = vector.broadcast %10 : vector<2x1x2x128xf32> to vector<2x3x2x128xf32>
    %12 = arith.mulf %11, %4 : vector<2x3x2x128xf32>
    %13 = arith.addf %8, %12 : vector<2x3x2x128xf32>
    %c0_16 = arith.constant 0 : index
    %c0_17 = arith.constant 0 : index
    %c0_18 = arith.constant 0 : index
    %c0_19 = arith.constant 0 : index
    %14 = vector.load %arg7[%c0_16, %c0_17, %c0_18, %c0_19] : memref<2x3x2x128xf32, #tpu.memory_space<vmem>>, vector<2x3x2x128xf32>
    tpu.vector_store %arg7[%c0_16, %c0_17, %c0_18, %c0_19], %13 {strides = array<i32>} : memref<2x3x2x128xf32, #tpu.memory_space<vmem>>, vector<2x3x2x128xf32>,
    %15 = arith.subf %4, %5 : vector<2x3x2x128xf32>
    %16 = math.absf %15 : vector<2x3x2x128xf32>
    %17 = vector.broadcast %3 : vector<2x1x2x128xf32> to vector<2x3x2x128xf32>
    %18 = arith.mulf %17, %16 : vector<2x3x2x128xf32>
    %c0_20 = arith.constant 0 : index
    %c0_21 = arith.constant 0 : index
    %c0_22 = arith.constant 0 : index
    %19 = vector.load %arg9[%c0_20, %c0_21, %c0_22] : memref<1x1x128xf32, #tpu.memory_space<vmem>>, vector<1x1x128xf32>
    %cst_23 = arith.constant dense<0.000000e+00> : vector<2x128xf32>
    %20 = vector.multi_reduction <add>, %18, %cst_23 [0, 1] : vector<2x3x2x128xf32> to vector<2x128xf32>
    %cst_24 = arith.constant dense<0.000000e+00> : vector<128xf32>
    %21 = vector.multi_reduction <add>, %20, %cst_24 [0] : vector<2x128xf32> to vector<128xf32>
    %22 = vector.shape_cast %21 : vector<128xf32> to vector<1x128xf32>
    %23 = vector.shape_cast %22 : vector<1x128xf32> to vector<1x1x128xf32>
    %24 = arith.addf %19, %23 : vector<1x1x128xf32>
    %c0_25 = arith.constant 0 : index
    %c0_26 = arith.constant 0 : index
    %c0_27 = arith.constant 0 : index
    %25 = vector.load %arg9[%c0_25, %c0_26, %c0_27] : memref<1x1x128xf32, #tpu.memory_space<vmem>>, vector<1x1x128xf32>
    tpu.vector_store %arg9[%c0_25, %c0_26, %c0_27], %24 {strides = array<i32>} : memref<1x1x128xf32, #tpu.memory_space<vmem>>, vector<1x1x128xf32>,
    %c0_28 = arith.constant 0 : index
    %c0_29 = arith.constant 0 : index
    %c0_30 = arith.constant 0 : index
    %26 = vector.load %arg8[%c0_28, %c0_29, %c0_30] : memref<1x1x128xf32, #tpu.memory_space<vmem>>, vector<1x1x128xf32>
    %27 = arith.subf %16, %18 : vector<2x3x2x128xf32>
    %cst_31 = arith.constant dense<0.000000e+00> : vector<2x128xf32>
    %28 = vector.multi_reduction <add>, %27, %cst_31 [0, 1] : vector<2x3x2x128xf32> to vector<2x128xf32>
    %cst_32 = arith.constant dense<0.000000e+00> : vector<128xf32>
    %29 = vector.multi_reduction <add>, %28, %cst_32 [0] : vector<2x128xf32> to vector<128xf32>
    %30 = vector.shape_cast %29 : vector<128xf32> to vector<1x128xf32>
    %31 = vector.shape_cast %30 : vector<1x128xf32> to vector<1x1x128xf32>
    %32 = arith.addf %26, %31 : vector<1x1x128xf32>
    %c0_33 = arith.constant 0 : index
    %c0_34 = arith.constant 0 : index
    %c0_35 = arith.constant 0 : index
    %33 = vector.load %arg8[%c0_33, %c0_34, %c0_35] : memref<1x1x128xf32, #tpu.memory_space<vmem>>, vector<1x1x128xf32>
    tpu.vector_store %arg8[%c0_33, %c0_34, %c0_35], %32 {strides = array<i32>} : memref<1x1x128xf32, #tpu.memory_space<vmem>>, vector<1x1x128xf32>,
    %c0_36 = arith.constant 0 : index
    %c0_37 = arith.constant 0 : index
    %c0_38 = arith.constant 0 : index
    %c0_39 = arith.constant 0 : index
    %34 = vector.load %arg4[%c0_36, %c0_37, %c0_38, %c0_39] : memref<2x3x2x128xf32, #tpu.memory_space<vmem>>, vector<2x3x2x128xf32>
    %35 = arith.subf %34, %5 : vector<2x3x2x128xf32>
    %36 = math.absf %35 : vector<2x3x2x128xf32>
    %37 = vector.broadcast %3 : vector<2x1x2x128xf32> to vector<2x3x2x128xf32>
    %38 = arith.mulf %37, %36 : vector<2x3x2x128xf32>
    %c0_40 = arith.constant 0 : index
    %c0_41 = arith.constant 0 : index
    %c0_42 = arith.constant 0 : index
    %39 = vector.load %arg11[%c0_40, %c0_41, %c0_42] : memref<1x1x128xf32, #tpu.memory_space<vmem>>, vector<1x1x128xf32>
    %cst_43 = arith.constant dense<0.000000e+00> : vector<2x128xf32>
    %40 = vector.multi_reduction <add>, %38, %cst_43 [0, 1] : vector<2x3x2x128xf32> to vector<2x128xf32>
    %cst_44 = arith.constant dense<0.000000e+00> : vector<128xf32>
    %41 = vector.multi_reduction <add>, %40, %cst_44 [0] : vector<2x128xf32> to vector<128xf32>
    %42 = vector.shape_cast %41 : vector<128xf32> to vector<1x128xf32>
    %43 = vector.shape_cast %42 : vector<1x128xf32> to vector<1x1x128xf32>
    %44 = arith.addf %39, %43 : vector<1x1x128xf32>
    %c0_45 = arith.constant 0 : index
    %c0_46 = arith.constant 0 : index
    %c0_47 = arith.constant 0 : index
    %45 = vector.load %arg11[%c0_45, %c0_46, %c0_47] : memref<1x1x128xf32, #tpu.memory_space<vmem>>, vector<1x1x128xf32>
    tpu.vector_store %arg11[%c0_45, %c0_46, %c0_47], %44 {strides = array<i32>} : memref<1x1x128xf32, #tpu.memory_space<vmem>>, vector<1x1x128xf32>,
    %c0_48 = arith.constant 0 : index
    %c0_49 = arith.constant 0 : index
    %c0_50 = arith.constant 0 : index
    %46 = vector.load %arg10[%c0_48, %c0_49, %c0_50] : memref<1x1x128xf32, #tpu.memory_space<vmem>>, vector<1x1x128xf32>
    %47 = arith.subf %36, %38 : vector<2x3x2x128xf32>
    %cst_51 = arith.constant dense<0.000000e+00> : vector<2x128xf32>
    %48 = vector.multi_reduction <add>, %47, %cst_51 [0, 1] : vector<2x3x2x128xf32> to vector<2x128xf32>
    %cst_52 = arith.constant dense<0.000000e+00> : vector<128xf32>
    %49 = vector.multi_reduction <add>, %48, %cst_52 [0] : vector<2x128xf32> to vector<128xf32>
    %50 = vector.shape_cast %49 : vector<128xf32> to vector<1x128xf32>
    %51 = vector.shape_cast %50 : vector<1x128xf32> to vector<1x1x128xf32>
    %52 = arith.addf %46, %51 : vector<1x1x128xf32>
    %c0_53 = arith.constant 0 : index
    %c0_54 = arith.constant 0 : index
    %c0_55 = arith.constant 0 : index
    %53 = vector.load %arg10[%c0_53, %c0_54, %c0_55] : memref<1x1x128xf32, #tpu.memory_space<vmem>>, vector<1x1x128xf32>
    tpu.vector_store %arg10[%c0_53, %c0_54, %c0_55], %52 {strides = array<i32>} : memref<1x1x128xf32, #tpu.memory_space<vmem>>, vector<1x1x128xf32>,
    return
  }
  func.func @transform_0(%arg0: i32, %arg1: i32) -> (i32, i32, i32, i32) {
    %c1_i32 = arith.constant 1 : i32
    %0 = arith.muli %arg0, %c1_i32 : i32
    %1 = arith.addi %0, %arg1 : i32
    %c0_i32 = arith.constant 0 : i32
    %c0_i32_0 = arith.constant 0 : i32
    %c0_i32_1 = arith.constant 0 : i32
    %c0_i32_2 = arith.constant 0 : i32
    return %c0_i32, %c0_i32_0, %1, %c0_i32_1 : i32, i32, i32, i32
  }
  func.func @transform_1(%arg0: i32, %arg1: i32) -> (i32, i32, i32, i32) {
    %c1_i32 = arith.constant 1 : i32
    %0 = arith.muli %arg0, %c1_i32 : i32
    %1 = arith.addi %0, %arg1 : i32
    %c0_i32 = arith.constant 0 : i32
    %c0_i32_0 = arith.constant 0 : i32
    %c0_i32_1 = arith.constant 0 : i32
    %c0_i32_2 = arith.constant 0 : i32
    return %c0_i32, %c0_i32_0, %1, %c0_i32_1 : i32, i32, i32, i32
  }
  func.func @transform_2(%arg0: i32, %arg1: i32) -> (i32, i32, i32, i32) {
    %c1_i32 = arith.constant 1 : i32
    %0 = arith.muli %arg0, %c1_i32 : i32
    %1 = arith.addi %0, %arg1 : i32
    %c0_i32 = arith.constant 0 : i32
    %c0_i32_0 = arith.constant 0 : i32
    %c0_i32_1 = arith.constant 0 : i32
    %c0_i32_2 = arith.constant 0 : i32
    return %c0_i32, %c0_i32_0, %1, %c0_i32_1 : i32, i32, i32, i32
  }
  func.func @transform_3(%arg0: i32, %arg1: i32) -> (i32, i32, i32, i32) {
    %c1_i32 = arith.constant 1 : i32
    %0 = arith.muli %arg0, %c1_i32 : i32
    %1 = arith.addi %0, %arg1 : i32
    %c0_i32 = arith.constant 0 : i32
    %c0_i32_0 = arith.constant 0 : i32
    %c0_i32_1 = arith.constant 0 : i32
    %c0_i32_2 = arith.constant 0 : i32
    return %c0_i32, %c0_i32_0, %1, %c0_i32_1 : i32, i32, i32, i32
  }
  func.func @transform_4(%arg0: i32, %arg1: i32) -> (i32, i32, i32, i32) {
    %c1_i32 = arith.constant 1 : i32
    %0 = arith.muli %arg0, %c1_i32 : i32
    %1 = arith.addi %0, %arg1 : i32
    %c0_i32 = arith.constant 0 : i32
    %c0_i32_0 = arith.constant 0 : i32
    %c0_i32_1 = arith.constant 0 : i32
    %c0_i32_2 = arith.constant 0 : i32
    return %c0_i32, %c0_i32_0, %1, %c0_i32_1 : i32, i32, i32, i32
  }
  func.func @transform_5(%arg0: i32, %arg1: i32) -> (i32, i32, i32, i32) {
    %c1_i32 = arith.constant 1 : i32
    %0 = arith.muli %arg0, %c1_i32 : i32
    %1 = arith.addi %0, %arg1 : i32
    %c0_i32 = arith.constant 0 : i32
    %c0_i32_0 = arith.constant 0 : i32
    %c0_i32_1 = arith.constant 0 : i32
    %c0_i32_2 = arith.constant 0 : i32
    return %c0_i32, %c0_i32_0, %1, %c0_i32_1 : i32, i32, i32, i32
  }
  func.func @transform_6(%arg0: i32, %arg1: i32) -> (i32, i32, i32) {
    %c0_i32 = arith.constant 0 : i32
    %c0_i32_0 = arith.constant 0 : i32
    %c0_i32_1 = arith.constant 0 : i32
    return %arg0, %c0_i32, %c0_i32_0 : i32, i32, i32
  }
  func.func @transform_7(%arg0: i32, %arg1: i32) -> (i32, i32, i32) {
    %c0_i32 = arith.constant 0 : i32
    %c0_i32_0 = arith.constant 0 : i32
    %c0_i32_1 = arith.constant 0 : i32
    return %arg0, %c0_i32, %c0_i32_0 : i32, i32, i32
  }
  func.func @transform_8(%arg0: i32, %arg1: i32) -> (i32, i32, i32) {
    %c0_i32 = arith.constant 0 : i32
    %c0_i32_0 = arith.constant 0 : i32
    %c0_i32_1 = arith.constant 0 : i32
    return %arg0, %c0_i32, %c0_i32_0 : i32, i32, i32
  }
  func.func @transform_9(%arg0: i32, %arg1: i32) -> (i32, i32, i32) {
    %c0_i32 = arith.constant 0 : i32
    %c0_i32_0 = arith.constant 0 : i32
    %c0_i32_1 = arith.constant 0 : i32
    return %arg0, %c0_i32, %c0_i32_0 : i32, i32, i32
  }
}

module attributes {stable_mosaic.version = 11 : i64} {
  func.func @_masked_l1_pair_kernel(%arg0: i32, %arg1: i32, %arg2: memref<2x3x1x128xf32, #tpu.memory_space<vmem>>, %arg3: memref<2x3x1x128xf32, #tpu.memory_space<vmem>>, %arg4: memref<2x1x1x128xf32, #tpu.memory_space<vmem>>, %arg5: memref<1x1x128xf32, #tpu.memory_space<vmem>>, %arg6: memref<1x1x128xf32, #tpu.memory_space<vmem>>) attributes {dimension_semantics = [#tpu.dimension_semantics<parallel>, #tpu.dimension_semantics<arbitrary>], iteration_bounds = array<i64: 1, 1>, scalar_prefetch = 0 : i64, scratch_operands = 0 : i64, tpu.core_type = #tpu.core_type<tc>, window_params = [{transform_indices = @transform_0, window_bounds = array<i64: 2, 3, 1, 128>}, {transform_indices = @transform_1, window_bounds = array<i64: 2, 3, 1, 128>}, {transform_indices = @transform_2, window_bounds = array<i64: 2, 1, 1, 128>}, {transform_indices = @transform_3, window_bounds = array<i64: 1, 1, 128>}, {transform_indices = @transform_4, window_bounds = array<i64: 1, 1, 128>}]} {
    %c0_i32 = arith.constant 0 : i32
    %0 = arith.cmpi eq, %arg1, %c0_i32 : i32
    %1 = arith.extui %0 : i1 to i32
    %c0_i32_0 = arith.constant 0 : i32
    %2 = arith.cmpi ne, %1, %c0_i32_0 : i32
    scf.if %2 {
      %cst_27 = arith.constant 0.000000e+00 : f32
      %25 = vector.broadcast %cst_27 : f32 to vector<1x1x128xf32>
      %c0_28 = arith.constant 0 : index
      %c0_29 = arith.constant 0 : index
      %c0_30 = arith.constant 0 : index
      %26 = vector.load %arg5[%c0_28, %c0_29, %c0_30] : memref<1x1x128xf32, #tpu.memory_space<vmem>>, vector<1x1x128xf32>
      tpu.vector_store %arg5[%c0_28, %c0_29, %c0_30], %25 {strides = array<i32>} : memref<1x1x128xf32, #tpu.memory_space<vmem>>, vector<1x1x128xf32>,
      %cst_31 = arith.constant 0.000000e+00 : f32
      %27 = vector.broadcast %cst_31 : f32 to vector<1x1x128xf32>
      %c0_32 = arith.constant 0 : index
      %c0_33 = arith.constant 0 : index
      %c0_34 = arith.constant 0 : index
      %28 = vector.load %arg6[%c0_32, %c0_33, %c0_34] : memref<1x1x128xf32, #tpu.memory_space<vmem>>, vector<1x1x128xf32>
      tpu.vector_store %arg6[%c0_32, %c0_33, %c0_34], %27 {strides = array<i32>} : memref<1x1x128xf32, #tpu.memory_space<vmem>>, vector<1x1x128xf32>,
    } else {
    }
    %c0 = arith.constant 0 : index
    %c0_1 = arith.constant 0 : index
    %c0_2 = arith.constant 0 : index
    %c0_3 = arith.constant 0 : index
    %3 = vector.load %arg2[%c0, %c0_1, %c0_2, %c0_3] : memref<2x3x1x128xf32, #tpu.memory_space<vmem>>, vector<2x3x1x128xf32>
    %c0_4 = arith.constant 0 : index
    %c0_5 = arith.constant 0 : index
    %c0_6 = arith.constant 0 : index
    %c0_7 = arith.constant 0 : index
    %4 = vector.load %arg3[%c0_4, %c0_5, %c0_6, %c0_7] : memref<2x3x1x128xf32, #tpu.memory_space<vmem>>, vector<2x3x1x128xf32>
    %5 = arith.subf %3, %4 : vector<2x3x1x128xf32>
    %6 = math.absf %5 : vector<2x3x1x128xf32>
    %c0_8 = arith.constant 0 : index
    %c0_9 = arith.constant 0 : index
    %c0_10 = arith.constant 0 : index
    %c0_11 = arith.constant 0 : index
    %7 = vector.load %arg4[%c0_8, %c0_9, %c0_10, %c0_11] : memref<2x1x1x128xf32, #tpu.memory_space<vmem>>, vector<2x1x1x128xf32>
    %8 = vector.broadcast %7 : vector<2x1x1x128xf32> to vector<2x3x1x128xf32>
    %9 = arith.mulf %8, %6 : vector<2x3x1x128xf32>
    %c0_12 = arith.constant 0 : index
    %c0_13 = arith.constant 0 : index
    %c0_14 = arith.constant 0 : index
    %10 = vector.load %arg5[%c0_12, %c0_13, %c0_14] : memref<1x1x128xf32, #tpu.memory_space<vmem>>, vector<1x1x128xf32>
    %cst = arith.constant dense<0.000000e+00> : vector<1x128xf32>
    %11 = vector.multi_reduction <add>, %9, %cst [0, 1] : vector<2x3x1x128xf32> to vector<1x128xf32>
    %cst_15 = arith.constant dense<0.000000e+00> : vector<128xf32>
    %12 = vector.multi_reduction <add>, %11, %cst_15 [0] : vector<1x128xf32> to vector<128xf32>
    %13 = vector.shape_cast %12 : vector<128xf32> to vector<1x128xf32>
    %14 = vector.shape_cast %13 : vector<1x128xf32> to vector<1x1x128xf32>
    %15 = arith.addf %10, %14 : vector<1x1x128xf32>
    %c0_16 = arith.constant 0 : index
    %c0_17 = arith.constant 0 : index
    %c0_18 = arith.constant 0 : index
    %16 = vector.load %arg5[%c0_16, %c0_17, %c0_18] : memref<1x1x128xf32, #tpu.memory_space<vmem>>, vector<1x1x128xf32>
    tpu.vector_store %arg5[%c0_16, %c0_17, %c0_18], %15 {strides = array<i32>} : memref<1x1x128xf32, #tpu.memory_space<vmem>>, vector<1x1x128xf32>,
    %c0_19 = arith.constant 0 : index
    %c0_20 = arith.constant 0 : index
    %c0_21 = arith.constant 0 : index
    %17 = vector.load %arg6[%c0_19, %c0_20, %c0_21] : memref<1x1x128xf32, #tpu.memory_space<vmem>>, vector<1x1x128xf32>
    %18 = arith.subf %6, %9 : vector<2x3x1x128xf32>
    %cst_22 = arith.constant dense<0.000000e+00> : vector<1x128xf32>
    %19 = vector.multi_reduction <add>, %18, %cst_22 [0, 1] : vector<2x3x1x128xf32> to vector<1x128xf32>
    %cst_23 = arith.constant dense<0.000000e+00> : vector<128xf32>
    %20 = vector.multi_reduction <add>, %19, %cst_23 [0] : vector<1x128xf32> to vector<128xf32>
    %21 = vector.shape_cast %20 : vector<128xf32> to vector<1x128xf32>
    %22 = vector.shape_cast %21 : vector<1x128xf32> to vector<1x1x128xf32>
    %23 = arith.addf %17, %22 : vector<1x1x128xf32>
    %c0_24 = arith.constant 0 : index
    %c0_25 = arith.constant 0 : index
    %c0_26 = arith.constant 0 : index
    %24 = vector.load %arg6[%c0_24, %c0_25, %c0_26] : memref<1x1x128xf32, #tpu.memory_space<vmem>>, vector<1x1x128xf32>
    tpu.vector_store %arg6[%c0_24, %c0_25, %c0_26], %23 {strides = array<i32>} : memref<1x1x128xf32, #tpu.memory_space<vmem>>, vector<1x1x128xf32>,
    return
  }
  func.func @transform_0(%arg0: i32, %arg1: i32) -> (i32, i32, i32, i32) {
    %c1_i32 = arith.constant 1 : i32
    %0 = arith.muli %arg0, %c1_i32 : i32
    %1 = arith.addi %0, %arg1 : i32
    %c0_i32 = arith.constant 0 : i32
    %c0_i32_0 = arith.constant 0 : i32
    %c0_i32_1 = arith.constant 0 : i32
    %c0_i32_2 = arith.constant 0 : i32
    return %c0_i32, %c0_i32_0, %1, %c0_i32_1 : i32, i32, i32, i32
  }
  func.func @transform_1(%arg0: i32, %arg1: i32) -> (i32, i32, i32, i32) {
    %c1_i32 = arith.constant 1 : i32
    %0 = arith.muli %arg0, %c1_i32 : i32
    %1 = arith.addi %0, %arg1 : i32
    %c0_i32 = arith.constant 0 : i32
    %c0_i32_0 = arith.constant 0 : i32
    %c0_i32_1 = arith.constant 0 : i32
    %c0_i32_2 = arith.constant 0 : i32
    return %c0_i32, %c0_i32_0, %1, %c0_i32_1 : i32, i32, i32, i32
  }
  func.func @transform_2(%arg0: i32, %arg1: i32) -> (i32, i32, i32, i32) {
    %c1_i32 = arith.constant 1 : i32
    %0 = arith.muli %arg0, %c1_i32 : i32
    %1 = arith.addi %0, %arg1 : i32
    %c0_i32 = arith.constant 0 : i32
    %c0_i32_0 = arith.constant 0 : i32
    %c0_i32_1 = arith.constant 0 : i32
    %c0_i32_2 = arith.constant 0 : i32
    return %c0_i32, %c0_i32_0, %1, %c0_i32_1 : i32, i32, i32, i32
  }
  func.func @transform_3(%arg0: i32, %arg1: i32) -> (i32, i32, i32) {
    %c0_i32 = arith.constant 0 : i32
    %c0_i32_0 = arith.constant 0 : i32
    %c0_i32_1 = arith.constant 0 : i32
    return %arg0, %c0_i32, %c0_i32_0 : i32, i32, i32
  }
  func.func @transform_4(%arg0: i32, %arg1: i32) -> (i32, i32, i32) {
    %c0_i32 = arith.constant 0 : i32
    %c0_i32_0 = arith.constant 0 : i32
    %c0_i32_1 = arith.constant 0 : i32
    return %arg0, %c0_i32, %c0_i32_0 : i32, i32, i32
  }
}

module attributes {stable_mosaic.version = 11 : i64} {
  func.func @_mm_bias_act_kernel(%arg0: i32, %arg1: memref<24x192xf32, #tpu.memory_space<vmem>>, %arg2: memref<192x128xf32, #tpu.memory_space<vmem>>, %arg3: memref<1x128xf32, #tpu.memory_space<vmem>>, %arg4: memref<24x128xf32, #tpu.memory_space<vmem>>) attributes {dimension_semantics = [#tpu.dimension_semantics<parallel>], iteration_bounds = array<i64: 1>, scalar_prefetch = 0 : i64, scratch_operands = 0 : i64, tpu.core_type = #tpu.core_type<tc>, window_params = [{transform_indices = @transform_0, window_bounds = array<i64: 24, 192>}, {pipeline_mode = #tpu.pipeline_mode<synchronous>, transform_indices = @transform_1, window_bounds = array<i64: 192, 128>}, {pipeline_mode = #tpu.pipeline_mode<synchronous>, transform_indices = @transform_2, window_bounds = array<i64: 1, 128>}, {transform_indices = @transform_3, window_bounds = array<i64: 24, 128>}]} {
    %c0 = arith.constant 0 : index
    %c0_0 = arith.constant 0 : index
    %0 = vector.load %arg1[%c0, %c0_0] : memref<24x192xf32, #tpu.memory_space<vmem>>, vector<24x192xf32>
    %c0_1 = arith.constant 0 : index
    %c0_2 = arith.constant 0 : index
    %1 = vector.load %arg2[%c0_1, %c0_2] : memref<192x128xf32, #tpu.memory_space<vmem>>, vector<192x128xf32>
    %cst = arith.constant dense<0.000000e+00> : vector<24x128xf32>
    %2 = tpu.matmul %0, %1, %cst {dimension_numbers = #tpu.dot_dimension_numbers<[1], [0], [0], [1], [0, 0, 1, 1], [], []>} : vector<24x192xf32>, vector<192x128xf32>, vector<24x128xf32> -> vector<24x128xf32>
    %c0_3 = arith.constant 0 : index
    %c0_4 = arith.constant 0 : index
    %3 = vector.load %arg3[%c0_3, %c0_4] : memref<1x128xf32, #tpu.memory_space<vmem>>, vector<1x128xf32>
    %4 = vector.broadcast %3 : vector<1x128xf32> to vector<24x128xf32>
    %5 = arith.addf %2, %4 : vector<24x128xf32>
    %cst_5 = arith.constant 0.000000e+00 : f32
    %6 = vector.broadcast %cst_5 : f32 to vector<24x128xf32>
    %7 = arith.maximumf %5, %6 : vector<24x128xf32>
    %c0_6 = arith.constant 0 : index
    %c0_7 = arith.constant 0 : index
    %8 = vector.load %arg4[%c0_6, %c0_7] : memref<24x128xf32, #tpu.memory_space<vmem>>, vector<24x128xf32>
    tpu.vector_store %arg4[%c0_6, %c0_7], %7 {strides = array<i32>} : memref<24x128xf32, #tpu.memory_space<vmem>>, vector<24x128xf32>,
    return
  }
  func.func @transform_0(%arg0: i32) -> (i32, i32) {
    %c0_i32 = arith.constant 0 : i32
    %c0_i32_0 = arith.constant 0 : i32
    return %arg0, %c0_i32 : i32, i32
  }
  func.func @transform_1(%arg0: i32) -> (i32, i32) {
    %c0_i32 = arith.constant 0 : i32
    %c0_i32_0 = arith.constant 0 : i32
    %c0_i32_1 = arith.constant 0 : i32
    return %c0_i32, %c0_i32_0 : i32, i32
  }
  func.func @transform_2(%arg0: i32) -> (i32, i32) {
    %c0_i32 = arith.constant 0 : i32
    %c0_i32_0 = arith.constant 0 : i32
    %c0_i32_1 = arith.constant 0 : i32
    return %c0_i32, %c0_i32_0 : i32, i32
  }
  func.func @transform_3(%arg0: i32) -> (i32, i32) {
    %c0_i32 = arith.constant 0 : i32
    %c0_i32_0 = arith.constant 0 : i32
    return %arg0, %c0_i32 : i32, i32
  }
}

module attributes {stable_mosaic.version = 11 : i64} {
  func.func @_feat_loss_kernel(%arg0: i32, %arg1: i32, %arg2: memref<1x1x64x8xf32, #tpu.memory_space<vmem>>, %arg3: memref<1x1x64x8xf32, #tpu.memory_space<vmem>>, %arg4: memref<1x1x64x8xf32, #tpu.memory_space<vmem>>, %arg5: memref<1x1x1xf32, #tpu.memory_space<vmem>>, %arg6: memref<1x1x1xf32, #tpu.memory_space<vmem>>, %arg7: memref<1x1x1xf32, #tpu.memory_space<vmem>>, %arg8: memref<1x1x1xf32, #tpu.memory_space<vmem>>, %arg9: memref<8x8xf32, #tpu.memory_space<vmem>>, %arg10: memref<8x8xf32, #tpu.memory_space<vmem>>, %arg11: memref<8x8xf32, #tpu.memory_space<vmem>>) attributes {dimension_semantics = [#tpu.dimension_semantics<parallel>, #tpu.dimension_semantics<arbitrary>], iteration_bounds = array<i64: 2, 1>, scalar_prefetch = 0 : i64, scratch_operands = 3 : i64, tpu.core_type = #tpu.core_type<tc>, window_params = [{transform_indices = @transform_0, window_bounds = array<i64: 1, 1, 64, 8>}, {transform_indices = @transform_1, window_bounds = array<i64: 1, 1, 64, 8>}, {transform_indices = @transform_2, window_bounds = array<i64: 1, 1, 64, 8>}, {transform_indices = @transform_3, window_bounds = array<i64: 1, 1, 1>}, {transform_indices = @transform_4, window_bounds = array<i64: 1, 1, 1>}, {transform_indices = @transform_5, window_bounds = array<i64: 1, 1, 1>}, {transform_indices = @transform_6, window_bounds = array<i64: 1, 1, 1>}]} {
    %c0_i32 = arith.constant 0 : i32
    %0 = arith.cmpi eq, %arg1, %c0_i32 : i32
    %1 = arith.extui %0 : i1 to i32
    %c0_i32_0 = arith.constant 0 : i32
    %2 = arith.cmpi ne, %1, %c0_i32_0 : i32
    scf.if %2 {
      %cst_42 = arith.constant 0.000000e+00 : f32
      %46 = vector.broadcast %cst_42 : f32 to vector<1x1x1xf32>
      %c0_43 = arith.constant 0 : index
      %c0_44 = arith.constant 0 : index
      %c0_45 = arith.constant 0 : index
      %47 = vector.load %arg5[%c0_43, %c0_44, %c0_45] : memref<1x1x1xf32, #tpu.memory_space<vmem>>, vector<1x1x1xf32>
      tpu.vector_store %arg5[%c0_43, %c0_44, %c0_45], %46 {strides = array<i32>} : memref<1x1x1xf32, #tpu.memory_space<vmem>>, vector<1x1x1xf32>,
      %cst_46 = arith.constant 0.000000e+00 : f32
      %48 = vector.broadcast %cst_46 : f32 to vector<1x1x1xf32>
      %c0_47 = arith.constant 0 : index
      %c0_48 = arith.constant 0 : index
      %c0_49 = arith.constant 0 : index
      %49 = vector.load %arg6[%c0_47, %c0_48, %c0_49] : memref<1x1x1xf32, #tpu.memory_space<vmem>>, vector<1x1x1xf32>
      tpu.vector_store %arg6[%c0_47, %c0_48, %c0_49], %48 {strides = array<i32>} : memref<1x1x1xf32, #tpu.memory_space<vmem>>, vector<1x1x1xf32>,
      %cst_50 = arith.constant 0.000000e+00 : f32
      %50 = vector.broadcast %cst_50 : f32 to vector<1x1x1xf32>
      %c0_51 = arith.constant 0 : index
      %c0_52 = arith.constant 0 : index
      %c0_53 = arith.constant 0 : index
      %51 = vector.load %arg7[%c0_51, %c0_52, %c0_53] : memref<1x1x1xf32, #tpu.memory_space<vmem>>, vector<1x1x1xf32>
      tpu.vector_store %arg7[%c0_51, %c0_52, %c0_53], %50 {strides = array<i32>} : memref<1x1x1xf32, #tpu.memory_space<vmem>>, vector<1x1x1xf32>,
      %cst_54 = arith.constant 0.000000e+00 : f32
      %52 = vector.broadcast %cst_54 : f32 to vector<1x1x1xf32>
      %c0_55 = arith.constant 0 : index
      %c0_56 = arith.constant 0 : index
      %c0_57 = arith.constant 0 : index
      %53 = vector.load %arg8[%c0_55, %c0_56, %c0_57] : memref<1x1x1xf32, #tpu.memory_space<vmem>>, vector<1x1x1xf32>
      tpu.vector_store %arg8[%c0_55, %c0_56, %c0_57], %52 {strides = array<i32>} : memref<1x1x1xf32, #tpu.memory_space<vmem>>, vector<1x1x1xf32>,
      %cst_58 = arith.constant 0.000000e+00 : f32
      %54 = vector.broadcast %cst_58 : f32 to vector<8x8xf32>
      %c0_59 = arith.constant 0 : index
      %c0_60 = arith.constant 0 : index
      %55 = vector.load %arg9[%c0_59, %c0_60] : memref<8x8xf32, #tpu.memory_space<vmem>>, vector<8x8xf32>
      tpu.vector_store %arg9[%c0_59, %c0_60], %54 {strides = array<i32>} : memref<8x8xf32, #tpu.memory_space<vmem>>, vector<8x8xf32>,
      %cst_61 = arith.constant 0.000000e+00 : f32
      %56 = vector.broadcast %cst_61 : f32 to vector<8x8xf32>
      %c0_62 = arith.constant 0 : index
      %c0_63 = arith.constant 0 : index
      %57 = vector.load %arg10[%c0_62, %c0_63] : memref<8x8xf32, #tpu.memory_space<vmem>>, vector<8x8xf32>
      tpu.vector_store %arg10[%c0_62, %c0_63], %56 {strides = array<i32>} : memref<8x8xf32, #tpu.memory_space<vmem>>, vector<8x8xf32>,
      %cst_64 = arith.constant 0.000000e+00 : f32
      %58 = vector.broadcast %cst_64 : f32 to vector<8x8xf32>
      %c0_65 = arith.constant 0 : index
      %c0_66 = arith.constant 0 : index
      %59 = vector.load %arg11[%c0_65, %c0_66] : memref<8x8xf32, #tpu.memory_space<vmem>>, vector<8x8xf32>
      tpu.vector_store %arg11[%c0_65, %c0_66], %58 {strides = array<i32>} : memref<8x8xf32, #tpu.memory_space<vmem>>, vector<8x8xf32>,
    } else {
    }
    %c0 = arith.constant 0 : index
    %c0_1 = arith.constant 0 : index
    %c0_2 = arith.constant 0 : index
    %c0_3 = arith.constant 0 : index
    %3 = vector.load %arg2[%c0, %c0_1, %c0_2, %c0_3] : memref<1x1x64x8xf32, #tpu.memory_space<vmem>>, vector<1x1x64x8xf32>
    %4 = vector.shape_cast %3 : vector<1x1x64x8xf32> to vector<64x8xf32>
    %c0_4 = arith.constant 0 : index
    %c0_5 = arith.constant 0 : index
    %c0_6 = arith.constant 0 : index
    %c0_7 = arith.constant 0 : index
    %5 = vector.load %arg3[%c0_4, %c0_5, %c0_6, %c0_7] : memref<1x1x64x8xf32, #tpu.memory_space<vmem>>, vector<1x1x64x8xf32>
    %6 = vector.shape_cast %5 : vector<1x1x64x8xf32> to vector<64x8xf32>
    %c0_8 = arith.constant 0 : index
    %c0_9 = arith.constant 0 : index
    %c0_10 = arith.constant 0 : index
    %c0_11 = arith.constant 0 : index
    %7 = vector.load %arg4[%c0_8, %c0_9, %c0_10, %c0_11] : memref<1x1x64x8xf32, #tpu.memory_space<vmem>>, vector<1x1x64x8xf32>
    %8 = vector.shape_cast %7 : vector<1x1x64x8xf32> to vector<64x8xf32>
    %c0_12 = arith.constant 0 : index
    %c0_13 = arith.constant 0 : index
    %c0_14 = arith.constant 0 : index
    %9 = vector.load %arg5[%c0_12, %c0_13, %c0_14] : memref<1x1x1xf32, #tpu.memory_space<vmem>>, vector<1x1x1xf32>
    %10 = arith.subf %6, %8 : vector<64x8xf32>
    %11 = math.absf %10 : vector<64x8xf32>
    %12 = vector.shape_cast %11 : vector<64x8xf32> to vector<1x64x8xf32>
    %cst = arith.constant dense<0.000000e+00> : vector<1xf32>
    %13 = vector.multi_reduction <add>, %12, %cst [1, 2] : vector<1x64x8xf32> to vector<1xf32>
    %14 = vector.shape_cast %13 : vector<1xf32> to vector<1x1x1xf32>
    %15 = vector.extract %14[0, 0, 0] : f32 from vector<1x1x1xf32>
    %16 = vector.broadcast %15 : f32 to vector<1x1xf32>
    %17 = vector.shape_cast %16 : vector<1x1xf32> to vector<1x1x1xf32>
    %18 = arith.addf %9, %17 : vector<1x1x1xf32>
    %c0_15 = arith.constant 0 : index
    %c0_16 = arith.constant 0 : index
    %c0_17 = arith.constant 0 : index
    %19 = vector.load %arg5[%c0_15, %c0_16, %c0_17] : memref<1x1x1xf32, #tpu.memory_space<vmem>>, vector<1x1x1xf32>
    tpu.vector_store %arg5[%c0_15, %c0_16, %c0_17], %18 {strides = array<i32>} : memref<1x1x1xf32, #tpu.memory_space<vmem>>, vector<1x1x1xf32>,
    %c0_18 = arith.constant 0 : index
    %c0_19 = arith.constant 0 : index
    %c0_20 = arith.constant 0 : index
    %20 = vector.load %arg6[%c0_18, %c0_19, %c0_20] : memref<1x1x1xf32, #tpu.memory_space<vmem>>, vector<1x1x1xf32>
    %21 = arith.subf %4, %8 : vector<64x8xf32>
    %22 = math.absf %21 : vector<64x8xf32>
    %23 = vector.shape_cast %22 : vector<64x8xf32> to vector<1x64x8xf32>
    %cst_21 = arith.constant dense<0.000000e+00> : vector<1xf32>
    %24 = vector.multi_reduction <add>, %23, %cst_21 [1, 2] : vector<1x64x8xf32> to vector<1xf32>
    %25 = vector.shape_cast %24 : vector<1xf32> to vector<1x1x1xf32>
    %26 = vector.extract %25[0, 0, 0] : f32 from vector<1x1x1xf32>
    %27 = vector.broadcast %26 : f32 to vector<1x1xf32>
    %28 = vector.shape_cast %27 : vector<1x1xf32> to vector<1x1x1xf32>
    %29 = arith.addf %20, %28 : vector<1x1x1xf32>
    %c0_22 = arith.constant 0 : index
    %c0_23 = arith.constant 0 : index
    %c0_24 = arith.constant 0 : index
    %30 = vector.load %arg6[%c0_22, %c0_23, %c0_24] : memref<1x1x1xf32, #tpu.memory_space<vmem>>, vector<1x1x1xf32>
    tpu.vector_store %arg6[%c0_22, %c0_23, %c0_24], %29 {strides = array<i32>} : memref<1x1x1xf32, #tpu.memory_space<vmem>>, vector<1x1x1xf32>,
    %c0_25 = arith.constant 0 : index
    %c0_26 = arith.constant 0 : index
    %31 = vector.load %arg9[%c0_25, %c0_26] : memref<8x8xf32, #tpu.memory_space<vmem>>, vector<8x8xf32>
    %cst_27 = arith.constant dense<0.000000e+00> : vector<8x8xf32>
    %32 = tpu.matmul %4, %4, %cst_27 {dimension_numbers = #tpu.dot_dimension_numbers<[0], [0], [1], [1], [0, 1, 1, 1], [], []>} : vector<64x8xf32>, vector<64x8xf32>, vector<8x8xf32> -> vector<8x8xf32>
    %33 = arith.addf %31, %32 : vector<8x8xf32>
    %c0_28 = arith.constant 0 : index
    %c0_29 = arith.constant 0 : index
    %34 = vector.load %arg9[%c0_28, %c0_29] : memref<8x8xf32, #tpu.memory_space<vmem>>, vector<8x8xf32>
    tpu.vector_store %arg9[%c0_28, %c0_29], %33 {strides = array<i32>} : memref<8x8xf32, #tpu.memory_space<vmem>>, vector<8x8xf32>,
    %c0_30 = arith.constant 0 : index
    %c0_31 = arith.constant 0 : index
    %35 = vector.load %arg10[%c0_30, %c0_31] : memref<8x8xf32, #tpu.memory_space<vmem>>, vector<8x8xf32>
    %cst_32 = arith.constant dense<0.000000e+00> : vector<8x8xf32>
    %36 = tpu.matmul %6, %6, %cst_32 {dimension_numbers = #tpu.dot_dimension_numbers<[0], [0], [1], [1], [0, 1, 1, 1], [], []>} : vector<64x8xf32>, vector<64x8xf32>, vector<8x8xf32> -> vector<8x8xf32>
    %37 = arith.addf %35, %36 : vector<8x8xf32>
    %c0_33 = arith.constant 0 : index
    %c0_34 = arith.constant 0 : index
    %38 = vector.load %arg10[%c0_33, %c0_34] : memref<8x8xf32, #tpu.memory_space<vmem>>, vector<8x8xf32>
    tpu.vector_store %arg10[%c0_33, %c0_34], %37 {strides = array<i32>} : memref<8x8xf32, #tpu.memory_space<vmem>>, vector<8x8xf32>,
    %c0_35 = arith.constant 0 : index
    %c0_36 = arith.constant 0 : index
    %39 = vector.load %arg11[%c0_35, %c0_36] : memref<8x8xf32, #tpu.memory_space<vmem>>, vector<8x8xf32>
    %cst_37 = arith.constant dense<0.000000e+00> : vector<8x8xf32>
    %40 = tpu.matmul %8, %8, %cst_37 {dimension_numbers = #tpu.dot_dimension_numbers<[0], [0], [1], [1], [0, 1, 1, 1], [], []>} : vector<64x8xf32>, vector<64x8xf32>, vector<8x8xf32> -> vector<8x8xf32>
    %41 = arith.addf %39, %40 : vector<8x8xf32>
    %c0_38 = arith.constant 0 : index
    %c0_39 = arith.constant 0 : index
    %42 = vector.load %arg11[%c0_38, %c0_39] : memref<8x8xf32, #tpu.memory_space<vmem>>, vector<8x8xf32>
    tpu.vector_store %arg11[%c0_38, %c0_39], %41 {strides = array<i32>} : memref<8x8xf32, #tpu.memory_space<vmem>>, vector<8x8xf32>,
    %c0_i32_40 = arith.constant 0 : i32
    %43 = arith.cmpi eq, %arg1, %c0_i32_40 : i32
    %44 = arith.extui %43 : i1 to i32
    %c0_i32_41 = arith.constant 0 : i32
    %45 = arith.cmpi ne, %44, %c0_i32_41 : i32
    scf.if %45 {
      %c0_42 = arith.constant 0 : index
      %c0_43 = arith.constant 0 : index
      %46 = vector.load %arg11[%c0_42, %c0_43] : memref<8x8xf32, #tpu.memory_space<vmem>>, vector<8x8xf32>
      %c0_44 = arith.constant 0 : index
      %c0_45 = arith.constant 0 : index
      %c0_46 = arith.constant 0 : index
      %47 = vector.load %arg7[%c0_44, %c0_45, %c0_46] : memref<1x1x1xf32, #tpu.memory_space<vmem>>, vector<1x1x1xf32>
      %c0_47 = arith.constant 0 : index
      %c0_48 = arith.constant 0 : index
      %48 = vector.load %arg10[%c0_47, %c0_48] : memref<8x8xf32, #tpu.memory_space<vmem>>, vector<8x8xf32>
      %49 = arith.subf %48, %46 : vector<8x8xf32>
      %50 = math.absf %49 : vector<8x8xf32>
      %51 = vector.shape_cast %50 : vector<8x8xf32> to vector<1x8x8xf32>
      %cst_49 = arith.constant dense<0.000000e+00> : vector<1xf32>
      %52 = vector.multi_reduction <add>, %51, %cst_49 [1, 2] : vector<1x8x8xf32> to vector<1xf32>
      %53 = vector.shape_cast %52 : vector<1xf32> to vector<1x1x1xf32>
      %54 = vector.extract %53[0, 0, 0] : f32 from vector<1x1x1xf32>
      %55 = vector.broadcast %54 : f32 to vector<1x1xf32>
      %56 = vector.shape_cast %55 : vector<1x1xf32> to vector<1x1x1xf32>
      %57 = arith.addf %47, %56 : vector<1x1x1xf32>
      %c0_50 = arith.constant 0 : index
      %c0_51 = arith.constant 0 : index
      %c0_52 = arith.constant 0 : index
      %58 = vector.load %arg7[%c0_50, %c0_51, %c0_52] : memref<1x1x1xf32, #tpu.memory_space<vmem>>, vector<1x1x1xf32>
      tpu.vector_store %arg7[%c0_50, %c0_51, %c0_52], %57 {strides = array<i32>} : memref<1x1x1xf32, #tpu.memory_space<vmem>>, vector<1x1x1xf32>,
      %c0_53 = arith.constant 0 : index
      %c0_54 = arith.constant 0 : index
      %c0_55 = arith.constant 0 : index
      %59 = vector.load %arg8[%c0_53, %c0_54, %c0_55] : memref<1x1x1xf32, #tpu.memory_space<vmem>>, vector<1x1x1xf32>
      %c0_56 = arith.constant 0 : index
      %c0_57 = arith.constant 0 : index
      %60 = vector.load %arg9[%c0_56, %c0_57] : memref<8x8xf32, #tpu.memory_space<vmem>>, vector<8x8xf32>
      %61 = arith.subf %60, %46 : vector<8x8xf32>
      %62 = math.absf %61 : vector<8x8xf32>
      %63 = vector.shape_cast %62 : vector<8x8xf32> to vector<1x8x8xf32>
      %cst_58 = arith.constant dense<0.000000e+00> : vector<1xf32>
      %64 = vector.multi_reduction <add>, %63, %cst_58 [1, 2] : vector<1x8x8xf32> to vector<1xf32>
      %65 = vector.shape_cast %64 : vector<1xf32> to vector<1x1x1xf32>
      %66 = vector.extract %65[0, 0, 0] : f32 from vector<1x1x1xf32>
      %67 = vector.broadcast %66 : f32 to vector<1x1xf32>
      %68 = vector.shape_cast %67 : vector<1x1xf32> to vector<1x1x1xf32>
      %69 = arith.addf %59, %68 : vector<1x1x1xf32>
      %c0_59 = arith.constant 0 : index
      %c0_60 = arith.constant 0 : index
      %c0_61 = arith.constant 0 : index
      %70 = vector.load %arg8[%c0_59, %c0_60, %c0_61] : memref<1x1x1xf32, #tpu.memory_space<vmem>>, vector<1x1x1xf32>
      tpu.vector_store %arg8[%c0_59, %c0_60, %c0_61], %69 {strides = array<i32>} : memref<1x1x1xf32, #tpu.memory_space<vmem>>, vector<1x1x1xf32>,
    } else {
    }
    return
  }
  func.func @transform_0(%arg0: i32, %arg1: i32) -> (i32, i32, i32, i32) {
    %c0_i32 = arith.constant 0 : i32
    %c0_i32_0 = arith.constant 0 : i32
    %c0_i32_1 = arith.constant 0 : i32
    return %c0_i32, %arg0, %arg1, %c0_i32_0 : i32, i32, i32, i32
  }
  func.func @transform_1(%arg0: i32, %arg1: i32) -> (i32, i32, i32, i32) {
    %c1_i32 = arith.constant 1 : i32
    %c0_i32 = arith.constant 0 : i32
    %c0_i32_0 = arith.constant 0 : i32
    return %c1_i32, %arg0, %arg1, %c0_i32 : i32, i32, i32, i32
  }
  func.func @transform_2(%arg0: i32, %arg1: i32) -> (i32, i32, i32, i32) {
    %c2_i32 = arith.constant 2 : i32
    %c0_i32 = arith.constant 0 : i32
    %c0_i32_0 = arith.constant 0 : i32
    return %c2_i32, %arg0, %arg1, %c0_i32 : i32, i32, i32, i32
  }
  func.func @transform_3(%arg0: i32, %arg1: i32) -> (i32, i32, i32) {
    %c0_i32 = arith.constant 0 : i32
    %c0_i32_0 = arith.constant 0 : i32
    %c0_i32_1 = arith.constant 0 : i32
    return %arg0, %c0_i32, %c0_i32_0 : i32, i32, i32
  }
  func.func @transform_4(%arg0: i32, %arg1: i32) -> (i32, i32, i32) {
    %c0_i32 = arith.constant 0 : i32
    %c0_i32_0 = arith.constant 0 : i32
    %c0_i32_1 = arith.constant 0 : i32
    return %arg0, %c0_i32, %c0_i32_0 : i32, i32, i32
  }
  func.func @transform_5(%arg0: i32, %arg1: i32) -> (i32, i32, i32) {
    %c0_i32 = arith.constant 0 : i32
    %c0_i32_0 = arith.constant 0 : i32
    %c0_i32_1 = arith.constant 0 : i32
    return %arg0, %c0_i32, %c0_i32_0 : i32, i32, i32
  }
  func.func @transform_6(%arg0: i32, %arg1: i32) -> (i32, i32, i32) {
    %c0_i32 = arith.constant 0 : i32
    %c0_i32_0 = arith.constant 0 : i32
    %c0_i32_1 = arith.constant 0 : i32
    return %arg0, %c0_i32, %c0_i32_0 : i32, i32, i32
  }
}

module attributes {stable_mosaic.version = 11 : i64} {
  func.func @_mm_bias_act_kernel(%arg0: i32, %arg1: memref<12x256xf32, #tpu.memory_space<vmem>>, %arg2: memref<256x128xf32, #tpu.memory_space<vmem>>, %arg3: memref<1x128xf32, #tpu.memory_space<vmem>>, %arg4: memref<12x128xf32, #tpu.memory_space<vmem>>) attributes {dimension_semantics = [#tpu.dimension_semantics<parallel>], iteration_bounds = array<i64: 1>, scalar_prefetch = 0 : i64, scratch_operands = 0 : i64, tpu.core_type = #tpu.core_type<tc>, window_params = [{transform_indices = @transform_0, window_bounds = array<i64: 12, 256>}, {pipeline_mode = #tpu.pipeline_mode<synchronous>, transform_indices = @transform_1, window_bounds = array<i64: 256, 128>}, {pipeline_mode = #tpu.pipeline_mode<synchronous>, transform_indices = @transform_2, window_bounds = array<i64: 1, 128>}, {transform_indices = @transform_3, window_bounds = array<i64: 12, 128>}]} {
    %c0 = arith.constant 0 : index
    %c0_0 = arith.constant 0 : index
    %0 = vector.load %arg1[%c0, %c0_0] : memref<12x256xf32, #tpu.memory_space<vmem>>, vector<12x256xf32>
    %c0_1 = arith.constant 0 : index
    %c0_2 = arith.constant 0 : index
    %1 = vector.load %arg2[%c0_1, %c0_2] : memref<256x128xf32, #tpu.memory_space<vmem>>, vector<256x128xf32>
    %cst = arith.constant dense<0.000000e+00> : vector<12x128xf32>
    %2 = tpu.matmul %0, %1, %cst {dimension_numbers = #tpu.dot_dimension_numbers<[1], [0], [0], [1], [0, 0, 1, 1], [], []>} : vector<12x256xf32>, vector<256x128xf32>, vector<12x128xf32> -> vector<12x128xf32>
    %c0_3 = arith.constant 0 : index
    %c0_4 = arith.constant 0 : index
    %3 = vector.load %arg3[%c0_3, %c0_4] : memref<1x128xf32, #tpu.memory_space<vmem>>, vector<1x128xf32>
    %4 = vector.broadcast %3 : vector<1x128xf32> to vector<12x128xf32>
    %5 = arith.addf %2, %4 : vector<12x128xf32>
    %cst_5 = arith.constant 0.000000e+00 : f32
    %6 = vector.broadcast %cst_5 : f32 to vector<12x128xf32>
    %7 = arith.maximumf %5, %6 : vector<12x128xf32>
    %c0_6 = arith.constant 0 : index
    %c0_7 = arith.constant 0 : index
    %8 = vector.load %arg4[%c0_6, %c0_7] : memref<12x128xf32, #tpu.memory_space<vmem>>, vector<12x128xf32>
    tpu.vector_store %arg4[%c0_6, %c0_7], %7 {strides = array<i32>} : memref<12x128xf32, #tpu.memory_space<vmem>>, vector<12x128xf32>,
    return
  }
  func.func @transform_0(%arg0: i32) -> (i32, i32) {
    %c0_i32 = arith.constant 0 : i32
    %c0_i32_0 = arith.constant 0 : i32
    return %arg0, %c0_i32 : i32, i32
  }
  func.func @transform_1(%arg0: i32) -> (i32, i32) {
    %c0_i32 = arith.constant 0 : i32
    %c0_i32_0 = arith.constant 0 : i32
    %c0_i32_1 = arith.constant 0 : i32
    return %c0_i32, %c0_i32_0 : i32, i32
  }
  func.func @transform_2(%arg0: i32) -> (i32, i32) {
    %c0_i32 = arith.constant 0 : i32
    %c0_i32_0 = arith.constant 0 : i32
    %c0_i32_1 = arith.constant 0 : i32
    return %c0_i32, %c0_i32_0 : i32, i32
  }
  func.func @transform_3(%arg0: i32) -> (i32, i32) {
    %c0_i32 = arith.constant 0 : i32
    %c0_i32_0 = arith.constant 0 : i32
    return %arg0, %c0_i32 : i32, i32
  }
}

module attributes {stable_mosaic.version = 11 : i64} {
  func.func @_feat_loss_kernel(%arg0: i32, %arg1: i32, %arg2: memref<1x1x16x16xf32, #tpu.memory_space<vmem>>, %arg3: memref<1x1x16x16xf32, #tpu.memory_space<vmem>>, %arg4: memref<1x1x16x16xf32, #tpu.memory_space<vmem>>, %arg5: memref<1x1x1xf32, #tpu.memory_space<vmem>>, %arg6: memref<1x1x1xf32, #tpu.memory_space<vmem>>, %arg7: memref<1x1x1xf32, #tpu.memory_space<vmem>>, %arg8: memref<1x1x1xf32, #tpu.memory_space<vmem>>, %arg9: memref<16x16xf32, #tpu.memory_space<vmem>>, %arg10: memref<16x16xf32, #tpu.memory_space<vmem>>, %arg11: memref<16x16xf32, #tpu.memory_space<vmem>>) attributes {dimension_semantics = [#tpu.dimension_semantics<parallel>, #tpu.dimension_semantics<arbitrary>], iteration_bounds = array<i64: 2, 1>, scalar_prefetch = 0 : i64, scratch_operands = 3 : i64, tpu.core_type = #tpu.core_type<tc>, window_params = [{transform_indices = @transform_0, window_bounds = array<i64: 1, 1, 16, 16>}, {transform_indices = @transform_1, window_bounds = array<i64: 1, 1, 16, 16>}, {transform_indices = @transform_2, window_bounds = array<i64: 1, 1, 16, 16>}, {transform_indices = @transform_3, window_bounds = array<i64: 1, 1, 1>}, {transform_indices = @transform_4, window_bounds = array<i64: 1, 1, 1>}, {transform_indices = @transform_5, window_bounds = array<i64: 1, 1, 1>}, {transform_indices = @transform_6, window_bounds = array<i64: 1, 1, 1>}]} {
    %c0_i32 = arith.constant 0 : i32
    %0 = arith.cmpi eq, %arg1, %c0_i32 : i32
    %1 = arith.extui %0 : i1 to i32
    %c0_i32_0 = arith.constant 0 : i32
    %2 = arith.cmpi ne, %1, %c0_i32_0 : i32
    scf.if %2 {
      %cst_42 = arith.constant 0.000000e+00 : f32
      %46 = vector.broadcast %cst_42 : f32 to vector<1x1x1xf32>
      %c0_43 = arith.constant 0 : index
      %c0_44 = arith.constant 0 : index
      %c0_45 = arith.constant 0 : index
      %47 = vector.load %arg5[%c0_43, %c0_44, %c0_45] : memref<1x1x1xf32, #tpu.memory_space<vmem>>, vector<1x1x1xf32>
      tpu.vector_store %arg5[%c0_43, %c0_44, %c0_45], %46 {strides = array<i32>} : memref<1x1x1xf32, #tpu.memory_space<vmem>>, vector<1x1x1xf32>,
      %cst_46 = arith.constant 0.000000e+00 : f32
      %48 = vector.broadcast %cst_46 : f32 to vector<1x1x1xf32>
      %c0_47 = arith.constant 0 : index
      %c0_48 = arith.constant 0 : index
      %c0_49 = arith.constant 0 : index
      %49 = vector.load %arg6[%c0_47, %c0_48, %c0_49] : memref<1x1x1xf32, #tpu.memory_space<vmem>>, vector<1x1x1xf32>
      tpu.vector_store %arg6[%c0_47, %c0_48, %c0_49], %48 {strides = array<i32>} : memref<1x1x1xf32, #tpu.memory_space<vmem>>, vector<1x1x1xf32>,
      %cst_50 = arith.constant 0.000000e+00 : f32
      %50 = vector.broadcast %cst_50 : f32 to vector<1x1x1xf32>
      %c0_51 = arith.constant 0 : index
      %c0_52 = arith.constant 0 : index
      %c0_53 = arith.constant 0 : index
      %51 = vector.load %arg7[%c0_51, %c0_52, %c0_53] : memref<1x1x1xf32, #tpu.memory_space<vmem>>, vector<1x1x1xf32>
      tpu.vector_store %arg7[%c0_51, %c0_52, %c0_53], %50 {strides = array<i32>} : memref<1x1x1xf32, #tpu.memory_space<vmem>>, vector<1x1x1xf32>,
      %cst_54 = arith.constant 0.000000e+00 : f32
      %52 = vector.broadcast %cst_54 : f32 to vector<1x1x1xf32>
      %c0_55 = arith.constant 0 : index
      %c0_56 = arith.constant 0 : index
      %c0_57 = arith.constant 0 : index
      %53 = vector.load %arg8[%c0_55, %c0_56, %c0_57] : memref<1x1x1xf32, #tpu.memory_space<vmem>>, vector<1x1x1xf32>
      tpu.vector_store %arg8[%c0_55, %c0_56, %c0_57], %52 {strides = array<i32>} : memref<1x1x1xf32, #tpu.memory_space<vmem>>, vector<1x1x1xf32>,
      %cst_58 = arith.constant 0.000000e+00 : f32
      %54 = vector.broadcast %cst_58 : f32 to vector<16x16xf32>
      %c0_59 = arith.constant 0 : index
      %c0_60 = arith.constant 0 : index
      %55 = vector.load %arg9[%c0_59, %c0_60] : memref<16x16xf32, #tpu.memory_space<vmem>>, vector<16x16xf32>
      tpu.vector_store %arg9[%c0_59, %c0_60], %54 {strides = array<i32>} : memref<16x16xf32, #tpu.memory_space<vmem>>, vector<16x16xf32>,
      %cst_61 = arith.constant 0.000000e+00 : f32
      %56 = vector.broadcast %cst_61 : f32 to vector<16x16xf32>
      %c0_62 = arith.constant 0 : index
      %c0_63 = arith.constant 0 : index
      %57 = vector.load %arg10[%c0_62, %c0_63] : memref<16x16xf32, #tpu.memory_space<vmem>>, vector<16x16xf32>
      tpu.vector_store %arg10[%c0_62, %c0_63], %56 {strides = array<i32>} : memref<16x16xf32, #tpu.memory_space<vmem>>, vector<16x16xf32>,
      %cst_64 = arith.constant 0.000000e+00 : f32
      %58 = vector.broadcast %cst_64 : f32 to vector<16x16xf32>
      %c0_65 = arith.constant 0 : index
      %c0_66 = arith.constant 0 : index
      %59 = vector.load %arg11[%c0_65, %c0_66] : memref<16x16xf32, #tpu.memory_space<vmem>>, vector<16x16xf32>
      tpu.vector_store %arg11[%c0_65, %c0_66], %58 {strides = array<i32>} : memref<16x16xf32, #tpu.memory_space<vmem>>, vector<16x16xf32>,
    } else {
    }
    %c0 = arith.constant 0 : index
    %c0_1 = arith.constant 0 : index
    %c0_2 = arith.constant 0 : index
    %c0_3 = arith.constant 0 : index
    %3 = vector.load %arg2[%c0, %c0_1, %c0_2, %c0_3] : memref<1x1x16x16xf32, #tpu.memory_space<vmem>>, vector<1x1x16x16xf32>
    %4 = vector.shape_cast %3 : vector<1x1x16x16xf32> to vector<16x16xf32>
    %c0_4 = arith.constant 0 : index
    %c0_5 = arith.constant 0 : index
    %c0_6 = arith.constant 0 : index
    %c0_7 = arith.constant 0 : index
    %5 = vector.load %arg3[%c0_4, %c0_5, %c0_6, %c0_7] : memref<1x1x16x16xf32, #tpu.memory_space<vmem>>, vector<1x1x16x16xf32>
    %6 = vector.shape_cast %5 : vector<1x1x16x16xf32> to vector<16x16xf32>
    %c0_8 = arith.constant 0 : index
    %c0_9 = arith.constant 0 : index
    %c0_10 = arith.constant 0 : index
    %c0_11 = arith.constant 0 : index
    %7 = vector.load %arg4[%c0_8, %c0_9, %c0_10, %c0_11] : memref<1x1x16x16xf32, #tpu.memory_space<vmem>>, vector<1x1x16x16xf32>
    %8 = vector.shape_cast %7 : vector<1x1x16x16xf32> to vector<16x16xf32>
    %c0_12 = arith.constant 0 : index
    %c0_13 = arith.constant 0 : index
    %c0_14 = arith.constant 0 : index
    %9 = vector.load %arg5[%c0_12, %c0_13, %c0_14] : memref<1x1x1xf32, #tpu.memory_space<vmem>>, vector<1x1x1xf32>
    %10 = arith.subf %6, %8 : vector<16x16xf32>
    %11 = math.absf %10 : vector<16x16xf32>
    %12 = vector.shape_cast %11 : vector<16x16xf32> to vector<1x16x16xf32>
    %cst = arith.constant dense<0.000000e+00> : vector<1xf32>
    %13 = vector.multi_reduction <add>, %12, %cst [1, 2] : vector<1x16x16xf32> to vector<1xf32>
    %14 = vector.shape_cast %13 : vector<1xf32> to vector<1x1x1xf32>
    %15 = vector.extract %14[0, 0, 0] : f32 from vector<1x1x1xf32>
    %16 = vector.broadcast %15 : f32 to vector<1x1xf32>
    %17 = vector.shape_cast %16 : vector<1x1xf32> to vector<1x1x1xf32>
    %18 = arith.addf %9, %17 : vector<1x1x1xf32>
    %c0_15 = arith.constant 0 : index
    %c0_16 = arith.constant 0 : index
    %c0_17 = arith.constant 0 : index
    %19 = vector.load %arg5[%c0_15, %c0_16, %c0_17] : memref<1x1x1xf32, #tpu.memory_space<vmem>>, vector<1x1x1xf32>
    tpu.vector_store %arg5[%c0_15, %c0_16, %c0_17], %18 {strides = array<i32>} : memref<1x1x1xf32, #tpu.memory_space<vmem>>, vector<1x1x1xf32>,
    %c0_18 = arith.constant 0 : index
    %c0_19 = arith.constant 0 : index
    %c0_20 = arith.constant 0 : index
    %20 = vector.load %arg6[%c0_18, %c0_19, %c0_20] : memref<1x1x1xf32, #tpu.memory_space<vmem>>, vector<1x1x1xf32>
    %21 = arith.subf %4, %8 : vector<16x16xf32>
    %22 = math.absf %21 : vector<16x16xf32>
    %23 = vector.shape_cast %22 : vector<16x16xf32> to vector<1x16x16xf32>
    %cst_21 = arith.constant dense<0.000000e+00> : vector<1xf32>
    %24 = vector.multi_reduction <add>, %23, %cst_21 [1, 2] : vector<1x16x16xf32> to vector<1xf32>
    %25 = vector.shape_cast %24 : vector<1xf32> to vector<1x1x1xf32>
    %26 = vector.extract %25[0, 0, 0] : f32 from vector<1x1x1xf32>
    %27 = vector.broadcast %26 : f32 to vector<1x1xf32>
    %28 = vector.shape_cast %27 : vector<1x1xf32> to vector<1x1x1xf32>
    %29 = arith.addf %20, %28 : vector<1x1x1xf32>
    %c0_22 = arith.constant 0 : index
    %c0_23 = arith.constant 0 : index
    %c0_24 = arith.constant 0 : index
    %30 = vector.load %arg6[%c0_22, %c0_23, %c0_24] : memref<1x1x1xf32, #tpu.memory_space<vmem>>, vector<1x1x1xf32>
    tpu.vector_store %arg6[%c0_22, %c0_23, %c0_24], %29 {strides = array<i32>} : memref<1x1x1xf32, #tpu.memory_space<vmem>>, vector<1x1x1xf32>,
    %c0_25 = arith.constant 0 : index
    %c0_26 = arith.constant 0 : index
    %31 = vector.load %arg9[%c0_25, %c0_26] : memref<16x16xf32, #tpu.memory_space<vmem>>, vector<16x16xf32>
    %cst_27 = arith.constant dense<0.000000e+00> : vector<16x16xf32>
    %32 = tpu.matmul %4, %4, %cst_27 {dimension_numbers = #tpu.dot_dimension_numbers<[0], [0], [1], [1], [0, 1, 1, 1], [], []>} : vector<16x16xf32>, vector<16x16xf32>, vector<16x16xf32> -> vector<16x16xf32>
    %33 = arith.addf %31, %32 : vector<16x16xf32>
    %c0_28 = arith.constant 0 : index
    %c0_29 = arith.constant 0 : index
    %34 = vector.load %arg9[%c0_28, %c0_29] : memref<16x16xf32, #tpu.memory_space<vmem>>, vector<16x16xf32>
    tpu.vector_store %arg9[%c0_28, %c0_29], %33 {strides = array<i32>} : memref<16x16xf32, #tpu.memory_space<vmem>>, vector<16x16xf32>,
    %c0_30 = arith.constant 0 : index
    %c0_31 = arith.constant 0 : index
    %35 = vector.load %arg10[%c0_30, %c0_31] : memref<16x16xf32, #tpu.memory_space<vmem>>, vector<16x16xf32>
    %cst_32 = arith.constant dense<0.000000e+00> : vector<16x16xf32>
    %36 = tpu.matmul %6, %6, %cst_32 {dimension_numbers = #tpu.dot_dimension_numbers<[0], [0], [1], [1], [0, 1, 1, 1], [], []>} : vector<16x16xf32>, vector<16x16xf32>, vector<16x16xf32> -> vector<16x16xf32>
    %37 = arith.addf %35, %36 : vector<16x16xf32>
    %c0_33 = arith.constant 0 : index
    %c0_34 = arith.constant 0 : index
    %38 = vector.load %arg10[%c0_33, %c0_34] : memref<16x16xf32, #tpu.memory_space<vmem>>, vector<16x16xf32>
    tpu.vector_store %arg10[%c0_33, %c0_34], %37 {strides = array<i32>} : memref<16x16xf32, #tpu.memory_space<vmem>>, vector<16x16xf32>,
    %c0_35 = arith.constant 0 : index
    %c0_36 = arith.constant 0 : index
    %39 = vector.load %arg11[%c0_35, %c0_36] : memref<16x16xf32, #tpu.memory_space<vmem>>, vector<16x16xf32>
    %cst_37 = arith.constant dense<0.000000e+00> : vector<16x16xf32>
    %40 = tpu.matmul %8, %8, %cst_37 {dimension_numbers = #tpu.dot_dimension_numbers<[0], [0], [1], [1], [0, 1, 1, 1], [], []>} : vector<16x16xf32>, vector<16x16xf32>, vector<16x16xf32> -> vector<16x16xf32>
    %41 = arith.addf %39, %40 : vector<16x16xf32>
    %c0_38 = arith.constant 0 : index
    %c0_39 = arith.constant 0 : index
    %42 = vector.load %arg11[%c0_38, %c0_39] : memref<16x16xf32, #tpu.memory_space<vmem>>, vector<16x16xf32>
    tpu.vector_store %arg11[%c0_38, %c0_39], %41 {strides = array<i32>} : memref<16x16xf32, #tpu.memory_space<vmem>>, vector<16x16xf32>,
    %c0_i32_40 = arith.constant 0 : i32
    %43 = arith.cmpi eq, %arg1, %c0_i32_40 : i32
    %44 = arith.extui %43 : i1 to i32
    %c0_i32_41 = arith.constant 0 : i32
    %45 = arith.cmpi ne, %44, %c0_i32_41 : i32
    scf.if %45 {
      %c0_42 = arith.constant 0 : index
      %c0_43 = arith.constant 0 : index
      %46 = vector.load %arg11[%c0_42, %c0_43] : memref<16x16xf32, #tpu.memory_space<vmem>>, vector<16x16xf32>
      %c0_44 = arith.constant 0 : index
      %c0_45 = arith.constant 0 : index
      %c0_46 = arith.constant 0 : index
      %47 = vector.load %arg7[%c0_44, %c0_45, %c0_46] : memref<1x1x1xf32, #tpu.memory_space<vmem>>, vector<1x1x1xf32>
      %c0_47 = arith.constant 0 : index
      %c0_48 = arith.constant 0 : index
      %48 = vector.load %arg10[%c0_47, %c0_48] : memref<16x16xf32, #tpu.memory_space<vmem>>, vector<16x16xf32>
      %49 = arith.subf %48, %46 : vector<16x16xf32>
      %50 = math.absf %49 : vector<16x16xf32>
      %51 = vector.shape_cast %50 : vector<16x16xf32> to vector<1x16x16xf32>
      %cst_49 = arith.constant dense<0.000000e+00> : vector<1xf32>
      %52 = vector.multi_reduction <add>, %51, %cst_49 [1, 2] : vector<1x16x16xf32> to vector<1xf32>
      %53 = vector.shape_cast %52 : vector<1xf32> to vector<1x1x1xf32>
      %54 = vector.extract %53[0, 0, 0] : f32 from vector<1x1x1xf32>
      %55 = vector.broadcast %54 : f32 to vector<1x1xf32>
      %56 = vector.shape_cast %55 : vector<1x1xf32> to vector<1x1x1xf32>
      %57 = arith.addf %47, %56 : vector<1x1x1xf32>
      %c0_50 = arith.constant 0 : index
      %c0_51 = arith.constant 0 : index
      %c0_52 = arith.constant 0 : index
      %58 = vector.load %arg7[%c0_50, %c0_51, %c0_52] : memref<1x1x1xf32, #tpu.memory_space<vmem>>, vector<1x1x1xf32>
      tpu.vector_store %arg7[%c0_50, %c0_51, %c0_52], %57 {strides = array<i32>} : memref<1x1x1xf32, #tpu.memory_space<vmem>>, vector<1x1x1xf32>,
      %c0_53 = arith.constant 0 : index
      %c0_54 = arith.constant 0 : index
      %c0_55 = arith.constant 0 : index
      %59 = vector.load %arg8[%c0_53, %c0_54, %c0_55] : memref<1x1x1xf32, #tpu.memory_space<vmem>>, vector<1x1x1xf32>
      %c0_56 = arith.constant 0 : index
      %c0_57 = arith.constant 0 : index
      %60 = vector.load %arg9[%c0_56, %c0_57] : memref<16x16xf32, #tpu.memory_space<vmem>>, vector<16x16xf32>
      %61 = arith.subf %60, %46 : vector<16x16xf32>
      %62 = math.absf %61 : vector<16x16xf32>
      %63 = vector.shape_cast %62 : vector<16x16xf32> to vector<1x16x16xf32>
      %cst_58 = arith.constant dense<0.000000e+00> : vector<1xf32>
      %64 = vector.multi_reduction <add>, %63, %cst_58 [1, 2] : vector<1x16x16xf32> to vector<1xf32>
      %65 = vector.shape_cast %64 : vector<1xf32> to vector<1x1x1xf32>
      %66 = vector.extract %65[0, 0, 0] : f32 from vector<1x1x1xf32>
      %67 = vector.broadcast %66 : f32 to vector<1x1xf32>
      %68 = vector.shape_cast %67 : vector<1x1xf32> to vector<1x1x1xf32>
      %69 = arith.addf %59, %68 : vector<1x1x1xf32>
      %c0_59 = arith.constant 0 : index
      %c0_60 = arith.constant 0 : index
      %c0_61 = arith.constant 0 : index
      %70 = vector.load %arg8[%c0_59, %c0_60, %c0_61] : memref<1x1x1xf32, #tpu.memory_space<vmem>>, vector<1x1x1xf32>
      tpu.vector_store %arg8[%c0_59, %c0_60, %c0_61], %69 {strides = array<i32>} : memref<1x1x1xf32, #tpu.memory_space<vmem>>, vector<1x1x1xf32>,
    } else {
    }
    return
  }
  func.func @transform_0(%arg0: i32, %arg1: i32) -> (i32, i32, i32, i32) {
    %c0_i32 = arith.constant 0 : i32
    %c0_i32_0 = arith.constant 0 : i32
    %c0_i32_1 = arith.constant 0 : i32
    return %c0_i32, %arg0, %arg1, %c0_i32_0 : i32, i32, i32, i32
  }
  func.func @transform_1(%arg0: i32, %arg1: i32) -> (i32, i32, i32, i32) {
    %c1_i32 = arith.constant 1 : i32
    %c0_i32 = arith.constant 0 : i32
    %c0_i32_0 = arith.constant 0 : i32
    return %c1_i32, %arg0, %arg1, %c0_i32 : i32, i32, i32, i32
  }
  func.func @transform_2(%arg0: i32, %arg1: i32) -> (i32, i32, i32, i32) {
    %c2_i32 = arith.constant 2 : i32
    %c0_i32 = arith.constant 0 : i32
    %c0_i32_0 = arith.constant 0 : i32
    return %c2_i32, %arg0, %arg1, %c0_i32 : i32, i32, i32, i32
  }
  func.func @transform_3(%arg0: i32, %arg1: i32) -> (i32, i32, i32) {
    %c0_i32 = arith.constant 0 : i32
    %c0_i32_0 = arith.constant 0 : i32
    %c0_i32_1 = arith.constant 0 : i32
    return %arg0, %c0_i32, %c0_i32_0 : i32, i32, i32
  }
  func.func @transform_4(%arg0: i32, %arg1: i32) -> (i32, i32, i32) {
    %c0_i32 = arith.constant 0 : i32
    %c0_i32_0 = arith.constant 0 : i32
    %c0_i32_1 = arith.constant 0 : i32
    return %arg0, %c0_i32, %c0_i32_0 : i32, i32, i32
  }
  func.func @transform_5(%arg0: i32, %arg1: i32) -> (i32, i32, i32) {
    %c0_i32 = arith.constant 0 : i32
    %c0_i32_0 = arith.constant 0 : i32
    %c0_i32_1 = arith.constant 0 : i32
    return %arg0, %c0_i32, %c0_i32_0 : i32, i32, i32
  }
  func.func @transform_6(%arg0: i32, %arg1: i32) -> (i32, i32, i32) {
    %c0_i32 = arith.constant 0 : i32
    %c0_i32_0 = arith.constant 0 : i32
    %c0_i32_1 = arith.constant 0 : i32
    return %arg0, %c0_i32, %c0_i32_0 : i32, i32, i32
  }
}

module attributes {stable_mosaic.version = 11 : i64} {
  func.func @_mm_bias_act_kernel(%arg0: i32, %arg1: memref<6x256xf32, #tpu.memory_space<vmem>>, %arg2: memref<256x128xf32, #tpu.memory_space<vmem>>, %arg3: memref<1x128xf32, #tpu.memory_space<vmem>>, %arg4: memref<6x128xf32, #tpu.memory_space<vmem>>) attributes {dimension_semantics = [#tpu.dimension_semantics<parallel>], iteration_bounds = array<i64: 1>, scalar_prefetch = 0 : i64, scratch_operands = 0 : i64, tpu.core_type = #tpu.core_type<tc>, window_params = [{transform_indices = @transform_0, window_bounds = array<i64: 6, 256>}, {pipeline_mode = #tpu.pipeline_mode<synchronous>, transform_indices = @transform_1, window_bounds = array<i64: 256, 128>}, {pipeline_mode = #tpu.pipeline_mode<synchronous>, transform_indices = @transform_2, window_bounds = array<i64: 1, 128>}, {transform_indices = @transform_3, window_bounds = array<i64: 6, 128>}]} {
    %c0 = arith.constant 0 : index
    %c0_0 = arith.constant 0 : index
    %0 = vector.load %arg1[%c0, %c0_0] : memref<6x256xf32, #tpu.memory_space<vmem>>, vector<6x256xf32>
    %c0_1 = arith.constant 0 : index
    %c0_2 = arith.constant 0 : index
    %1 = vector.load %arg2[%c0_1, %c0_2] : memref<256x128xf32, #tpu.memory_space<vmem>>, vector<256x128xf32>
    %cst = arith.constant dense<0.000000e+00> : vector<6x128xf32>
    %2 = tpu.matmul %0, %1, %cst {dimension_numbers = #tpu.dot_dimension_numbers<[1], [0], [0], [1], [0, 0, 1, 1], [], []>} : vector<6x256xf32>, vector<256x128xf32>, vector<6x128xf32> -> vector<6x128xf32>
    %c0_3 = arith.constant 0 : index
    %c0_4 = arith.constant 0 : index
    %3 = vector.load %arg3[%c0_3, %c0_4] : memref<1x128xf32, #tpu.memory_space<vmem>>, vector<1x128xf32>
    %4 = vector.broadcast %3 : vector<1x128xf32> to vector<6x128xf32>
    %5 = arith.addf %2, %4 : vector<6x128xf32>
    %cst_5 = arith.constant 0.000000e+00 : f32
    %6 = vector.broadcast %cst_5 : f32 to vector<6x128xf32>
    %7 = arith.maximumf %5, %6 : vector<6x128xf32>
    %c0_6 = arith.constant 0 : index
    %c0_7 = arith.constant 0 : index
    %8 = vector.load %arg4[%c0_6, %c0_7] : memref<6x128xf32, #tpu.memory_space<vmem>>, vector<6x128xf32>
    tpu.vector_store %arg4[%c0_6, %c0_7], %7 {strides = array<i32>} : memref<6x128xf32, #tpu.memory_space<vmem>>, vector<6x128xf32>,
    return
  }
  func.func @transform_0(%arg0: i32) -> (i32, i32) {
    %c0_i32 = arith.constant 0 : i32
    %c0_i32_0 = arith.constant 0 : i32
    return %arg0, %c0_i32 : i32, i32
  }
  func.func @transform_1(%arg0: i32) -> (i32, i32) {
    %c0_i32 = arith.constant 0 : i32
    %c0_i32_0 = arith.constant 0 : i32
    %c0_i32_1 = arith.constant 0 : i32
    return %c0_i32, %c0_i32_0 : i32, i32
  }
  func.func @transform_2(%arg0: i32) -> (i32, i32) {
    %c0_i32 = arith.constant 0 : i32
    %c0_i32_0 = arith.constant 0 : i32
    %c0_i32_1 = arith.constant 0 : i32
    return %c0_i32, %c0_i32_0 : i32, i32
  }
  func.func @transform_3(%arg0: i32) -> (i32, i32) {
    %c0_i32 = arith.constant 0 : i32
    %c0_i32_0 = arith.constant 0 : i32
    return %arg0, %c0_i32 : i32, i32
  }
}

module attributes {stable_mosaic.version = 11 : i64} {
  func.func @_feat_loss_kernel(%arg0: i32, %arg1: i32, %arg2: memref<1x1x4x32xf32, #tpu.memory_space<vmem>>, %arg3: memref<1x1x4x32xf32, #tpu.memory_space<vmem>>, %arg4: memref<1x1x4x32xf32, #tpu.memory_space<vmem>>, %arg5: memref<1x1x1xf32, #tpu.memory_space<vmem>>, %arg6: memref<1x1x1xf32, #tpu.memory_space<vmem>>, %arg7: memref<1x1x1xf32, #tpu.memory_space<vmem>>, %arg8: memref<1x1x1xf32, #tpu.memory_space<vmem>>, %arg9: memref<32x32xf32, #tpu.memory_space<vmem>>, %arg10: memref<32x32xf32, #tpu.memory_space<vmem>>, %arg11: memref<32x32xf32, #tpu.memory_space<vmem>>) attributes {dimension_semantics = [#tpu.dimension_semantics<parallel>, #tpu.dimension_semantics<arbitrary>], iteration_bounds = array<i64: 2, 1>, scalar_prefetch = 0 : i64, scratch_operands = 3 : i64, tpu.core_type = #tpu.core_type<tc>, window_params = [{transform_indices = @transform_0, window_bounds = array<i64: 1, 1, 4, 32>}, {transform_indices = @transform_1, window_bounds = array<i64: 1, 1, 4, 32>}, {transform_indices = @transform_2, window_bounds = array<i64: 1, 1, 4, 32>}, {transform_indices = @transform_3, window_bounds = array<i64: 1, 1, 1>}, {transform_indices = @transform_4, window_bounds = array<i64: 1, 1, 1>}, {transform_indices = @transform_5, window_bounds = array<i64: 1, 1, 1>}, {transform_indices = @transform_6, window_bounds = array<i64: 1, 1, 1>}]} {
    %c0_i32 = arith.constant 0 : i32
    %0 = arith.cmpi eq, %arg1, %c0_i32 : i32
    %1 = arith.extui %0 : i1 to i32
    %c0_i32_0 = arith.constant 0 : i32
    %2 = arith.cmpi ne, %1, %c0_i32_0 : i32
    scf.if %2 {
      %cst_42 = arith.constant 0.000000e+00 : f32
      %46 = vector.broadcast %cst_42 : f32 to vector<1x1x1xf32>
      %c0_43 = arith.constant 0 : index
      %c0_44 = arith.constant 0 : index
      %c0_45 = arith.constant 0 : index
      %47 = vector.load %arg5[%c0_43, %c0_44, %c0_45] : memref<1x1x1xf32, #tpu.memory_space<vmem>>, vector<1x1x1xf32>
      tpu.vector_store %arg5[%c0_43, %c0_44, %c0_45], %46 {strides = array<i32>} : memref<1x1x1xf32, #tpu.memory_space<vmem>>, vector<1x1x1xf32>,
      %cst_46 = arith.constant 0.000000e+00 : f32
      %48 = vector.broadcast %cst_46 : f32 to vector<1x1x1xf32>
      %c0_47 = arith.constant 0 : index
      %c0_48 = arith.constant 0 : index
      %c0_49 = arith.constant 0 : index
      %49 = vector.load %arg6[%c0_47, %c0_48, %c0_49] : memref<1x1x1xf32, #tpu.memory_space<vmem>>, vector<1x1x1xf32>
      tpu.vector_store %arg6[%c0_47, %c0_48, %c0_49], %48 {strides = array<i32>} : memref<1x1x1xf32, #tpu.memory_space<vmem>>, vector<1x1x1xf32>,
      %cst_50 = arith.constant 0.000000e+00 : f32
      %50 = vector.broadcast %cst_50 : f32 to vector<1x1x1xf32>
      %c0_51 = arith.constant 0 : index
      %c0_52 = arith.constant 0 : index
      %c0_53 = arith.constant 0 : index
      %51 = vector.load %arg7[%c0_51, %c0_52, %c0_53] : memref<1x1x1xf32, #tpu.memory_space<vmem>>, vector<1x1x1xf32>
      tpu.vector_store %arg7[%c0_51, %c0_52, %c0_53], %50 {strides = array<i32>} : memref<1x1x1xf32, #tpu.memory_space<vmem>>, vector<1x1x1xf32>,
      %cst_54 = arith.constant 0.000000e+00 : f32
      %52 = vector.broadcast %cst_54 : f32 to vector<1x1x1xf32>
      %c0_55 = arith.constant 0 : index
      %c0_56 = arith.constant 0 : index
      %c0_57 = arith.constant 0 : index
      %53 = vector.load %arg8[%c0_55, %c0_56, %c0_57] : memref<1x1x1xf32, #tpu.memory_space<vmem>>, vector<1x1x1xf32>
      tpu.vector_store %arg8[%c0_55, %c0_56, %c0_57], %52 {strides = array<i32>} : memref<1x1x1xf32, #tpu.memory_space<vmem>>, vector<1x1x1xf32>,
      %cst_58 = arith.constant 0.000000e+00 : f32
      %54 = vector.broadcast %cst_58 : f32 to vector<32x32xf32>
      %c0_59 = arith.constant 0 : index
      %c0_60 = arith.constant 0 : index
      %55 = vector.load %arg9[%c0_59, %c0_60] : memref<32x32xf32, #tpu.memory_space<vmem>>, vector<32x32xf32>
      tpu.vector_store %arg9[%c0_59, %c0_60], %54 {strides = array<i32>} : memref<32x32xf32, #tpu.memory_space<vmem>>, vector<32x32xf32>,
      %cst_61 = arith.constant 0.000000e+00 : f32
      %56 = vector.broadcast %cst_61 : f32 to vector<32x32xf32>
      %c0_62 = arith.constant 0 : index
      %c0_63 = arith.constant 0 : index
      %57 = vector.load %arg10[%c0_62, %c0_63] : memref<32x32xf32, #tpu.memory_space<vmem>>, vector<32x32xf32>
      tpu.vector_store %arg10[%c0_62, %c0_63], %56 {strides = array<i32>} : memref<32x32xf32, #tpu.memory_space<vmem>>, vector<32x32xf32>,
      %cst_64 = arith.constant 0.000000e+00 : f32
      %58 = vector.broadcast %cst_64 : f32 to vector<32x32xf32>
      %c0_65 = arith.constant 0 : index
      %c0_66 = arith.constant 0 : index
      %59 = vector.load %arg11[%c0_65, %c0_66] : memref<32x32xf32, #tpu.memory_space<vmem>>, vector<32x32xf32>
      tpu.vector_store %arg11[%c0_65, %c0_66], %58 {strides = array<i32>} : memref<32x32xf32, #tpu.memory_space<vmem>>, vector<32x32xf32>,
    } else {
    }
    %c0 = arith.constant 0 : index
    %c0_1 = arith.constant 0 : index
    %c0_2 = arith.constant 0 : index
    %c0_3 = arith.constant 0 : index
    %3 = vector.load %arg2[%c0, %c0_1, %c0_2, %c0_3] : memref<1x1x4x32xf32, #tpu.memory_space<vmem>>, vector<1x1x4x32xf32>
    %4 = vector.shape_cast %3 : vector<1x1x4x32xf32> to vector<4x32xf32>
    %c0_4 = arith.constant 0 : index
    %c0_5 = arith.constant 0 : index
    %c0_6 = arith.constant 0 : index
    %c0_7 = arith.constant 0 : index
    %5 = vector.load %arg3[%c0_4, %c0_5, %c0_6, %c0_7] : memref<1x1x4x32xf32, #tpu.memory_space<vmem>>, vector<1x1x4x32xf32>
    %6 = vector.shape_cast %5 : vector<1x1x4x32xf32> to vector<4x32xf32>
    %c0_8 = arith.constant 0 : index
    %c0_9 = arith.constant 0 : index
    %c0_10 = arith.constant 0 : index
    %c0_11 = arith.constant 0 : index
    %7 = vector.load %arg4[%c0_8, %c0_9, %c0_10, %c0_11] : memref<1x1x4x32xf32, #tpu.memory_space<vmem>>, vector<1x1x4x32xf32>
    %8 = vector.shape_cast %7 : vector<1x1x4x32xf32> to vector<4x32xf32>
    %c0_12 = arith.constant 0 : index
    %c0_13 = arith.constant 0 : index
    %c0_14 = arith.constant 0 : index
    %9 = vector.load %arg5[%c0_12, %c0_13, %c0_14] : memref<1x1x1xf32, #tpu.memory_space<vmem>>, vector<1x1x1xf32>
    %10 = arith.subf %6, %8 : vector<4x32xf32>
    %11 = math.absf %10 : vector<4x32xf32>
    %12 = vector.shape_cast %11 : vector<4x32xf32> to vector<1x4x32xf32>
    %cst = arith.constant dense<0.000000e+00> : vector<1xf32>
    %13 = vector.multi_reduction <add>, %12, %cst [1, 2] : vector<1x4x32xf32> to vector<1xf32>
    %14 = vector.shape_cast %13 : vector<1xf32> to vector<1x1x1xf32>
    %15 = vector.extract %14[0, 0, 0] : f32 from vector<1x1x1xf32>
    %16 = vector.broadcast %15 : f32 to vector<1x1xf32>
    %17 = vector.shape_cast %16 : vector<1x1xf32> to vector<1x1x1xf32>
    %18 = arith.addf %9, %17 : vector<1x1x1xf32>
    %c0_15 = arith.constant 0 : index
    %c0_16 = arith.constant 0 : index
    %c0_17 = arith.constant 0 : index
    %19 = vector.load %arg5[%c0_15, %c0_16, %c0_17] : memref<1x1x1xf32, #tpu.memory_space<vmem>>, vector<1x1x1xf32>
    tpu.vector_store %arg5[%c0_15, %c0_16, %c0_17], %18 {strides = array<i32>} : memref<1x1x1xf32, #tpu.memory_space<vmem>>, vector<1x1x1xf32>,
    %c0_18 = arith.constant 0 : index
    %c0_19 = arith.constant 0 : index
    %c0_20 = arith.constant 0 : index
    %20 = vector.load %arg6[%c0_18, %c0_19, %c0_20] : memref<1x1x1xf32, #tpu.memory_space<vmem>>, vector<1x1x1xf32>
    %21 = arith.subf %4, %8 : vector<4x32xf32>
    %22 = math.absf %21 : vector<4x32xf32>
    %23 = vector.shape_cast %22 : vector<4x32xf32> to vector<1x4x32xf32>
    %cst_21 = arith.constant dense<0.000000e+00> : vector<1xf32>
    %24 = vector.multi_reduction <add>, %23, %cst_21 [1, 2] : vector<1x4x32xf32> to vector<1xf32>
    %25 = vector.shape_cast %24 : vector<1xf32> to vector<1x1x1xf32>
    %26 = vector.extract %25[0, 0, 0] : f32 from vector<1x1x1xf32>
    %27 = vector.broadcast %26 : f32 to vector<1x1xf32>
    %28 = vector.shape_cast %27 : vector<1x1xf32> to vector<1x1x1xf32>
    %29 = arith.addf %20, %28 : vector<1x1x1xf32>
    %c0_22 = arith.constant 0 : index
    %c0_23 = arith.constant 0 : index
    %c0_24 = arith.constant 0 : index
    %30 = vector.load %arg6[%c0_22, %c0_23, %c0_24] : memref<1x1x1xf32, #tpu.memory_space<vmem>>, vector<1x1x1xf32>
    tpu.vector_store %arg6[%c0_22, %c0_23, %c0_24], %29 {strides = array<i32>} : memref<1x1x1xf32, #tpu.memory_space<vmem>>, vector<1x1x1xf32>,
    %c0_25 = arith.constant 0 : index
    %c0_26 = arith.constant 0 : index
    %31 = vector.load %arg9[%c0_25, %c0_26] : memref<32x32xf32, #tpu.memory_space<vmem>>, vector<32x32xf32>
    %cst_27 = arith.constant dense<0.000000e+00> : vector<32x32xf32>
    %32 = tpu.matmul %4, %4, %cst_27 {dimension_numbers = #tpu.dot_dimension_numbers<[0], [0], [1], [1], [0, 1, 1, 1], [], []>} : vector<4x32xf32>, vector<4x32xf32>, vector<32x32xf32> -> vector<32x32xf32>
    %33 = arith.addf %31, %32 : vector<32x32xf32>
    %c0_28 = arith.constant 0 : index
    %c0_29 = arith.constant 0 : index
    %34 = vector.load %arg9[%c0_28, %c0_29] : memref<32x32xf32, #tpu.memory_space<vmem>>, vector<32x32xf32>
    tpu.vector_store %arg9[%c0_28, %c0_29], %33 {strides = array<i32>} : memref<32x32xf32, #tpu.memory_space<vmem>>, vector<32x32xf32>,
    %c0_30 = arith.constant 0 : index
    %c0_31 = arith.constant 0 : index
    %35 = vector.load %arg10[%c0_30, %c0_31] : memref<32x32xf32, #tpu.memory_space<vmem>>, vector<32x32xf32>
    %cst_32 = arith.constant dense<0.000000e+00> : vector<32x32xf32>
    %36 = tpu.matmul %6, %6, %cst_32 {dimension_numbers = #tpu.dot_dimension_numbers<[0], [0], [1], [1], [0, 1, 1, 1], [], []>} : vector<4x32xf32>, vector<4x32xf32>, vector<32x32xf32> -> vector<32x32xf32>
    %37 = arith.addf %35, %36 : vector<32x32xf32>
    %c0_33 = arith.constant 0 : index
    %c0_34 = arith.constant 0 : index
    %38 = vector.load %arg10[%c0_33, %c0_34] : memref<32x32xf32, #tpu.memory_space<vmem>>, vector<32x32xf32>
    tpu.vector_store %arg10[%c0_33, %c0_34], %37 {strides = array<i32>} : memref<32x32xf32, #tpu.memory_space<vmem>>, vector<32x32xf32>,
    %c0_35 = arith.constant 0 : index
    %c0_36 = arith.constant 0 : index
    %39 = vector.load %arg11[%c0_35, %c0_36] : memref<32x32xf32, #tpu.memory_space<vmem>>, vector<32x32xf32>
    %cst_37 = arith.constant dense<0.000000e+00> : vector<32x32xf32>
    %40 = tpu.matmul %8, %8, %cst_37 {dimension_numbers = #tpu.dot_dimension_numbers<[0], [0], [1], [1], [0, 1, 1, 1], [], []>} : vector<4x32xf32>, vector<4x32xf32>, vector<32x32xf32> -> vector<32x32xf32>
    %41 = arith.addf %39, %40 : vector<32x32xf32>
    %c0_38 = arith.constant 0 : index
    %c0_39 = arith.constant 0 : index
    %42 = vector.load %arg11[%c0_38, %c0_39] : memref<32x32xf32, #tpu.memory_space<vmem>>, vector<32x32xf32>
    tpu.vector_store %arg11[%c0_38, %c0_39], %41 {strides = array<i32>} : memref<32x32xf32, #tpu.memory_space<vmem>>, vector<32x32xf32>,
    %c0_i32_40 = arith.constant 0 : i32
    %43 = arith.cmpi eq, %arg1, %c0_i32_40 : i32
    %44 = arith.extui %43 : i1 to i32
    %c0_i32_41 = arith.constant 0 : i32
    %45 = arith.cmpi ne, %44, %c0_i32_41 : i32
    scf.if %45 {
      %c0_42 = arith.constant 0 : index
      %c0_43 = arith.constant 0 : index
      %46 = vector.load %arg11[%c0_42, %c0_43] : memref<32x32xf32, #tpu.memory_space<vmem>>, vector<32x32xf32>
      %c0_44 = arith.constant 0 : index
      %c0_45 = arith.constant 0 : index
      %c0_46 = arith.constant 0 : index
      %47 = vector.load %arg7[%c0_44, %c0_45, %c0_46] : memref<1x1x1xf32, #tpu.memory_space<vmem>>, vector<1x1x1xf32>
      %c0_47 = arith.constant 0 : index
      %c0_48 = arith.constant 0 : index
      %48 = vector.load %arg10[%c0_47, %c0_48] : memref<32x32xf32, #tpu.memory_space<vmem>>, vector<32x32xf32>
      %49 = arith.subf %48, %46 : vector<32x32xf32>
      %50 = math.absf %49 : vector<32x32xf32>
      %51 = vector.shape_cast %50 : vector<32x32xf32> to vector<1x32x32xf32>
      %cst_49 = arith.constant dense<0.000000e+00> : vector<1xf32>
      %52 = vector.multi_reduction <add>, %51, %cst_49 [1, 2] : vector<1x32x32xf32> to vector<1xf32>
      %53 = vector.shape_cast %52 : vector<1xf32> to vector<1x1x1xf32>
      %54 = vector.extract %53[0, 0, 0] : f32 from vector<1x1x1xf32>
      %55 = vector.broadcast %54 : f32 to vector<1x1xf32>
      %56 = vector.shape_cast %55 : vector<1x1xf32> to vector<1x1x1xf32>
      %57 = arith.addf %47, %56 : vector<1x1x1xf32>
      %c0_50 = arith.constant 0 : index
      %c0_51 = arith.constant 0 : index
      %c0_52 = arith.constant 0 : index
      %58 = vector.load %arg7[%c0_50, %c0_51, %c0_52] : memref<1x1x1xf32, #tpu.memory_space<vmem>>, vector<1x1x1xf32>
      tpu.vector_store %arg7[%c0_50, %c0_51, %c0_52], %57 {strides = array<i32>} : memref<1x1x1xf32, #tpu.memory_space<vmem>>, vector<1x1x1xf32>,
      %c0_53 = arith.constant 0 : index
      %c0_54 = arith.constant 0 : index
      %c0_55 = arith.constant 0 : index
      %59 = vector.load %arg8[%c0_53, %c0_54, %c0_55] : memref<1x1x1xf32, #tpu.memory_space<vmem>>, vector<1x1x1xf32>
      %c0_56 = arith.constant 0 : index
      %c0_57 = arith.constant 0 : index
      %60 = vector.load %arg9[%c0_56, %c0_57] : memref<32x32xf32, #tpu.memory_space<vmem>>, vector<32x32xf32>
      %61 = arith.subf %60, %46 : vector<32x32xf32>
      %62 = math.absf %61 : vector<32x32xf32>
      %63 = vector.shape_cast %62 : vector<32x32xf32> to vector<1x32x32xf32>
      %cst_58 = arith.constant dense<0.000000e+00> : vector<1xf32>
      %64 = vector.multi_reduction <add>, %63, %cst_58 [1, 2] : vector<1x32x32xf32> to vector<1xf32>
      %65 = vector.shape_cast %64 : vector<1xf32> to vector<1x1x1xf32>
      %66 = vector.extract %65[0, 0, 0] : f32 from vector<1x1x1xf32>
      %67 = vector.broadcast %66 : f32 to vector<1x1xf32>
      %68 = vector.shape_cast %67 : vector<1x1xf32> to vector<1x1x1xf32>
      %69 = arith.addf %59, %68 : vector<1x1x1xf32>
      %c0_59 = arith.constant 0 : index
      %c0_60 = arith.constant 0 : index
      %c0_61 = arith.constant 0 : index
      %70 = vector.load %arg8[%c0_59, %c0_60, %c0_61] : memref<1x1x1xf32, #tpu.memory_space<vmem>>, vector<1x1x1xf32>
      tpu.vector_store %arg8[%c0_59, %c0_60, %c0_61], %69 {strides = array<i32>} : memref<1x1x1xf32, #tpu.memory_space<vmem>>, vector<1x1x1xf32>,
    } else {
    }
    return
  }
  func.func @transform_0(%arg0: i32, %arg1: i32) -> (i32, i32, i32, i32) {
    %c0_i32 = arith.constant 0 : i32
    %c0_i32_0 = arith.constant 0 : i32
    %c0_i32_1 = arith.constant 0 : i32
    return %c0_i32, %arg0, %arg1, %c0_i32_0 : i32, i32, i32, i32
  }
  func.func @transform_1(%arg0: i32, %arg1: i32) -> (i32, i32, i32, i32) {
    %c1_i32 = arith.constant 1 : i32
    %c0_i32 = arith.constant 0 : i32
    %c0_i32_0 = arith.constant 0 : i32
    return %c1_i32, %arg0, %arg1, %c0_i32 : i32, i32, i32, i32
  }
  func.func @transform_2(%arg0: i32, %arg1: i32) -> (i32, i32, i32, i32) {
    %c2_i32 = arith.constant 2 : i32
    %c0_i32 = arith.constant 0 : i32
    %c0_i32_0 = arith.constant 0 : i32
    return %c2_i32, %arg0, %arg1, %c0_i32 : i32, i32, i32, i32
  }
  func.func @transform_3(%arg0: i32, %arg1: i32) -> (i32, i32, i32) {
    %c0_i32 = arith.constant 0 : i32
    %c0_i32_0 = arith.constant 0 : i32
    %c0_i32_1 = arith.constant 0 : i32
    return %arg0, %c0_i32, %c0_i32_0 : i32, i32, i32
  }
  func.func @transform_4(%arg0: i32, %arg1: i32) -> (i32, i32, i32) {
    %c0_i32 = arith.constant 0 : i32
    %c0_i32_0 = arith.constant 0 : i32
    %c0_i32_1 = arith.constant 0 : i32
    return %arg0, %c0_i32, %c0_i32_0 : i32, i32, i32
  }
  func.func @transform_5(%arg0: i32, %arg1: i32) -> (i32, i32, i32) {
    %c0_i32 = arith.constant 0 : i32
    %c0_i32_0 = arith.constant 0 : i32
    %c0_i32_1 = arith.constant 0 : i32
    return %arg0, %c0_i32, %c0_i32_0 : i32, i32, i32
  }
  func.func @transform_6(%arg0: i32, %arg1: i32) -> (i32, i32, i32) {
    %c0_i32 = arith.constant 0 : i32
    %c0_i32_0 = arith.constant 0 : i32
    %c0_i32_1 = arith.constant 0 : i32
    return %arg0, %c0_i32, %c0_i32_0 : i32, i32, i32
  }
}

module attributes {stable_mosaic.version = 11 : i64} {
  func.func @_disc_kernel(%arg0: i32, %arg1: i32, %arg2: memref<8x192xf32, #tpu.memory_space<vmem>>, %arg3: memref<192x128xf32, #tpu.memory_space<vmem>>, %arg4: memref<1x128xf32, #tpu.memory_space<vmem>>, %arg5: memref<128x64xf32, #tpu.memory_space<vmem>>, %arg6: memref<1x64xf32, #tpu.memory_space<vmem>>, %arg7: memref<64x16xf32, #tpu.memory_space<vmem>>, %arg8: memref<1x16xf32, #tpu.memory_space<vmem>>, %arg9: memref<1x16xf32, #tpu.memory_space<vmem>>, %arg10: memref<1x1x1xf32, #tpu.memory_space<vmem>>) attributes {dimension_semantics = [#tpu.dimension_semantics<parallel>, #tpu.dimension_semantics<arbitrary>], iteration_bounds = array<i64: 2, 1>, scalar_prefetch = 0 : i64, scratch_operands = 0 : i64, tpu.core_type = #tpu.core_type<tc>, window_params = [{transform_indices = @transform_0, window_bounds = array<i64: 8, 192>}, {pipeline_mode = #tpu.pipeline_mode<synchronous>, transform_indices = @transform_1, window_bounds = array<i64: 192, 128>}, {pipeline_mode = #tpu.pipeline_mode<synchronous>, transform_indices = @transform_2, window_bounds = array<i64: 1, 128>}, {pipeline_mode = #tpu.pipeline_mode<synchronous>, transform_indices = @transform_3, window_bounds = array<i64: 128, 64>}, {pipeline_mode = #tpu.pipeline_mode<synchronous>, transform_indices = @transform_4, window_bounds = array<i64: 1, 64>}, {pipeline_mode = #tpu.pipeline_mode<synchronous>, transform_indices = @transform_5, window_bounds = array<i64: 64, 16>}, {pipeline_mode = #tpu.pipeline_mode<synchronous>, transform_indices = @transform_6, window_bounds = array<i64: 1, 16>}, {pipeline_mode = #tpu.pipeline_mode<synchronous>, transform_indices = @transform_7, window_bounds = array<i64: 1, 16>}, {transform_indices = @transform_8, window_bounds = array<i64: 1, 1, 1>}]} {
    %c0_i32 = arith.constant 0 : i32
    %0 = arith.cmpi eq, %arg1, %c0_i32 : i32
    %1 = arith.extui %0 : i1 to i32
    %c0_i32_0 = arith.constant 0 : i32
    %2 = arith.cmpi ne, %1, %c0_i32_0 : i32
    scf.if %2 {
      %cst_32 = arith.constant 0.000000e+00 : f32
      %44 = vector.broadcast %cst_32 : f32 to vector<1x1x1xf32>
      %c0_33 = arith.constant 0 : index
      %c0_34 = arith.constant 0 : index
      %c0_35 = arith.constant 0 : index
      %45 = vector.load %arg10[%c0_33, %c0_34, %c0_35] : memref<1x1x1xf32, #tpu.memory_space<vmem>>, vector<1x1x1xf32>
      tpu.vector_store %arg10[%c0_33, %c0_34, %c0_35], %44 {strides = array<i32>} : memref<1x1x1xf32, #tpu.memory_space<vmem>>, vector<1x1x1xf32>,
    } else {
    }
    %c0 = arith.constant 0 : index
    %c0_1 = arith.constant 0 : index
    %3 = vector.load %arg2[%c0, %c0_1] : memref<8x192xf32, #tpu.memory_space<vmem>>, vector<8x192xf32>
    %c0_2 = arith.constant 0 : index
    %c0_3 = arith.constant 0 : index
    %4 = vector.load %arg3[%c0_2, %c0_3] : memref<192x128xf32, #tpu.memory_space<vmem>>, vector<192x128xf32>
    %cst = arith.constant dense<0.000000e+00> : vector<8x128xf32>
    %5 = tpu.matmul %3, %4, %cst {dimension_numbers = #tpu.dot_dimension_numbers<[1], [0], [0], [1], [0, 0, 1, 1], [], []>} : vector<8x192xf32>, vector<192x128xf32>, vector<8x128xf32> -> vector<8x128xf32>
    %c0_4 = arith.constant 0 : index
    %c0_5 = arith.constant 0 : index
    %6 = vector.load %arg4[%c0_4, %c0_5] : memref<1x128xf32, #tpu.memory_space<vmem>>, vector<1x128xf32>
    %7 = vector.broadcast %6 : vector<1x128xf32> to vector<8x128xf32>
    %8 = arith.addf %5, %7 : vector<8x128xf32>
    %cst_6 = arith.constant 0.000000e+00 : f32
    %9 = vector.broadcast %cst_6 : f32 to vector<8x128xf32>
    %10 = arith.cmpf ogt, %8, %9 : vector<8x128xf32>
    %cst_7 = arith.constant 2.000000e-01 : f32
    %11 = vector.broadcast %cst_7 : f32 to vector<8x128xf32>
    %12 = arith.mulf %11, %8 : vector<8x128xf32>
    %13 = arith.select %10, %8, %12 : vector<8x128xi1>, vector<8x128xf32>
    %c0_8 = arith.constant 0 : index
    %c0_9 = arith.constant 0 : index
    %14 = vector.load %arg5[%c0_8, %c0_9] : memref<128x64xf32, #tpu.memory_space<vmem>>, vector<128x64xf32>
    %cst_10 = arith.constant dense<0.000000e+00> : vector<8x64xf32>
    %15 = tpu.matmul %13, %14, %cst_10 {dimension_numbers = #tpu.dot_dimension_numbers<[1], [0], [0], [1], [0, 0, 1, 1], [], []>} : vector<8x128xf32>, vector<128x64xf32>, vector<8x64xf32> -> vector<8x64xf32>
    %c0_11 = arith.constant 0 : index
    %c0_12 = arith.constant 0 : index
    %16 = vector.load %arg6[%c0_11, %c0_12] : memref<1x64xf32, #tpu.memory_space<vmem>>, vector<1x64xf32>
    %17 = vector.broadcast %16 : vector<1x64xf32> to vector<8x64xf32>
    %18 = arith.addf %15, %17 : vector<8x64xf32>
    %cst_13 = arith.constant 0.000000e+00 : f32
    %19 = vector.broadcast %cst_13 : f32 to vector<8x64xf32>
    %20 = arith.cmpf ogt, %18, %19 : vector<8x64xf32>
    %cst_14 = arith.constant 2.000000e-01 : f32
    %21 = vector.broadcast %cst_14 : f32 to vector<8x64xf32>
    %22 = arith.mulf %21, %18 : vector<8x64xf32>
    %23 = arith.select %20, %18, %22 : vector<8x64xi1>, vector<8x64xf32>
    %c0_15 = arith.constant 0 : index
    %c0_16 = arith.constant 0 : index
    %24 = vector.load %arg7[%c0_15, %c0_16] : memref<64x16xf32, #tpu.memory_space<vmem>>, vector<64x16xf32>
    %cst_17 = arith.constant dense<0.000000e+00> : vector<8x16xf32>
    %25 = tpu.matmul %23, %24, %cst_17 {dimension_numbers = #tpu.dot_dimension_numbers<[1], [0], [0], [1], [0, 0, 1, 1], [], []>} : vector<8x64xf32>, vector<64x16xf32>, vector<8x16xf32> -> vector<8x16xf32>
    %c0_18 = arith.constant 0 : index
    %c0_19 = arith.constant 0 : index
    %26 = vector.load %arg8[%c0_18, %c0_19] : memref<1x16xf32, #tpu.memory_space<vmem>>, vector<1x16xf32>
    %27 = vector.broadcast %26 : vector<1x16xf32> to vector<8x16xf32>
    %28 = arith.addf %25, %27 : vector<8x16xf32>
    %cst_20 = arith.constant 0.000000e+00 : f32
    %29 = vector.broadcast %cst_20 : f32 to vector<8x16xf32>
    %30 = arith.cmpf ogt, %28, %29 : vector<8x16xf32>
    %cst_21 = arith.constant 2.000000e-01 : f32
    %31 = vector.broadcast %cst_21 : f32 to vector<8x16xf32>
    %32 = arith.mulf %31, %28 : vector<8x16xf32>
    %33 = arith.select %30, %28, %32 : vector<8x16xi1>, vector<8x16xf32>
    %cst_22 = arith.constant dense<0.000000e+00> : vector<16xf32>
    %34 = vector.multi_reduction <add>, %33, %cst_22 [0] : vector<8x16xf32> to vector<16xf32>
    %35 = vector.shape_cast %34 : vector<16xf32> to vector<1x16xf32>
    %c0_23 = arith.constant 0 : index
    %c0_24 = arith.constant 0 : index
    %36 = vector.load %arg9[%c0_23, %c0_24] : memref<1x16xf32, #tpu.memory_space<vmem>>, vector<1x16xf32>
    %37 = arith.mulf %35, %36 : vector<1x16xf32>
    %cst_25 = arith.constant dense<0.000000e+00> : vector<1xf32>
    %38 = vector.multi_reduction <add>, %37, %cst_25 [1] : vector<1x16xf32> to vector<1xf32>
    %39 = vector.shape_cast %38 : vector<1xf32> to vector<1x1xf32>
    %c0_26 = arith.constant 0 : index
    %c0_27 = arith.constant 0 : index
    %c0_28 = arith.constant 0 : index
    %40 = vector.load %arg10[%c0_26, %c0_27, %c0_28] : memref<1x1x1xf32, #tpu.memory_space<vmem>>, vector<1x1x1xf32>
    %41 = vector.shape_cast %39 : vector<1x1xf32> to vector<1x1x1xf32>
    %42 = arith.addf %40, %41 : vector<1x1x1xf32>
    %c0_29 = arith.constant 0 : index
    %c0_30 = arith.constant 0 : index
    %c0_31 = arith.constant 0 : index
    %43 = vector.load %arg10[%c0_29, %c0_30, %c0_31] : memref<1x1x1xf32, #tpu.memory_space<vmem>>, vector<1x1x1xf32>
    tpu.vector_store %arg10[%c0_29, %c0_30, %c0_31], %42 {strides = array<i32>} : memref<1x1x1xf32, #tpu.memory_space<vmem>>, vector<1x1x1xf32>,
    return
  }
  func.func @transform_0(%arg0: i32, %arg1: i32) -> (i32, i32) {
    %c1_i32 = arith.constant 1 : i32
    %0 = arith.muli %arg0, %c1_i32 : i32
    %1 = arith.addi %0, %arg1 : i32
    %c0_i32 = arith.constant 0 : i32
    %c0_i32_0 = arith.constant 0 : i32
    return %1, %c0_i32 : i32, i32
  }
  func.func @transform_1(%arg0: i32, %arg1: i32) -> (i32, i32) {
    %c0_i32 = arith.constant 0 : i32
    %c0_i32_0 = arith.constant 0 : i32
    %c0_i32_1 = arith.constant 0 : i32
    return %c0_i32, %c0_i32_0 : i32, i32
  }
  func.func @transform_2(%arg0: i32, %arg1: i32) -> (i32, i32) {
    %c0_i32 = arith.constant 0 : i32
    %c0_i32_0 = arith.constant 0 : i32
    %c0_i32_1 = arith.constant 0 : i32
    return %c0_i32, %c0_i32_0 : i32, i32
  }
  func.func @transform_3(%arg0: i32, %arg1: i32) -> (i32, i32) {
    %c0_i32 = arith.constant 0 : i32
    %c0_i32_0 = arith.constant 0 : i32
    %c0_i32_1 = arith.constant 0 : i32
    return %c0_i32, %c0_i32_0 : i32, i32
  }
  func.func @transform_4(%arg0: i32, %arg1: i32) -> (i32, i32) {
    %c0_i32 = arith.constant 0 : i32
    %c0_i32_0 = arith.constant 0 : i32
    %c0_i32_1 = arith.constant 0 : i32
    return %c0_i32, %c0_i32_0 : i32, i32
  }
  func.func @transform_5(%arg0: i32, %arg1: i32) -> (i32, i32) {
    %c0_i32 = arith.constant 0 : i32
    %c0_i32_0 = arith.constant 0 : i32
    %c0_i32_1 = arith.constant 0 : i32
    return %c0_i32, %c0_i32_0 : i32, i32
  }
  func.func @transform_6(%arg0: i32, %arg1: i32) -> (i32, i32) {
    %c0_i32 = arith.constant 0 : i32
    %c0_i32_0 = arith.constant 0 : i32
    %c0_i32_1 = arith.constant 0 : i32
    return %c0_i32, %c0_i32_0 : i32, i32
  }
  func.func @transform_7(%arg0: i32, %arg1: i32) -> (i32, i32) {
    %c0_i32 = arith.constant 0 : i32
    %c0_i32_0 = arith.constant 0 : i32
    %c0_i32_1 = arith.constant 0 : i32
    return %c0_i32, %c0_i32_0 : i32, i32
  }
  func.func @transform_8(%arg0: i32, %arg1: i32) -> (i32, i32, i32) {
    %c0_i32 = arith.constant 0 : i32
    %c0_i32_0 = arith.constant 0 : i32
    %c0_i32_1 = arith.constant 0 : i32
    return %arg0, %c0_i32, %c0_i32_0 : i32, i32, i32
  }
}

module attributes {stable_mosaic.version = 11 : i64} {
  func.func @_dice_kernel(%arg0: i32, %arg1: memref<2x2x128xf32, #tpu.memory_space<vmem>>, %arg2: memref<2x2x128xf32, #tpu.memory_space<vmem>>, %arg3: memref<2x1x128xf32, #tpu.memory_space<vmem>>, %arg4: memref<2x1x128xf32, #tpu.memory_space<vmem>>, %arg5: memref<2x1x128xf32, #tpu.memory_space<vmem>>) attributes {dimension_semantics = [#tpu.dimension_semantics<arbitrary>], iteration_bounds = array<i64: 1>, scalar_prefetch = 0 : i64, scratch_operands = 0 : i64, tpu.core_type = #tpu.core_type<tc>, window_params = [{transform_indices = @transform_0, window_bounds = array<i64: 2, 2, 128>}, {transform_indices = @transform_1, window_bounds = array<i64: 2, 2, 128>}, {pipeline_mode = #tpu.pipeline_mode<synchronous>, transform_indices = @transform_2, window_bounds = array<i64: 2, 1, 128>}, {pipeline_mode = #tpu.pipeline_mode<synchronous>, transform_indices = @transform_3, window_bounds = array<i64: 2, 1, 128>}, {pipeline_mode = #tpu.pipeline_mode<synchronous>, transform_indices = @transform_4, window_bounds = array<i64: 2, 1, 128>}]} {
    %c0_i32 = arith.constant 0 : i32
    %0 = arith.cmpi eq, %arg0, %c0_i32 : i32
    %1 = arith.extui %0 : i1 to i32
    %c0_i32_0 = arith.constant 0 : i32
    %2 = arith.cmpi ne, %1, %c0_i32_0 : i32
    scf.if %2 {
      %cst_28 = arith.constant 0.000000e+00 : f32
      %30 = vector.broadcast %cst_28 : f32 to vector<2x1x128xf32>
      %c0_29 = arith.constant 0 : index
      %c0_30 = arith.constant 0 : index
      %c0_31 = arith.constant 0 : index
      %31 = vector.load %arg3[%c0_29, %c0_30, %c0_31] : memref<2x1x128xf32, #tpu.memory_space<vmem>>, vector<2x1x128xf32>
      tpu.vector_store %arg3[%c0_29, %c0_30, %c0_31], %30 {strides = array<i32>} : memref<2x1x128xf32, #tpu.memory_space<vmem>>, vector<2x1x128xf32>,
      %cst_32 = arith.constant 0.000000e+00 : f32
      %32 = vector.broadcast %cst_32 : f32 to vector<2x1x128xf32>
      %c0_33 = arith.constant 0 : index
      %c0_34 = arith.constant 0 : index
      %c0_35 = arith.constant 0 : index
      %33 = vector.load %arg4[%c0_33, %c0_34, %c0_35] : memref<2x1x128xf32, #tpu.memory_space<vmem>>, vector<2x1x128xf32>
      tpu.vector_store %arg4[%c0_33, %c0_34, %c0_35], %32 {strides = array<i32>} : memref<2x1x128xf32, #tpu.memory_space<vmem>>, vector<2x1x128xf32>,
      %cst_36 = arith.constant 0.000000e+00 : f32
      %34 = vector.broadcast %cst_36 : f32 to vector<2x1x128xf32>
      %c0_37 = arith.constant 0 : index
      %c0_38 = arith.constant 0 : index
      %c0_39 = arith.constant 0 : index
      %35 = vector.load %arg5[%c0_37, %c0_38, %c0_39] : memref<2x1x128xf32, #tpu.memory_space<vmem>>, vector<2x1x128xf32>
      tpu.vector_store %arg5[%c0_37, %c0_38, %c0_39], %34 {strides = array<i32>} : memref<2x1x128xf32, #tpu.memory_space<vmem>>, vector<2x1x128xf32>,
    } else {
    }
    %c0 = arith.constant 0 : index
    %c0_1 = arith.constant 0 : index
    %c0_2 = arith.constant 0 : index
    %3 = vector.load %arg1[%c0, %c0_1, %c0_2] : memref<2x2x128xf32, #tpu.memory_space<vmem>>, vector<2x2x128xf32>
    %4 = arith.negf %3 : vector<2x2x128xf32>
    %5 = math.exp %4 : vector<2x2x128xf32>
    %cst = arith.constant 1.000000e+00 : f32
    %6 = vector.broadcast %cst : f32 to vector<2x2x128xf32>
    %7 = arith.addf %6, %5 : vector<2x2x128xf32>
    %8 = arith.divf %6, %7 : vector<2x2x128xf32>
    %c0_3 = arith.constant 0 : index
    %c0_4 = arith.constant 0 : index
    %c0_5 = arith.constant 0 : index
    %9 = vector.load %arg2[%c0_3, %c0_4, %c0_5] : memref<2x2x128xf32, #tpu.memory_space<vmem>>, vector<2x2x128xf32>
    %cst_6 = arith.constant 1.000000e+00 : f32
    %10 = vector.broadcast %cst_6 : f32 to vector<2x2x128xf32>
    %11 = arith.subf %10, %9 : vector<2x2x128xf32>
    %c0_7 = arith.constant 0 : index
    %c0_8 = arith.constant 0 : index
    %c0_9 = arith.constant 0 : index
    %12 = vector.load %arg3[%c0_7, %c0_8, %c0_9] : memref<2x1x128xf32, #tpu.memory_space<vmem>>, vector<2x1x128xf32>
    %13 = arith.mulf %8, %11 : vector<2x2x128xf32>
    %cst_10 = arith.constant dense<0.000000e+00> : vector<2x128xf32>
    %14 = vector.multi_reduction <add>, %13, %cst_10 [1] : vector<2x2x128xf32> to vector<2x128xf32>
    %15 = vector.shape_cast %14 : vector<2x128xf32> to vector<2x1x128xf32>
    %16 = arith.addf %12, %15 : vector<2x1x128xf32>
    %c0_11 = arith.constant 0 : index
    %c0_12 = arith.constant 0 : index
    %c0_13 = arith.constant 0 : index
    %17 = vector.load %arg3[%c0_11, %c0_12, %c0_13] : memref<2x1x128xf32, #tpu.memory_space<vmem>>, vector<2x1x128xf32>
    tpu.vector_store %arg3[%c0_11, %c0_12, %c0_13], %16 {strides = array<i32>} : memref<2x1x128xf32, #tpu.memory_space<vmem>>, vector<2x1x128xf32>,
    %c0_14 = arith.constant 0 : index
    %c0_15 = arith.constant 0 : index
    %c0_16 = arith.constant 0 : index
    %18 = vector.load %arg4[%c0_14, %c0_15, %c0_16] : memref<2x1x128xf32, #tpu.memory_space<vmem>>, vector<2x1x128xf32>
    %19 = arith.mulf %8, %8 : vector<2x2x128xf32>
    %cst_17 = arith.constant dense<0.000000e+00> : vector<2x128xf32>
    %20 = vector.multi_reduction <add>, %19, %cst_17 [1] : vector<2x2x128xf32> to vector<2x128xf32>
    %21 = vector.shape_cast %20 : vector<2x128xf32> to vector<2x1x128xf32>
    %22 = arith.addf %18, %21 : vector<2x1x128xf32>
    %c0_18 = arith.constant 0 : index
    %c0_19 = arith.constant 0 : index
    %c0_20 = arith.constant 0 : index
    %23 = vector.load %arg4[%c0_18, %c0_19, %c0_20] : memref<2x1x128xf32, #tpu.memory_space<vmem>>, vector<2x1x128xf32>
    tpu.vector_store %arg4[%c0_18, %c0_19, %c0_20], %22 {strides = array<i32>} : memref<2x1x128xf32, #tpu.memory_space<vmem>>, vector<2x1x128xf32>,
    %c0_21 = arith.constant 0 : index
    %c0_22 = arith.constant 0 : index
    %c0_23 = arith.constant 0 : index
    %24 = vector.load %arg5[%c0_21, %c0_22, %c0_23] : memref<2x1x128xf32, #tpu.memory_space<vmem>>, vector<2x1x128xf32>
    %25 = arith.mulf %11, %11 : vector<2x2x128xf32>
    %cst_24 = arith.constant dense<0.000000e+00> : vector<2x128xf32>
    %26 = vector.multi_reduction <add>, %25, %cst_24 [1] : vector<2x2x128xf32> to vector<2x128xf32>
    %27 = vector.shape_cast %26 : vector<2x128xf32> to vector<2x1x128xf32>
    %28 = arith.addf %24, %27 : vector<2x1x128xf32>
    %c0_25 = arith.constant 0 : index
    %c0_26 = arith.constant 0 : index
    %c0_27 = arith.constant 0 : index
    %29 = vector.load %arg5[%c0_25, %c0_26, %c0_27] : memref<2x1x128xf32, #tpu.memory_space<vmem>>, vector<2x1x128xf32>
    tpu.vector_store %arg5[%c0_25, %c0_26, %c0_27], %28 {strides = array<i32>} : memref<2x1x128xf32, #tpu.memory_space<vmem>>, vector<2x1x128xf32>,
    return
  }
  func.func @transform_0(%arg0: i32) -> (i32, i32, i32) {
    %c0_i32 = arith.constant 0 : i32
    %c0_i32_0 = arith.constant 0 : i32
    %c0_i32_1 = arith.constant 0 : i32
    return %c0_i32, %arg0, %c0_i32_0 : i32, i32, i32
  }
  func.func @transform_1(%arg0: i32) -> (i32, i32, i32) {
    %c0_i32 = arith.constant 0 : i32
    %c0_i32_0 = arith.constant 0 : i32
    %c0_i32_1 = arith.constant 0 : i32
    return %c0_i32, %arg0, %c0_i32_0 : i32, i32, i32
  }
  func.func @transform_2(%arg0: i32) -> (i32, i32, i32) {
    %c0_i32 = arith.constant 0 : i32
    %c0_i32_0 = arith.constant 0 : i32
    %c0_i32_1 = arith.constant 0 : i32
    %c0_i32_2 = arith.constant 0 : i32
    return %c0_i32, %c0_i32_0, %c0_i32_1 : i32, i32, i32
  }
  func.func @transform_3(%arg0: i32) -> (i32, i32, i32) {
    %c0_i32 = arith.constant 0 : i32
    %c0_i32_0 = arith.constant 0 : i32
    %c0_i32_1 = arith.constant 0 : i32
    %c0_i32_2 = arith.constant 0 : i32
    return %c0_i32, %c0_i32_0, %c0_i32_1 : i32, i32, i32
  }
  func.func @transform_4(%arg0: i32) -> (i32, i32, i32) {
    %c0_i32 = arith.constant 0 : i32
    %c0_i32_0 = arith.constant 0 : i32
    %c0_i32_1 = arith.constant 0 : i32
    %c0_i32_2 = arith.constant 0 : i32
    return %c0_i32, %c0_i32_0, %c0_i32_1 : i32, i32, i32
  }
}

</mosaic_0001>

<bundles_post_ra>
// kernel: loss_with_gan_ste_forward.11
= control target key start
LH: loop header
LB: loop body
LE: loop exit
PB: predicated region body
PF: predicated region fallthrough
CT: control target
= control target key end

     0   :  { %v384_v0 = vmov 0.0   ;;  %vm194_vm0 = vcmask 1041408   ;;  %s619_s6 = inlined_call_operand.vmem [shape: f32[1,1,128], index: 6, kind: output, shape index: {1}]   ;;  %s620_s7 = inlined_call_operand.vmem [shape: f32[1,1,128], index: 7, kind: output, shape index: {2}]   ;;  %s621_s8 = inlined_call_operand.vmem [shape: f32[1,1,128], index: 8, kind: output, shape index: {3}]   ;;  %s622_s9 = inlined_call_operand.vmem [shape: f32[1,1,128], index: 9, kind: output, shape index: {4}]   ;;  %s623_s0 = inlined_call_operand.vmem [shape: f32[2,3,2,128], index: 0, kind: input, shape index: {}]   ;;  %s624_s1 = inlined_call_operand.vmem [shape: f32[2,3,2,128], index: 1, kind: input, shape index: {}]   ;;  %s625_s2 = inlined_call_operand.vmem [shape: f32[2,3,2,128], index: 2, kind: input, shape index: {}]   ;;  %s626_s3 = inlined_call_operand.vmem [shape: f32[2,3,2,128], index: 3, kind: input, shape index: {}]   ;;  %s627_s4 = inlined_call_operand.vmem [shape: f32[2,1,2,128], index: 4, kind: input, shape index: {}]   ;;  %s628_s5 = inlined_call_operand.vmem [shape: f32[2,3,2,128], index: 5, kind: output, shape index: {0}]  }
   0x1   :  { %125 = vst [vmem:[%s619_s6] sm:$0x1] %v384_v0  ;;  %126 = vst [vmem:[%s620_s7] sm:$0x1] %v384_v0  ;;  %v450_v1 = vld [vmem:[%s627_s4] sm:$0x3]  ;;  %v132_v10 = vld [vmem:[%s624_s1 + $0x2] sm:$0x3] }
   0x2   :  { %127 = vst [vmem:[%s621_s8] sm:$0x1] %v384_v0  ;;  %128 = vst [vmem:[%s622_s9] sm:$0x1] %v384_v0  ;;  %v131_v2 = vld [vmem:[%s624_s1] sm:$0x3]  ;;  %v155_v5 = vsub.f32 1.0, %v450_v1 }
   0x3   :  { %v137_v3 = vld [vmem:[%s626_s3] sm:$0x3]  ;;  %v138_v11 = vld [vmem:[%s626_s3 + $0x2] sm:$0x3]  ;;  %v133_v18 = vld [vmem:[%s624_s1 + $0x4] sm:$0x3] }
   0x4   :  { %v143_v4 = vld [vmem:[%s623_s0] sm:$0x3]  ;;  %v175_v6 = vsub.f32 %v131_v2, %v137_v3  ;;  %v144_v12 = vld [vmem:[%s623_s0 + $0x2] sm:$0x3]  ;;  %v157_v13 = vmul.f32 %v155_v5, %v131_v2  ;;  %v158_v16 = vmul.f32 %v155_v5, %v132_v10  ;;  %v176_v20 = vsub.f32 %v132_v10, %v138_v11  ;;  %v139_v22 = vld [vmem:[%s626_s3 + $0x4] sm:$0x3] }
   0x5   :  { %v242_v7 = vld [vmem:[%s625_s2] sm:$0x3]  ;;  %v149_v8 = vmul.f32 %v143_v4, %v450_v1  ;;  %v150_v15 = vmul.f32 %v144_v12, %v450_v1  ;;  %v243_v17 = vld [vmem:[%s625_s2 + $0x2] sm:$0x3]  ;;  %v145_v23 = vld [vmem:[%s623_s0 + $0x4] sm:$0x3]  ;;  %v159_v24 = vmul.f32 %v155_v5, %v133_v18  ;;  %v177_v33 = vsub.f32 %v133_v18, %v139_v22 }
   0x6   :  { %v248_v9 = vsub.f32 %v242_v7, %v137_v3  ;;  %v181_v14 = vand.u32 2147483647, %v175_v6  ;;  %v249_v21 = vsub.f32 %v243_v17, %v138_v11  ;;  %v151_v28 = vmul.f32 %v145_v23, %v450_v1  ;;  %v244_v29 = vld [vmem:[%s625_s2 + $0x4] sm:$0x3]  ;;  %v504_v38 = vld [vmem:[%s627_s4 + $0x2] sm:$0x3] }
   0x7   :  { %v163_v25 = vadd.f32 %v157_v13, %v149_v8  ;;  %v164_v27 = vadd.f32 %v158_v16, %v150_v15  ;;  %v182_v31 = vand.u32 2147483647, %v176_v20  ;;  %v250_v37 = vsub.f32 %v244_v29, %v139_v22  ;;  %v146_v39 = vld [vmem:[%s623_s0 + $0x6] sm:$0x3]  ;;  %v135_v4 = vld [vmem:[%s624_s1 + $0x8] sm:$0x3] }
   0x8   :  { %v254_v19 = vand.u32 2147483647, %v248_v9  ;;  %v187_v26 = vmul.f32 %v181_v14, %v450_v1  ;;  %v255_v32 = vand.u32 2147483647, %v249_v21  ;;  %v165_v36 = vadd.f32 %v159_v24, %v151_v28  ;;  %v134_v44 = vld [vmem:[%s624_s1 + $0x6] sm:$0x3] }
   0x9   :  { %169 = vst [vmem:[%s628_s5] sm:$0x3] %v163_v25  ;;  %170 = vst [vmem:[%s628_s5 + $0x2] sm:$0x3] %v164_v27  ;;  %v188_v42 = vmul.f32 %v182_v31, %v450_v1  ;;  %v140_v45 = vld [vmem:[%s626_s3 + $0x6] sm:$0x3]  ;;  %v152_v49 = vmul.f32 %v146_v39, %v504_v38  ;;  %v156_v60 = vsub.f32 1.0, %v504_v38 }
   0xa   :  { %v260_v30 = vmul.f32 %v254_v19, %v450_v1  ;;  %v195_v34 = vsel %vm194_vm0, %v187_v26, 0.0  ;;  %v216_v35 = vsub.f32 %v181_v14, %v187_v26  ;;  %v261_v43 = vmul.f32 %v255_v32, %v450_v1  ;;  %171 = vst [vmem:[%s628_s5 + $0x4] sm:$0x3] %v165_v36  ;;  %v245_v62 = vld [vmem:[%s625_s2 + $0x6] sm:$0x3] }
   0xb   :  { %v183_v47 = vand.u32 2147483647, %v177_v33  ;;  %v256_v48 = vand.u32 2147483647, %v250_v37  ;;  %v196_v51 = vsel %vm194_vm0, %v188_v42, 0.0  ;;  %v217_v52 = vsub.f32 %v182_v31, %v188_v42 }
   0xc   :  { %v267_v40 = vsel %vm194_vm0, %v260_v30, 0.0  ;;  %v288_v41 = vsub.f32 %v254_v19, %v260_v30  ;;  %v222_v46 = vsel %vm194_vm0, %v216_v35, 0.0  ;;  %v268_v53 = vsel %vm194_vm0, %v261_v43, 0.0  ;;  %v141_v9 = vld [vmem:[%s626_s3 + $0x8] sm:$0x3] }
   0xd   :  { %v197_v54 = vadd.f32 %v196_v51, %v195_v34  ;;  %v269_v55 = vadd.f32 %v268_v53, %v267_v40  ;;  %v289_v56 = vsub.f32 %v255_v32, %v261_v43  ;;  %v189_v57 = vmul.f32 %v183_v47, %v450_v1  ;;  %v246_v10 = vld [vmem:[%s625_s2 + $0x8] sm:$0x3]  ;;  %v148_v15 = vld [vmem:[%s623_s0 + $0xa] sm:$0x3] }
   0xe   :  { %v294_v50 = vsel %vm194_vm0, %v288_v41, 0.0  ;;  %v223_v58 = vsel %vm194_vm0, %v217_v52, 0.0  ;;  %v262_v59 = vmul.f32 %v256_v48, %v450_v1  ;;  %v178_v61 = vsub.f32 %v134_v44, %v140_v45  ;;  %v147_v1 = vld [vmem:[%s623_s0 + $0x8] sm:$0x3]  ;;  %v136_v24 = vld [vmem:[%s624_s1 + $0xa] sm:$0x3] }
   0xf   :  { %v224_v63 = vadd.f32 %v223_v58, %v222_v46  ;;  %v295_v0 = vsel %vm194_vm0, %v289_v56, 0.0  ;;  %v198_v2 = vsel %vm194_vm0, %v189_v57, 0.0  ;;  %v218_v3 = vsub.f32 %v183_v47, %v189_v57  ;;  %v142_v28 = vld [vmem:[%s626_s3 + $0xa] sm:$0x3] }
  0x10   :  { %v296_v5 = vadd.f32 %v295_v0, %v294_v50  ;;  %v199_v6 = vadd.f32 %v198_v2, %v197_v54  ;;  %v270_v7 = vsel %vm194_vm0, %v262_v59, 0.0  ;;  %v290_v8 = vsub.f32 %v256_v48, %v262_v59  ;;  %v247_v30 = vld [vmem:[%s625_s2 + $0xa] sm:$0x3] }
  0x11   :  { %v225_v11 = vsel %vm194_vm0, %v218_v3, 0.0  ;;  %v271_v12 = vadd.f32 %v270_v7, %v269_v55  ;;  %v160_v13 = vmul.f32 %v156_v60, %v134_v44  ;;  %v184_v14 = vand.u32 2147483647, %v178_v61 }
  0x12   :  { %v226_v16 = vadd.f32 %v225_v11, %v224_v63  ;;  %v297_v17 = vsel %vm194_vm0, %v290_v8, 0.0  ;;  %v251_v18 = vsub.f32 %v245_v62, %v140_v45  ;;  %v153_v19 = vmul.f32 %v147_v1, %v504_v38 }
  0x13   :  { %v298_v20 = vadd.f32 %v297_v17, %v296_v5  ;;  %v166_v21 = vadd.f32 %v160_v13, %v152_v49  ;;  %v190_v22 = vmul.f32 %v184_v14, %v504_v38  ;;  %v161_v23 = vmul.f32 %v156_v60, %v135_v4 }
  0x14   :  { %v257_v25 = vand.u32 2147483647, %v251_v18  ;;  %v179_v26 = vsub.f32 %v135_v4, %v141_v9  ;;  %v252_v27 = vsub.f32 %v246_v10, %v141_v9  ;;  %v154_v29 = vmul.f32 %v148_v15, %v504_v38 }
  0x15   :  { %172 = vst [vmem:[%s628_s5 + $0x6] sm:$0x3] %v166_v21  ;;  %v200_v31 = vsel %vm194_vm0, %v190_v22, 0.0  ;;  %v219_v32 = vsub.f32 %v184_v14, %v190_v22  ;;  %v167_v33 = vadd.f32 %v161_v23, %v153_v19  ;;  %v162_v34 = vmul.f32 %v156_v60, %v136_v24 }
  0x16   :  { %v201_v35 = vadd.f32 %v200_v31, %v199_v6  ;;  %v263_v36 = vmul.f32 %v257_v25, %v504_v38  ;;  %v185_v37 = vand.u32 2147483647, %v179_v26  ;;  %v258_v39 = vand.u32 2147483647, %v252_v27 }
  0x17   :  { %v227_v40 = vsel %vm194_vm0, %v219_v32, 0.0  ;;  %173 = vst [vmem:[%s628_s5 + $0x8] sm:$0x3] %v167_v33  ;;  %v168_v41 = vadd.f32 %v162_v34, %v154_v29  ;;  %v180_v42 = vsub.f32 %v136_v24, %v142_v28  ;;  %v253_v43 = vsub.f32 %v247_v30, %v142_v28  ;;  %v193_v32 = vld [vmem:[%s620_s7] sm:$0x1] }
  0x18   :  { %v228_v44 = vadd.f32 %v227_v40, %v226_v16  ;;  %v272_v45 = vsel %vm194_vm0, %v263_v36, 0.0  ;;  %v291_v46 = vsub.f32 %v257_v25, %v263_v36  ;;  %v191_v47 = vmul.f32 %v185_v37, %v504_v38  ;;  %v266_v33 = vld [vmem:[%s622_s9] sm:$0x1] }
  0x19   :  { %v273_v48 = vadd.f32 %v272_v45, %v271_v12  ;;  %v264_v49 = vmul.f32 %v258_v39, %v504_v38  ;;  %174 = vst [vmem:[%s628_s5 + $0xa] sm:$0x3] %v168_v41  ;;  %v186_v50 = vand.u32 2147483647, %v180_v42  ;;  %v259_v51 = vand.u32 2147483647, %v253_v43 }
  0x1a   :  { %v299_v52 = vsel %vm194_vm0, %v291_v46, 0.0  ;;  %v202_v53 = vsel %vm194_vm0, %v191_v47, 0.0  ;;  %v220_v54 = vsub.f32 %v185_v37, %v191_v47 }
  0x1b   :  { %v300_v55 = vadd.f32 %v299_v52, %v298_v20  ;;  %v203_v56 = vadd.f32 %v202_v53, %v201_v35  ;;  %v274_v57 = vsel %vm194_vm0, %v264_v49, 0.0  ;;  %v292_v58 = vsub.f32 %v258_v39, %v264_v49  ;;  %v215_v39 = vld [vmem:[%s619_s6] sm:$0x1] }
  0x1c   :  { %v229_v59 = vsel %vm194_vm0, %v220_v54, 0.0  ;;  %v275_v60 = vadd.f32 %v274_v57, %v273_v48  ;;  %v192_v61 = vmul.f32 %v186_v50, %v504_v38  ;;  %v265_v62 = vmul.f32 %v259_v51, %v504_v38 }
  0x1d   :  { %v230_v63 = vadd.f32 %v229_v59, %v228_v44  ;;  %v301_v0 = vsel %vm194_vm0, %v292_v58, 0.0  ;;  %v287_v44 = vld [vmem:[%s621_s8] sm:$0x1] }
  0x1e   :  { %v302_v2 = vadd.f32 %v301_v0, %v300_v55  ;;  %v204_v3 = vsel %vm194_vm0, %v192_v61, 0.0  ;;  %v221_v4 = vsub.f32 %v186_v50, %v192_v61  ;;  %v276_v1 = vsel %vm194_vm0, %v265_v62, 0.0 }
  0x1f   :  { %v205_v5 = vadd.f32 %v204_v3, %v203_v56  ;;  %v277_v6 = vadd.f32 %v276_v1, %v275_v60  ;;  %v293_v7 = vsub.f32 %v259_v51, %v265_v62 }
  0x20   :  { %v231_v8 = vsel %vm194_vm0, %v221_v4, 0.0 }
  0x21   :  { %v232_v9 = vadd.f32 %v231_v8, %v230_v63  ;;  %v303_v10 = vsel %vm194_vm0, %v293_v7, 0.0  ;;  %v206_v11 = vsel %vm194_vm0, %v205_v5, 0.0  ;;  %v278_v38 = vsel %vm194_vm0, %v277_v6, 0.0 }
  0x22   :  { %v304_v12 = vadd.f32 %v303_v10, %v302_v2  ;;  %v207_v13 = vrot.slane %v206_v11, 4  ;;  %v279_v14 = vrot.slane %v278_v38, 4 }
  0x23   :  { %v233_v15 = vsel %vm194_vm0, %v232_v9, 0.0 }
  0x24   :  { %v208_v16 = vadd.f32 %v207_v13, %v206_v11  ;;  %v234_v17 = vrot.slane %v233_v15, 4  ;;  %v280_v18 = vadd.f32 %v279_v14, %v278_v38  ;;  %v305_v19 = vsel %vm194_vm0, %v304_v12, 0.0 }
  0x25   :  { %v306_v20 = vrot.slane %v305_v19, 4 }
  0x26   :  { %v209_v21 = vrot.slane %v208_v16, 2  ;;  %v235_v22 = vadd.f32 %v234_v17, %v233_v15  ;;  %v281_v23 = vrot.slane %v280_v18, 2 }
  0x27   :  { %v307_v24 = vadd.f32 %v306_v20, %v305_v19 }
  0x28   :  { %v210_v25 = vadd.f32 %v209_v21, %v208_v16  ;;  %v236_v26 = vrot.slane %v235_v22, 2  ;;  %v282_v27 = vadd.f32 %v281_v23, %v280_v18 }
  0x29   :  { %v308_v28 = vrot.slane %v307_v24, 2 }
  0x2a   :  { %v211_v29 = vrot.slane %v210_v25, 1  ;;  %v237_v30 = vadd.f32 %v236_v26, %v235_v22  ;;  %v283_v31 = vrot.slane %v282_v27, 1 }
  0x2b   :  { %v309_v34 = vadd.f32 %v308_v28, %v307_v24 }
  0x2c   :  { %v212_v35 = vadd.f32 %v211_v29, %v210_v25  ;;  %v238_v36 = vrot.slane %v237_v30, 1  ;;  %v284_v37 = vadd.f32 %v283_v31, %v282_v27 }
  0x2d   :  { %v310_v40 = vrot.slane %v309_v34, 1 }
  0x2e   :  { %v213_v41 = vadd.f32 %v212_v35, %v193_v32  ;;  %v239_v42 = vadd.f32 %v238_v36, %v237_v30  ;;  %v285_v43 = vadd.f32 %v284_v37, %v266_v33 }
  0x2f   :  { %v311_v45 = vadd.f32 %v310_v40, %v309_v34 }
  0x30   :  { %214 = vst [vmem:[%s620_s7] sm:$0x1] %v213_v41  ;;  %v240_v46 = vadd.f32 %v239_v42, %v215_v39  ;;  %286 = vst [vmem:[%s622_s9] sm:$0x1] %v285_v43 }
  0x31   :  { %v312_v47 = vadd.f32 %v311_v45, %v287_v44 }
  0x32   :  { %241 = vst [vmem:[%s619_s6] sm:$0x1] %v240_v46 }
  0x33   :  { %313 = vst [vmem:[%s621_s8] sm:$0x1] %v312_v47 }

// kernel: loss_with_gan_ste_forward.13
= control target key start
LH: loop header
LB: loop body
LE: loop exit
PB: predicated region body
PF: predicated region fallthrough
CT: control target
= control target key end

     0   :  { %v151_v0 = vmov 0.0   ;;  %vm97_vm0 = vcmask 1040384   ;;  %s249_s3 = inlined_call_operand.vmem [shape: f32[1,1,128], index: 3, kind: output, shape index: {0}]   ;;  %s250_s4 = inlined_call_operand.vmem [shape: f32[1,1,128], index: 4, kind: output, shape index: {1}]   ;;  %s251_s0 = inlined_call_operand.vmem [shape: f32[2,3,1,128], index: 0, kind: input, shape index: {}]   ;;  %s252_s1 = inlined_call_operand.vmem [shape: f32[2,3,1,128], index: 1, kind: input, shape index: {}]   ;;  %s253_s2 = inlined_call_operand.vmem [shape: f32[2,1,1,128], index: 2, kind: input, shape index: {}]  }
   0x1   :  { %62 = vst [vmem:[%s249_s3] sm:$0x1] %v151_v0  ;;  %63 = vst [vmem:[%s250_s4] sm:$0x1] %v151_v0  ;;  %v64_v1 = vld [vmem:[%s251_s0] sm:$0x1]  ;;  %v65_v2 = vld [vmem:[%s251_s0 + $0x1] sm:$0x1] }
   0x2   :  { %v66_v3 = vld [vmem:[%s251_s0 + $0x2] sm:$0x1]  ;;  %v67_v4 = vld [vmem:[%s251_s0 + $0x3] sm:$0x1]  ;;  %v68_v5 = vld [vmem:[%s251_s0 + $0x4] sm:$0x1] }
   0x3   :  { %v69_v6 = vld [vmem:[%s251_s0 + $0x5] sm:$0x1]  ;;  %v70_v7 = vld [vmem:[%s252_s1] sm:$0x1]  ;;  %v71_v8 = vld [vmem:[%s252_s1 + $0x1] sm:$0x1] }
   0x4   :  { %v72_v9 = vld [vmem:[%s252_s1 + $0x2] sm:$0x1]  ;;  %v73_v10 = vld [vmem:[%s252_s1 + $0x3] sm:$0x1]  ;;  %v74_v11 = vld [vmem:[%s252_s1 + $0x4] sm:$0x1]  ;;  %v76_v13 = vsub.f32 %v64_v1, %v70_v7  ;;  %v77_v14 = vsub.f32 %v65_v2, %v71_v8 }
   0x5   :  { %v75_v12 = vld [vmem:[%s252_s1 + $0x5] sm:$0x1]  ;;  %v78_v15 = vsub.f32 %v66_v3, %v72_v9  ;;  %v79_v16 = vsub.f32 %v67_v4, %v73_v10  ;;  %v80_v17 = vsub.f32 %v68_v5, %v74_v11  ;;  %v88_v19 = vld [vmem:[%s253_s2] sm:$0x1]  ;;  %v89_v20 = vld [vmem:[%s253_s2 + $0x1] sm:$0x1] }
   0x6   :  { %v81_v18 = vsub.f32 %v69_v6, %v75_v12  ;;  %v82_v21 = vand.u32 2147483647, %v76_v13  ;;  %v83_v22 = vand.u32 2147483647, %v77_v14 }
   0x7   :  { %v84_v23 = vand.u32 2147483647, %v78_v15  ;;  %v85_v24 = vand.u32 2147483647, %v79_v16  ;;  %v86_v25 = vand.u32 2147483647, %v80_v17 }
   0x8   :  { %v87_v26 = vand.u32 2147483647, %v81_v18  ;;  %v90_v27 = vmul.f32 %v88_v19, %v82_v21  ;;  %v91_v28 = vmul.f32 %v88_v19, %v83_v22  ;;  %v96_v55 = vld [vmem:[%s249_s3] sm:$0x1] }
   0x9   :  { %v92_v29 = vmul.f32 %v88_v19, %v84_v23  ;;  %v93_v30 = vmul.f32 %v89_v20, %v85_v24  ;;  %v94_v31 = vmul.f32 %v89_v20, %v86_v25  ;;  %v112_v62 = vld [vmem:[%s250_s4] sm:$0x1] }
   0xa   :  { %v98_v32 = vsel %vm97_vm0, %v90_v27, 0.0  ;;  %v99_v33 = vsel %vm97_vm0, %v91_v28, 0.0  ;;  %v113_v35 = vsub.f32 %v82_v21, %v90_v27  ;;  %v95_v36 = vmul.f32 %v89_v20, %v87_v26 }
   0xb   :  { %v101_v34 = vsel %vm97_vm0, %v92_v29, 0.0  ;;  %v100_v37 = vadd.f32 %v99_v33, %v98_v32  ;;  %v103_v38 = vsel %vm97_vm0, %v93_v30, 0.0  ;;  %v114_v39 = vsub.f32 %v83_v22, %v91_v28 }
   0xc   :  { %v115_v40 = vsub.f32 %v84_v23, %v92_v29  ;;  %v116_v41 = vsub.f32 %v85_v24, %v93_v30  ;;  %v119_v43 = vsel %vm97_vm0, %v113_v35, 0.0  ;;  %v105_v44 = vsel %vm97_vm0, %v94_v31, 0.0 }
   0xd   :  { %v102_v42 = vadd.f32 %v101_v34, %v100_v37  ;;  %v117_v45 = vsub.f32 %v86_v25, %v94_v31  ;;  %v120_v46 = vsel %vm97_vm0, %v114_v39, 0.0  ;;  %v107_v50 = vsel %vm97_vm0, %v95_v36, 0.0 }
   0xe   :  { %v122_v47 = vsel %vm97_vm0, %v115_v40, 0.0  ;;  %v121_v49 = vadd.f32 %v120_v46, %v119_v43  ;;  %v118_v51 = vsub.f32 %v87_v26, %v95_v36  ;;  %v124_v52 = vsel %vm97_vm0, %v116_v41, 0.0 }
   0xf   :  { %v104_v48 = vadd.f32 %v103_v38, %v102_v42  ;;  %v126_v56 = vsel %vm97_vm0, %v117_v45, 0.0 }
  0x10   :  { %v123_v54 = vadd.f32 %v122_v47, %v121_v49  ;;  %v128_v59 = vsel %vm97_vm0, %v118_v51, 0.0 }
  0x11   :  { %v106_v53 = vadd.f32 %v105_v44, %v104_v48 }
  0x12   :  { %v125_v58 = vadd.f32 %v124_v52, %v123_v54 }
  0x13   :  { %v108_v57 = vadd.f32 %v107_v50, %v106_v53 }
  0x14   :  { %v127_v61 = vadd.f32 %v126_v56, %v125_v58 }
  0x15   :  { %v110_v60 = vadd.f32 %v108_v57, %v96_v55 }
  0x16   :  { %v129_v63 = vadd.f32 %v128_v59, %v127_v61 }
  0x17   :  { %111 = vst [vmem:[%s249_s3] sm:$0x1] %v110_v60 }
  0x18   :  { %v131_v0 = vadd.f32 %v129_v63, %v112_v62 }
  0x1a   :  { %132 = vst [vmem:[%s250_s4] sm:$0x1] %v131_v0 }

// kernel: loss_with_gan_ste_forward.16
= control target key start
LH: loop header
LB: loop body
LE: loop exit
PB: predicated region body
PF: predicated region fallthrough
CT: control target
= control target key end

     0   :  { %v204_v0 = vmov 0.0   ;;  %vm51_vm0 = vcmask 523264   ;;  %s378_s1 = inlined_call_operand.vmem [shape: f32[192,128], index: 1, kind: input, shape index: {}]   ;;  %s379_s0 = inlined_call_operand.vmem [shape: f32[24,192], index: 0, kind: input, shape index: {}]   ;;  %s380_s2 = inlined_call_operand.vmem [shape: f32[1,128], index: 2, kind: input, shape index: {}]   ;;  %s381_s3 = inlined_call_operand.vmem [shape: f32[24,128], index: 3, kind: output, shape index: {}]  }
   0x1   :  { %155 = vmatprep.subr.mxu1 %v204_v0  ;;  %v35_v1 = vld [vmem:[%s378_s1 + $0x78] sm:$0xff]  ;;  %61 = vmatprep.subr.mxu0 %v204_v0  ;;  %v34_v2 = vld [vmem:[%s378_s1 + $0x70] sm:$0xff]  ;;  %v33_v3 = vld [vmem:[%s378_s1 + $0x68] sm:$0xff] }
   0x2   :  { %179 = vmatpush1.msra.mxu1 %v35_v1  ;;  %62 = vmatpush1.msra.mxu0 %v35_v1  ;;  %v32_v4 = vld [vmem:[%s378_s1 + $0x60] sm:$0xff]  ;;  %v31_v5 = vld [vmem:[%s378_s1 + $0x58] sm:$0xff]  ;;  %v30_v6 = vld [vmem:[%s378_s1 + $0x50] sm:$0xff] }
   0x3   :  { %156 = vmatprep.subr.mxu1 %v204_v0  ;;  %63 = vmatprep.subr.mxu0 %v204_v0  ;;  %v29_v7 = vld [vmem:[%s378_s1 + $0x48] sm:$0xff]  ;;  %v28_v8 = vld [vmem:[%s378_s1 + $0x40] sm:$0xff]  ;;  %v27_v9 = vld [vmem:[%s378_s1 + $0x38] sm:$0xff] }
   0x4   :  { %180 = vmatpush1.msra.mxu1 %v34_v2  ;;  %64 = vmatpush1.msra.mxu0 %v34_v2  ;;  %v26_v10 = vld [vmem:[%s378_s1 + $0x30] sm:$0xff]  ;;  %v25_v11 = vld [vmem:[%s378_s1 + $0x28] sm:$0xff]  ;;  %v24_v12 = vld [vmem:[%s378_s1 + $0x20] sm:$0xff] }
   0x5   :  { %157 = vmatprep.subr.mxu1 %v204_v0  ;;  %65 = vmatprep.subr.mxu0 %v204_v0  ;;  %v23_v13 = vld [vmem:[%s378_s1 + $0x18] sm:$0xff]  ;;  %v22_v14 = vld [vmem:[%s378_s1 + $0x10] sm:$0xff]  ;;  %v21_v15 = vld [vmem:[%s378_s1 + $0x8] sm:$0xff] }
   0x6   :  { %181 = vmatpush1.msra.mxu1 %v33_v3  ;;  %66 = vmatpush1.msra.mxu0 %v33_v3  ;;  %v20_v16 = vld [vmem:[%s378_s1] sm:$0xff]  ;;  %v43_v17 = vld [vmem:[%s378_s1 + $0xb8] sm:$0xff]  ;;  %v42_v18 = vld [vmem:[%s378_s1 + $0xb0] sm:$0xff] }
   0x7   :  { %158 = vmatprep.subr.mxu1 %v204_v0  ;;  %67 = vmatprep.subr.mxu0 %v204_v0  ;;  %v41_v19 = vld [vmem:[%s378_s1 + $0xa8] sm:$0xff]  ;;  %v40_v20 = vld [vmem:[%s378_s1 + $0xa0] sm:$0xff]  ;;  %v39_v21 = vld [vmem:[%s378_s1 + $0x98] sm:$0xff] }
   0x8   :  { %182 = vmatpush1.msra.mxu1 %v32_v4  ;;  %68 = vmatpush1.msra.mxu0 %v32_v4  ;;  %v38_v22 = vld [vmem:[%s378_s1 + $0x90] sm:$0xff]  ;;  %v37_v23 = vld [vmem:[%s378_s1 + $0x88] sm:$0xff]  ;;  %v17_v24 = vld [vmem:[%s379_s0 + $0x18] sm:$0xff] }
   0x9   :  { %159 = vmatprep.subr.mxu1 %v204_v0  ;;  %69 = vmatprep.subr.mxu0 %v204_v0  ;;  %v36_v25 = vld [vmem:[%s378_s1 + $0x80] sm:$0xff]  ;;  %v16_v26 = vld [vmem:[%s379_s0 + $0x10] sm:$0xff]  ;;  %v15_v27 = vld [vmem:[%s379_s0 + $0x8] sm:$0xff] }
   0xa   :  { %183 = vmatpush1.msra.mxu1 %v31_v5  ;;  %70 = vmatpush1.msra.mxu0 %v31_v5  ;;  %v19_v28 = vld [vmem:[%s379_s0 + $0x28] sm:$0xff]  ;;  %v14_v29 = vld [vmem:[%s379_s0] sm:$0xff] }
   0xb   :  { %160 = vmatprep.subr.mxu1 %v204_v0  ;;  %71 = vmatprep.subr.mxu0 %v204_v0  ;;  %v18_v30 = vld [vmem:[%s379_s0 + $0x20] sm:$0xff] }
   0xc   :  { %184 = vmatpush1.msra.mxu1 %v30_v6  ;;  %72 = vmatpush1.msra.mxu0 %v30_v6  ;;  %v151_v31 = vld [vmem:[%s380_s2] ss:$0 sm:$0xff] }
   0xd   :  { %161 = vmatprep.subr.mxu1 %v204_v0  ;;  %73 = vmatprep.subr.mxu0 %v204_v0 }
   0xe   :  { %185 = vmatpush1.msra.mxu1 %v29_v7  ;;  %74 = vmatpush1.msra.mxu0 %v29_v7 }
   0xf   :  { %162 = vmatprep.subr.mxu1 %v204_v0  ;;  %75 = vmatprep.subr.mxu0 %v204_v0 }
  0x10   :  { %186 = vmatpush1.msra.mxu1 %v28_v8  ;;  %76 = vmatpush1.msra.mxu0 %v28_v8 }
  0x11   :  { %163 = vmatprep.subr.mxu1 %v204_v0  ;;  %77 = vmatprep.subr.mxu0 %v204_v0 }
  0x12   :  { %187 = vmatpush1.msra.mxu1 %v27_v9  ;;  %78 = vmatpush1.msra.mxu0 %v27_v9 }
  0x13   :  { %164 = vmatprep.subr.mxu1 %v204_v0  ;;  %79 = vmatprep.subr.mxu0 %v204_v0 }
  0x14   :  { %188 = vmatpush1.msra.mxu1 %v26_v10  ;;  %80 = vmatpush1.msra.mxu0 %v26_v10 }
  0x15   :  { %165 = vmatprep.subr.mxu1 %v204_v0  ;;  %81 = vmatprep.subr.mxu0 %v204_v0 }
  0x16   :  { %189 = vmatpush1.msra.mxu1 %v25_v11  ;;  %82 = vmatpush1.msra.mxu0 %v25_v11 }
  0x17   :  { %166 = vmatprep.subr.mxu1 %v204_v0  ;;  %83 = vmatprep.subr.mxu0 %v204_v0 }
  0x18   :  { %190 = vmatpush1.msra.mxu1 %v24_v12  ;;  %84 = vmatpush1.msra.mxu0 %v24_v12 }
  0x19   :  { %167 = vmatprep.subr.mxu1 %v204_v0  ;;  %85 = vmatprep.subr.mxu0 %v204_v0 }
  0x1a   :  { %191 = vmatpush1.msra.mxu1 %v23_v13  ;;  %86 = vmatpush1.msra.mxu0 %v23_v13 }
  0x1b   :  { %168 = vmatprep.subr.mxu1 %v204_v0  ;;  %87 = vmatprep.subr.mxu0 %v204_v0 }
  0x1c   :  { %192 = vmatpush1.msra.mxu1 %v22_v14  ;;  %88 = vmatpush1.msra.mxu0 %v22_v14 }
  0x1d   :  { %169 = vmatprep.subr.mxu1 %v204_v0  ;;  %89 = vmatprep.subr.mxu0 %v204_v0 }
  0x1e   :  { %193 = vmatpush1.msra.mxu1 %v21_v15  ;;  %90 = vmatpush1.msra.mxu0 %v21_v15 }
  0x1f   :  { %170 = vmatprep.subr.mxu1 %v204_v0  ;;  %91 = vmatprep.subr.mxu0 %v204_v0 }
  0x20   :  { %194 = vmatpush1.msra.mxu1 %v20_v16  ;;  %92 = vmatpush1.msra.mxu0 %v20_v16 }
  0x21   :  { %171 = vmatprep.subr.mxu1 %v204_v0  ;;  %109 = vmatprep.subr.mxu0 %v204_v0 }
  0x22   :  { %195 = vmatpush2.msra.mxu1 %v43_v17  ;;  %110 = vmatpush2.msra.mxu0 %v43_v17 }
  0x23   :  { %172 = vmatprep.subr.mxu1 %v204_v0  ;;  %111 = vmatprep.subr.mxu0 %v204_v0 }
  0x24   :  { %196 = vmatpush2.msra.mxu1 %v42_v18  ;;  %112 = vmatpush2.msra.mxu0 %v42_v18 }
  0x25   :  { %173 = vmatprep.subr.mxu1 %v204_v0  ;;  %113 = vmatprep.subr.mxu0 %v204_v0 }
  0x26   :  { %197 = vmatpush2.msra.mxu1 %v41_v19  ;;  %114 = vmatpush2.msra.mxu0 %v41_v19 }
  0x27   :  { %174 = vmatprep.subr.mxu1 %v204_v0  ;;  %115 = vmatprep.subr.mxu0 %v204_v0 }
  0x28   :  { %198 = vmatpush2.msra.mxu1 %v40_v20  ;;  %116 = vmatpush2.msra.mxu0 %v40_v20 }
  0x29   :  { %175 = vmatprep.subr.mxu1 %v204_v0  ;;  %117 = vmatprep.subr.mxu0 %v204_v0 }
  0x2a   :  { %199 = vmatpush2.msra.mxu1 %v39_v21  ;;  %118 = vmatpush2.msra.mxu0 %v39_v21 }
  0x2b   :  { %176 = vmatprep.subr.mxu1 %v204_v0  ;;  %119 = vmatprep.subr.mxu0 %v204_v0 }
  0x2c   :  { %200 = vmatpush2.msra.mxu1 %v38_v22  ;;  %120 = vmatpush2.msra.mxu0 %v38_v22 }
  0x2d   :  { %177 = vmatprep.subr.mxu1 %v204_v0  ;;  %121 = vmatprep.subr.mxu0 %v204_v0 }
  0x2e   :  { %201 = vmatpush2.msra.mxu1 %v37_v23  ;;  %122 = vmatpush2.msra.mxu0 %v37_v23 }
  0x2f   :  { %178 = vmatprep.subr.mxu1 %v204_v0  ;;  %153 = vmatprep.mubr.msk.f32.mxu1 %vm51_vm0, %v17_v24 }
  0x30   :  { %202 = vmatpush2.msra.mxu1 %v36_v25  ;;  %123 = vmatprep.subr.mxu0 %v204_v0 }
  0x31   :  { %131 = vmatmul.mubr.f32.vlgmr.msra.gmra.mxu1 %v16_v26  ;;  %124 = vmatpush2.msra.mxu0 %v36_v25 }
  0x32   :  { %152 = vmatprep.mubr.msk.f32.mxu0 %vm51_vm0, %v15_v27  ;;  %154 = vmatprep.mubr.msk.f32.mxu1 %vm51_vm0, %v19_v28 }
  0x33   :  { %126 = vmatmul.mubr.f32.vlgmr.msra.gmra.mxu0 %v14_v29 }
  0x35   :  { %136 = vmatmul.mubr.f32.gmra.mxu1 %v18_v30 }
  0xf1   :  { %v132_v32 = vpop.f32.mrf.mxu1 }
  0xf2   :  { %v133_v33 = vadd.f32 %v151_v31, %v132_v32 }
  0xf3   :  { %v127_v34 = vpop.f32.mrf.mxu0  ;;  %v134_v35 = vpop.f32.mrf.mxu1 }
  0xf4   :  { %v142_v36 = vmax.f32 %v133_v33, 0.0  ;;  %v128_v37 = vadd.f32 %v151_v31, %v127_v34 }
  0xf5   :  { %v129_v38 = vpop.f32.mrf.mxu0  ;;  %v137_v39 = vpop.f32.mrf.mxu1 }
  0xf6   :  { %145 = vst [vmem:[%s381_s3 + $0x8] sm:$0xff] %v142_v36  ;;  %v141_v40 = vmax.f32 %v128_v37, 0.0  ;;  %v138_v41 = vadd.f32 %v151_v31, %v137_v39 }
  0xf7   :  { %v139_v42 = vpop.f32.mrf.mxu1 }
  0xf8   :  { %144 = vst [vmem:[%s381_s3] sm:$0xff] %v141_v40  ;;  %v143_v43 = vmax.f32 %v138_v41, 0.0 }
  0xfa   :  { %146 = vst [vmem:[%s381_s3 + $0x10] sm:$0xff] %v143_v43 }

// kernel: loss_with_gan_ste_forward.19
= control target key start
LH: loop header
LB: loop body
LE: loop exit
PB: predicated region body
PF: predicated region fallthrough
CT: control target
= control target key end

     0   :  { %s1261_s21 = smov 0   ;;  %s1263_s22 = smov 0   ;;  %s1522_s0 = inlined_call_operand.vmem [shape: f32[3,2,64,8], index: 0, kind: input, shape index: {}, may-alias: {0,1,2}]   ;;  %s1523_s1 = inlined_call_operand.vmem [shape: f32[3,2,64,8], index: 1, kind: input, shape index: {}, may-alias: {0,1,2}]   ;;  %s1524_s2 = inlined_call_operand.vmem [shape: f32[3,2,64,8], index: 2, kind: input, shape index: {}, may-alias: {0,1,2}]   ;;  %s1525_s3 = inlined_call_operand.vmem [shape: f32[2,1,1], index: 3, kind: output, shape index: {0}]   ;;  %s1526_s4 = inlined_call_operand.vmem [shape: f32[2,1,1], index: 4, kind: output, shape index: {1}]   ;;  %s1527_s5 = inlined_call_operand.vmem [shape: f32[2,1,1], index: 5, kind: output, shape index: {2}]   ;;  %s1528_s6 = inlined_call_operand.vmem [shape: f32[2,1,1], index: 6, kind: output, shape index: {3}]  }
   0x1   :  { %s1265_s23 = smov 0  }
   0x2 LB: > { %s29_s24 = sadd.s32 1, %s1218_s22  ;;  %p1051_p0 = scmp.ge.s32.totalorder %s1222_s23, 1  ;;  %s1222_s23 = sphi %s1265_s23, %s17_s23   ;;  %s1218_s22 = sphi %s1263_s22, %s1530_s22   ;;  %s1214_s21 = sphi %s1261_s21, %s1529_s21  }
   0x3   : > { %p31_p1 = scmp.ge.s32.totalorder %s29_s24, 2  ;;  %p274_p2 = scmp.lt.s32.totalorder %s1222_s23, 3 }
   0x5   : > { %s1532_s24 = smov (%p31_p1, %s29_s24), 0  ;;  %p275_p3 = pnand %p1051_p0, %p274_p2 }
   0x6   : > { %p336_p4 = scmp.lt.s32.totalorder (!%p275_p3), %s1214_s21, 1 }
   0x7   : > { %278 = sbr.rel (%p275_p3) target bundleno = 589 (0x24d), region = 32 }
   0xc   : > { %vm388_vm0 = vcmask 64512   ;;  %v1224_v0 = vmov 0.0   ;;  %vm1225_vm1 = vmmov 0   ;;  %s1534_s21 = smov (!%p336_p4, %s1214_s21), 1  ;;  %vm539_vm2 = vcmask 523264  }
   0xd   : > { %1109 = vmatprep.subr.mxu0 %v1224_v0  ;;  %389 = vst.msk [vmem:[#allocation2] sm:$0xff] %vm388_vm0, %v1224_v0  ;;  %390 = vst.msk [vmem:[#allocation3] sm:$0xff] %vm388_vm0, %v1224_v0  ;;  %1125 = vmatprep.mubr.msk.f32.mxu0 %vm1225_vm1, %v1224_v0  ;;  %s1079_s25 = sshll.u32 %s1534_s21, 6  ;;  %s369_s13 = scalar_lea.vmem %s1525_s3, %s1534_s21  ;;  %vm383_vm3 = vcmask 0  }
   0xe   : > { %391 = vst.msk [vmem:[#allocation4] sm:$0xff] %vm388_vm0, %v1224_v0  ;;  %1128 = vmatprep.subr.mxu1 %v1224_v0  ;;  %1144 = vmatprep.mubr.msk.f32.mxu1 %vm1225_vm1, %v1224_v0  ;;  %s1297_s28 = scalar_lea.vmem %s1522_s0, %s1079_s25  ;;  %s1302_s7 = scalar_lea.vmem %s1523_s1, %s1079_s25 }
   0xf   : > { %v1305_v1 = vld [vmem:[%s1297_s28] sm:$0xff]  ;;  %s1310_s10 = scalar_lea.vmem %s1524_s2, %s1079_s25  ;;  %v393_v2 = vld [vmem:[%s1297_s28 + $0x8] sm:$0xff]  ;;  %v394_v3 = vld [vmem:[%s1297_s28 + $0x10] sm:$0xff]  ;;  %s372_s16 = scalar_lea.vmem %s1526_s4, %s1534_s21  ;;  %384 = vst.msk [vmem:[%s369_s13] sm:$0x1] %vm383_vm3, %v1224_v0 }
  0x10   : > { %507 = vxpose.xlu0.b32.start [1/8] (short) (narrow) %v1305_v1, 8  ;;  %v1316_v4 = vld [vmem:[%s1297_s28 + $0x38] sm:$0xff]  ;;  %v1319_v5 = vld [vmem:[%s1302_s7 + $0x80] sm:$0xff]  ;;  %v1326_v7 = vld [vmem:[%s1302_s7 + $0x88] sm:$0xff]  ;;  %385 = vst.msk [vmem:[%s372_s16] sm:$0x1] %vm383_vm3, %v1224_v0  ;;  %s1491_s19 = scalar_lea.vmem %s1527_s5, %s1534_s21  ;;  %s1501_s27 = scalar_lea.vmem %s1528_s6, %s1534_s21 }
  0x11   : > { %616 = vxpose.xlu1.b32.start [1/8] (short) (narrow) %v1319_v5, 8  ;;  %v1323_v6 = vld [vmem:[%s1310_s10 + $0x100] sm:$0xff]  ;;  %v1329_v8 = vld [vmem:[%s1310_s10 + $0x108] sm:$0xff]  ;;  %1110 = vmatpush3.msra.mxu0 %v1316_v4  ;;  %v1333_v9 = vld [vmem:[%s1297_s28 + $0x30] sm:$0xff]  ;;  %386 = vst.msk [vmem:[%s1491_s19] sm:$0x1] %vm383_vm3, %v1224_v0 }
  0x12   : > { %v417_v10 = vsub.f32 %v1319_v5, %v1323_v6  ;;  %v463_v11 = vsub.f32 %v1305_v1, %v1323_v6  ;;  %v418_v12 = vsub.f32 %v1326_v7, %v1329_v8  ;;  %v464_v13 = vsub.f32 %v393_v2, %v1329_v8  ;;  %v1343_v14 = vld [vmem:[%s1302_s7 + $0x90] sm:$0xff]  ;;  %1111 = vmatprep.subr.mxu0 %v1224_v0  ;;  %v1350_v16 = vld [vmem:[%s1297_s28 + $0x28] sm:$0xff]  ;;  %v1360_v24 = vld [vmem:[%s1297_s28 + $0x20] sm:$0xff] }
  0x13   : > { %v1346_v15 = vld [vmem:[%s1310_s10 + $0x110] sm:$0xff]  ;;  %1112 = vmatpush3.msra.mxu0 %v1333_v9  ;;  %v1370_v32 = vld [vmem:[%s1297_s28 + $0x18] sm:$0xff]  ;;  %v1396_v40 = vld [vmem:[%s1302_s7 + $0xa0] sm:$0xff]  ;;  %387 = vst.msk [vmem:[%s1501_s27] sm:$0x1] %vm383_vm3, %v1224_v0 }
  0x14   : > { %508 = vxpose.xlu0.b32.cont [2/8] (short) (narrow) %v393_v2, 8  ;;  %v419_v17 = vsub.f32 %v1343_v14, %v1346_v15  ;;  %v465_v18 = vsub.f32 %v394_v3, %v1346_v15  ;;  %v425_v19 = vand.u32 2147483647, %v417_v10  ;;  %v471_v20 = vand.u32 2147483647, %v463_v11  ;;  %1113 = vmatprep.subr.mxu0 %v1224_v0  ;;  %v1378_v36 = vld [vmem:[%s1302_s7 + $0xb8] sm:$0xff] }
  0x15   : > { %v426_v21 = vand.u32 2147483647, %v418_v12  ;;  %617 = vxpose.xlu1.b32.cont [2/8] (short) (narrow) %v1326_v7, 8  ;;  %v472_v22 = vand.u32 2147483647, %v464_v13  ;;  %1114 = vmatpush3.msra.mxu0 %v1350_v16  ;;  %v1384_v38 = vld [vmem:[%s1302_s7 + $0x98] sm:$0xff] }
  0x16   : > { %v427_v23 = vand.u32 2147483647, %v419_v17  ;;  %v434_v25 = vsel %vm388_vm0, %v425_v19, 0.0  ;;  %v479_v26 = vsel %vm388_vm0, %v471_v20, 0.0  ;;  %v473_v28 = vand.u32 2147483647, %v465_v18  ;;  %1115 = vmatprep.subr.mxu0 %v1224_v0  ;;  %1129 = vmatpush3.msra.mxu1 %v1378_v36 }
  0x17   : > { %v435_v27 = vsel %vm388_vm0, %v426_v21, 0.0  ;;  %v480_v30 = vsel %vm388_vm0, %v472_v22, 0.0  ;;  %1116 = vmatpush3.msra.mxu0 %v1360_v24  ;;  %1130 = vmatprep.subr.mxu1 %v1224_v0  ;;  %v1393_v39 = vld [vmem:[%s1302_s7 + $0xb0] sm:$0xff]  ;;  %v1403_v41 = vld [vmem:[%s1302_s7 + $0xa8] sm:$0xff]  ;;  %v1069_v42 = vld [vmem:[%s1310_s10 + $0x118] sm:$0xff] }
  0x18   : > { %509 = vxpose.xlu0.b32.cont [3/8] (short) (narrow) %v394_v3, 8  ;;  %v436_v29 = vadd.f32 %v435_v27, %v434_v25  ;;  %v437_v31 = vsel %vm388_vm0, %v427_v23, 0.0  ;;  %v481_v33 = vadd.f32 %v480_v30, %v479_v26  ;;  %v482_v34 = vsel %vm388_vm0, %v473_v28, 0.0  ;;  %1117 = vmatprep.subr.mxu0 %v1224_v0  ;;  %v1070_v43 = vld [vmem:[%s1310_s10 + $0x120] sm:$0xff]  ;;  %v1071_v44 = vld [vmem:[%s1310_s10 + $0x128] sm:$0xff]  ;;  %v1072_v45 = vld [vmem:[%s1310_s10 + $0x130] sm:$0xff] }
  0x19   : > { %618 = vxpose.xlu1.b32.cont [3/8] (short) (narrow) %v1343_v14, 8  ;;  %1118 = vmatpush3.msra.mxu0 %v1370_v32  ;;  %v1073_v46 = vld [vmem:[%s1310_s10 + $0x138] sm:$0xff]  ;;  %v420_v50 = vsub.f32 %v1384_v38, %v1069_v42  ;;  %v421_v52 = vsub.f32 %v1396_v40, %v1070_v43  ;;  %v422_v53 = vsub.f32 %v1403_v41, %v1071_v44 }
  0x1a   : > { %v1375_v35 = vadd.f32 %v437_v31, %v436_v29  ;;  %v1381_v37 = vadd.f32 %v482_v34, %v481_v33  ;;  %1119 = vmatprep.subr.mxu0 %v1224_v0  ;;  %1131 = vmatpush3.msra.mxu1 %v1393_v39  ;;  %v466_v54 = vsub.f32 %v1370_v32, %v1069_v42  ;;  %v615_v29 = vld [vmem:[#allocation3] sm:$0xff] }
  0x1b   : > { %1120 = vmatpush3.msra.mxu0 %v394_v3  ;;  %1132 = vmatprep.subr.mxu1 %v1224_v0  ;;  %v428_v51 = vand.u32 2147483647, %v420_v50  ;;  %v429_v56 = vand.u32 2147483647, %v421_v52  ;;  %v430_v57 = vand.u32 2147483647, %v422_v53  ;;  %v467_v59 = vsub.f32 %v1360_v24, %v1070_v43 }
  0x1c   : > { %510 = vxpose.xlu0.b32.cont [4/8] (short) (narrow) %v1370_v32, 8  ;;  %1121 = vmatprep.subr.mxu0 %v1224_v0  ;;  %v474_v58 = vand.u32 2147483647, %v466_v54  ;;  %v468_v60 = vsub.f32 %v1350_v16, %v1071_v44  ;;  %v423_v62 = vsub.f32 %v1393_v39, %v1072_v45 }
  0x1d   : > { %619 = vxpose.xlu1.b32.cont [4/8] (short) (narrow) %v1384_v38, 8  ;;  %1122 = vmatpush3.msra.mxu0 %v393_v2  ;;  %v439_v55 = vsel %vm388_vm0, %v428_v51, 0.0  ;;  %v441_v63 = vsel %vm388_vm0, %v429_v56, 0.0  ;;  %v424_v2 = vsub.f32 %v1378_v36, %v1073_v46 }
  0x1e   : > { %1123 = vmatprep.subr.mxu0 %v1224_v0  ;;  %1133 = vmatpush3.msra.mxu1 %v1403_v41  ;;  %v440_v61 = vadd.f32 %v439_v55, %v1375_v35  ;;  %v431_v3 = vand.u32 2147483647, %v423_v62  ;;  %v723_v35 = vld [vmem:[#allocation4] sm:$0xff]  ;;  %v416_v62 = vld [vmem:[%s369_s13] sm:$0x1] }
  0x1f   : > { %1124 = vmatpush3.msra.mxu0 %v1305_v1  ;;  %1134 = vmatprep.subr.mxu1 %v1224_v0  ;;  %v432_v11 = vand.u32 2147483647, %v424_v2  ;;  %v462_v2 = vld [vmem:[%s372_s16] sm:$0x1] }
  0x20   : > { %511 = vxpose.xlu0.b32.cont [5/8] (short) (narrow) %v1360_v24, 8  ;;  %1147 = vmatprep.subr.mxu0 %v1224_v0  ;;  %v442_v1 = vadd.f32 %v441_v63, %v440_v61  ;;  %v445_v12 = vsel %vm388_vm0, %v431_v3, 0.0 }
  0x21   : > { %620 = vxpose.xlu1.b32.cont [5/8] (short) (narrow) %v1396_v40, 8  ;;  %1135 = vmatpush3.msra.mxu1 %v1396_v40 }
  0x22   : > { %1136 = vmatprep.subr.mxu1 %v1224_v0 }
  0x23   : > { %1137 = vmatpush3.msra.mxu1 %v1384_v38 }
  0x24   : > { %512 = vxpose.xlu0.b32.cont [6/8] (short) (narrow) %v1350_v16, 8  ;;  %1138 = vmatprep.subr.mxu1 %v1224_v0  ;;  %v470_v16 = vsub.f32 %v1316_v4, %v1073_v46 }
  0x25   : > { %621 = vxpose.xlu1.b32.cont [6/8] (short) (narrow) %v1403_v41, 8  ;;  %1139 = vmatpush3.msra.mxu1 %v1343_v14  ;;  %v447_v14 = vsel %vm388_vm0, %v432_v11, 0.0 }
  0x26   : > { %1140 = vmatprep.subr.mxu1 %v1224_v0  ;;  %v478_v22 = vand.u32 2147483647, %v470_v16 }
  0x27   : > { %1141 = vmatpush3.msra.mxu1 %v1326_v7  ;;  %v475_v7 = vand.u32 2147483647, %v467_v59 }
  0x28   : > { %513 = vxpose.xlu0.b32.cont [7/8] (short) (narrow) %v1333_v9, 8  ;;  %1142 = vmatprep.subr.mxu1 %v1224_v0  ;;  %v492_v26 = vsel %vm388_vm0, %v478_v22, 0.0 }
  0x29   : > { %622 = vxpose.xlu1.b32.cont [7/8] (short) (narrow) %v1393_v39, 8  ;;  %1143 = vmatpush3.msra.mxu1 %v1319_v5  ;;  %v443_v5 = vsel %vm388_vm0, %v430_v57, 0.0  ;;  %v486_v19 = vsel %vm388_vm0, %v475_v7, 0.0 }
  0x2a   : > { %v444_v10 = vadd.f32 %v443_v5, %v442_v1 }
  0x2c   : > { %514 = vxpose.xlu0.b32.end [8/8] (short) (narrow) %v1316_v4, 8  ;;  %v446_v13 = vadd.f32 %v445_v12, %v444_v10  ;;  %v506_v4 = vld [vmem:[#allocation2] sm:$0xff] }
  0x2d   : > { %623 = vxpose.xlu1.b32.end [8/8] (short) (narrow) %v1378_v36, 8 }
  0x2e   : > { %v448_v18 = vadd.f32 %v447_v14, %v446_v13 }
  0x30   : > { %724 = vxpose.xlu0.b32.start [1/8] (short) (narrow) %v1323_v6, 8 }
  0x34   : > { %725 = vxpose.xlu0.b32.cont [2/8] (short) (narrow) %v1329_v8, 8 }
  0x38   : > { %726 = vxpose.xlu0.b32.cont [3/8] (short) (narrow) %v1346_v15, 8 }
  0x3c   : > { %727 = vxpose.xlu0.b32.cont [4/8] (short) (narrow) %v1069_v42, 8 }
  0x40   : > { %728 = vxpose.xlu0.b32.cont [5/8] (short) (narrow) %v1070_v43, 8 }
  0x44   : > { %729 = vxpose.xlu0.b32.cont [6/8] (short) (narrow) %v1071_v44, 8 }
  0x48   : > { %730 = vxpose.xlu0.b32.cont [7/8] (short) (narrow) %v1072_v45, 8 }
  0x4c   : > { %731 = vxpose.xlu0.b32.end [8/8] (short) (narrow) %v1073_v46, 8 }
  0x54   : > { %449 = vadd.xlane.f32.xlu1 %v448_v18 }
  0x8c   : > { %v523_v47 = vpop.trf.xlu0 }
  0x8d   : > { %1126 = vmatmul.mubr.msk.f32.vlgmr.msra.gmra.mxu0 %vm539_vm2, %v523_v47  ;;  %v632_v48 = vpop.trf.xlu1 }
  0x8e   : > { %1148 = vmatpush3.msra.mxu0 %v1073_v46  ;;  %1163 = vmatprep.mubr.msk.f32.mxu0 %vm1225_vm1, %v1224_v0 }
  0x8f   : > { %1149 = vmatprep.subr.mxu0 %v1224_v0  ;;  %1145 = vmatmul.mubr.msk.f32.vlgmr.msra.gmra.mxu1 %vm539_vm2, %v632_v48 }
  0x90   : > { %1150 = vmatpush3.msra.mxu0 %v1072_v45 }
  0x91   : > { %1151 = vmatprep.subr.mxu0 %v1224_v0 }
  0x92   : > { %1152 = vmatpush3.msra.mxu0 %v1071_v44 }
  0x93   : > { %1153 = vmatprep.subr.mxu0 %v1224_v0 }
  0x94   : > { %1154 = vmatpush3.msra.mxu0 %v1070_v43 }
  0x95   : > { %1155 = vmatprep.subr.mxu0 %v1224_v0 }
  0x96   : > { %1156 = vmatpush3.msra.mxu0 %v1069_v42 }
  0x97   : > { %1157 = vmatprep.subr.mxu0 %v1224_v0 }
  0x98   : > { %1158 = vmatpush3.msra.mxu0 %v1346_v15  ;;  %v469_v15 = vsub.f32 %v1333_v9, %v1072_v45 }
  0x99   : > { %1159 = vmatprep.subr.mxu0 %v1224_v0 }
  0x9a   : > { %1160 = vmatpush3.msra.mxu0 %v1329_v8  ;;  %v476_v8 = vand.u32 2147483647, %v468_v60  ;;  %v477_v21 = vand.u32 2147483647, %v469_v15 }
  0x9b   : > { %1161 = vmatprep.subr.mxu0 %v1224_v0 }
  0x9c   : > { %1162 = vmatpush3.msra.mxu0 %v1323_v6  ;;  %v484_v6 = vsel %vm388_vm0, %v474_v58, 0.0  ;;  %v488_v20 = vsel %vm388_vm0, %v476_v8, 0.0  ;;  %v490_v25 = vsel %vm388_vm0, %v477_v21, 0.0 }
  0x9d   : > { %v485_v17 = vadd.f32 %v484_v6, %v1381_v37 }
  0x9f   : > { %v487_v23 = vadd.f32 %v486_v19, %v485_v17 }
  0xa1   : > { %v489_v24 = vadd.f32 %v488_v20, %v487_v23  ;;  %v835_v20 = vld [vmem:[%s1491_s19] sm:$0x1] }
  0xa2   : > { %v852_v23 = vld [vmem:[%s1501_s27] sm:$0x1] }
  0xa3   : > { %v491_v27 = vadd.f32 %v490_v25, %v489_v24 }
  0xa5   : > { %v493_v9 = vadd.f32 %v492_v26, %v491_v27 }
  0xa7   : > { %494 = vadd.xlane.f32.xlu0 %v493_v9 }
  0xac   : > { %v740_v49 = vpop.trf.xlu0 }
  0xad   : > { %1164 = vmatmul.mubr.msk.f32.vlgmr.msra.gmra.mxu0 %vm539_vm2, %v740_v49 }
  0xdd   : > { %v450_v47 = vpop.xlane.xlu1 %449 }
  0xde   : > { %v451_v48 = vrot.slane %v450_v47, 4 }
  0xe0   : > { %v452_v49 = vadd.f32 %v451_v48, %v450_v47 }
  0xe2   : > { %v453_v51 = vrot.slane %v452_v49, 2 }
  0xe4   : > { %v454_v53 = vadd.f32 %v453_v51, %v452_v49 }
  0xe6   : > { %v455_v55 = vrot.slane %v454_v53, 1 }
  0xe8   : > { %v456_v57 = vadd.f32 %v455_v55, %v454_v53 }
  0xea   : > { %1166 = vpush %v456_v57 }
 0x11b   : > { %s1167_s20 = spop %1166 }
 0x11c   : > { %v458_v63 = vstv %s1167_s20 }
 0x11d   : > { %v459_v1 = vadd.f32 %v458_v63, %v416_v62 }
 0x11f   : > { %461 = vst.msk [vmem:[%s369_s13] sm:$0x1] %vm383_vm3, %v459_v1 }
 0x130   : > { %v495_v52 = vpop.xlane.xlu0 %494 }
 0x131   : > { %v496_v54 = vrot.slane %v495_v52, 4 }
 0x133   : > { %v497_v56 = vadd.f32 %v496_v54, %v495_v52 }
 0x135   : > { %v498_v58 = vrot.slane %v497_v56, 2 }
 0x137   : > { %v499_v59 = vadd.f32 %v498_v58, %v497_v56 }
 0x139   : > { %v500_v60 = vrot.slane %v499_v59, 1 }
 0x13b   : > { %v501_v61 = vadd.f32 %v500_v60, %v499_v59 }
 0x13d   : > { %1168 = vpush %v501_v61 }
 0x14d   : > { %v609_v28 = vpop.f32.mrf.mxu0 }
 0x14e   : > { %v613_v30 = vadd.f32 %v609_v28, %v506_v4 }
 0x14f   : > { %v1127_v31 = vpop.f32.mrf.mxu0  ;;  %v717_v32 = vpop.f32.mrf.mxu1 }
 0x150   : > { %614 = vst.msk [vmem:[#allocation2] sm:$0xff] %vm388_vm0, %v613_v30  ;;  %v721_v33 = vadd.f32 %v717_v32, %v615_v29 }
 0x151   : > { %v1146_v34 = vpop.f32.mrf.mxu1 }
 0x152   : > { %722 = vst.msk [vmem:[#allocation3] sm:$0xff] %vm388_vm0, %v721_v33 }
 0x157   : > { %v853_v41 = vld [vmem:[#allocation2] sm:$0xff] }
 0x159   : > { %v836_v39 = vld [vmem:[#allocation3] sm:$0xff] }
 0x16d   : > { %v825_v36 = vpop.f32.mrf.mxu0 }
 0x16e   : > { %v829_v37 = vadd.f32 %v825_v36, %v723_v35  ;;  %s1169_s28 = spop %1168 }
 0x16f   : > { %v1165_v38 = vpop.f32.mrf.mxu0  ;;  %v503_v3 = vstv %s1169_s28 }
 0x170   : > { %830 = vst.msk [vmem:[#allocation4] sm:$0xff] %vm388_vm0, %v829_v37  ;;  %v504_v5 = vadd.f32 %v503_v3, %v462_v2 }
 0x172   : > { %505 = vst.msk [vmem:[%s372_s16] sm:$0x1] %vm383_vm3, %v504_v5 }
 0x177   : > { %v834_v40 = vld [vmem:[#allocation4] sm:$0xff] }
 0x178   : > { %v837_v42 = vsub.f32 %v836_v39, %v834_v40  ;;  %v854_v43 = vsub.f32 %v853_v41, %v834_v40 }
 0x17a   : > { %v838_v44 = vand.u32 2147483647, %v837_v42  ;;  %v855_v46 = vand.u32 2147483647, %v854_v43 }
 0x17c   : > { %v839_v45 = vsel %vm388_vm0, %v838_v44, 0.0  ;;  %v856_v50 = vsel %vm388_vm0, %v855_v46, 0.0 }
 0x17d   : > { %840 = vadd.xlane.f32.xlu1 %v839_v45 }
 0x181   : > { %857 = vadd.xlane.f32.xlu1 %v856_v50 }
 0x206   : > { %v841_v6 = vpop.xlane.xlu1 %840 }
 0x207   : > { %v842_v7 = vrot.slane %v841_v6, 4 }
 0x209   : > { %v843_v8 = vadd.f32 %v842_v7, %v841_v6 }
 0x20a   : > { %v858_v10 = vpop.xlane.xlu1 %857 }
 0x20b   : > { %v844_v11 = vrot.slane %v843_v8, 2  ;;  %v859_v12 = vrot.slane %v858_v10, 4 }
 0x20d   : > { %v860_v13 = vadd.f32 %v859_v12, %v858_v10  ;;  %v845_v14 = vadd.f32 %v844_v11, %v843_v8 }
 0x20f   : > { %v861_v15 = vrot.slane %v860_v13, 2  ;;  %v846_v16 = vrot.slane %v845_v14, 1 }
 0x211   : > { %v862_v17 = vadd.f32 %v861_v15, %v860_v13  ;;  %v847_v0 = vadd.f32 %v846_v16, %v845_v14 }
 0x213   : > { %1170 = vpush %v847_v0  ;;  %v863_v18 = vrot.slane %v862_v17, 1 }
 0x215   : > { %v864_v19 = vadd.f32 %v863_v18, %v862_v17 }
 0x217   : > { %1172 = vpush %v864_v19 }
 0x244   : > { %s1171_s21 = spop %1170 }
 0x245   : > { %v849_v21 = vstv %s1171_s21 }
 0x246   : > { %v850_v22 = vadd.f32 %v849_v21, %v835_v20 }
 0x248   : > { %851 = vst.msk [vmem:[%s1491_s19] sm:$0x1] %vm383_vm3, %v850_v22  ;;  %s1173_s29 = spop %1172 }
 0x249   : > { %v866_v24 = vstv %s1173_s29 }
 0x24a   : > { %v867_v25 = vadd.f32 %v866_v24, %v852_v23 }
 0x24c   : > { %868 = vst.msk [vmem:[%s1501_s27] sm:$0x1] %vm383_vm3, %v867_v25 }
 0x24d PF: > { %s17_s23 = sadd.s32 1, %s1222_s23   ;;  %s1529_s21 = smov %s1218_s22 }
 0x24e   : > { %p14_p5 = scmp.ge.s32.totalorder %s17_s23, 4   ;;  %s1530_s22 = smov %s1532_s24 }
 0x250   :  { %16 = sbr.rel (!%p14_p5) target bundleno = 2 (0x2), region = 112 }

// kernel: loss_with_gan_ste_forward.17
= control target key start
LH: loop header
LB: loop body
LE: loop exit
PB: predicated region body
PF: predicated region fallthrough
CT: control target
= control target key end

     0   :  { %s348_s1 = inlined_call_operand.vmem [shape: f32[256,128], index: 1, kind: input, shape index: {}]   ;;  %s349_s0 = inlined_call_operand.vmem [shape: f32[12,256], index: 0, kind: input, shape index: {}]   ;;  %s350_s2 = inlined_call_operand.vmem [shape: f32[1,128], index: 2, kind: input, shape index: {}]   ;;  %s351_s3 = inlined_call_operand.vmem [shape: f32[12,128], index: 3, kind: output, shape index: {}]  }
   0x1   :  { %v49_v0 = vld [vmem:[%s348_s1 + $0xf8] sm:$0xff]  ;;  %v48_v2 = vld [vmem:[%s348_s1 + $0xf0] sm:$0xff]  ;;  %v47_v4 = vld [vmem:[%s348_s1 + $0xe8] sm:$0xff] }
   0x2   :  { %v33_v1 = vld [vmem:[%s348_s1 + $0x78] sm:$0xff]  ;;  %141 = vmatprep.subr.mxu0 %v49_v0  ;;  %179 = vmatprep.subr.mxu1 %v49_v0  ;;  %v32_v3 = vld [vmem:[%s348_s1 + $0x70] sm:$0xff]  ;;  %v31_v5 = vld [vmem:[%s348_s1 + $0x68] sm:$0xff] }
   0x3   :  { %142 = vmatpush3.msra.mxu0 %v33_v1  ;;  %195 = vmatpush3.msra.mxu1 %v33_v1  ;;  %v46_v6 = vld [vmem:[%s348_s1 + $0xe0] sm:$0xff]  ;;  %v45_v8 = vld [vmem:[%s348_s1 + $0xd8] sm:$0xff]  ;;  %v44_v10 = vld [vmem:[%s348_s1 + $0xd0] sm:$0xff] }
   0x4   :  { %143 = vmatprep.subr.mxu0 %v48_v2  ;;  %180 = vmatprep.subr.mxu1 %v48_v2  ;;  %v30_v7 = vld [vmem:[%s348_s1 + $0x60] sm:$0xff]  ;;  %v29_v9 = vld [vmem:[%s348_s1 + $0x58] sm:$0xff]  ;;  %v28_v11 = vld [vmem:[%s348_s1 + $0x50] sm:$0xff] }
   0x5   :  { %144 = vmatpush3.msra.mxu0 %v32_v3  ;;  %196 = vmatpush3.msra.mxu1 %v32_v3  ;;  %v43_v12 = vld [vmem:[%s348_s1 + $0xc8] sm:$0xff]  ;;  %v42_v14 = vld [vmem:[%s348_s1 + $0xc0] sm:$0xff]  ;;  %v41_v16 = vld [vmem:[%s348_s1 + $0xb8] sm:$0xff] }
   0x6   :  { %145 = vmatprep.subr.mxu0 %v47_v4  ;;  %181 = vmatprep.subr.mxu1 %v47_v4  ;;  %v27_v13 = vld [vmem:[%s348_s1 + $0x48] sm:$0xff]  ;;  %v26_v15 = vld [vmem:[%s348_s1 + $0x40] sm:$0xff]  ;;  %v25_v17 = vld [vmem:[%s348_s1 + $0x38] sm:$0xff] }
   0x7   :  { %146 = vmatpush3.msra.mxu0 %v31_v5  ;;  %197 = vmatpush3.msra.mxu1 %v31_v5  ;;  %v40_v18 = vld [vmem:[%s348_s1 + $0xb0] sm:$0xff]  ;;  %v39_v20 = vld [vmem:[%s348_s1 + $0xa8] sm:$0xff]  ;;  %v38_v22 = vld [vmem:[%s348_s1 + $0xa0] sm:$0xff] }
   0x8   :  { %147 = vmatprep.subr.mxu0 %v46_v6  ;;  %182 = vmatprep.subr.mxu1 %v46_v6  ;;  %v24_v19 = vld [vmem:[%s348_s1 + $0x30] sm:$0xff]  ;;  %v23_v21 = vld [vmem:[%s348_s1 + $0x28] sm:$0xff]  ;;  %v22_v23 = vld [vmem:[%s348_s1 + $0x20] sm:$0xff] }
   0x9   :  { %148 = vmatpush3.msra.mxu0 %v30_v7  ;;  %198 = vmatpush3.msra.mxu1 %v30_v7  ;;  %v37_v24 = vld [vmem:[%s348_s1 + $0x98] sm:$0xff]  ;;  %v36_v26 = vld [vmem:[%s348_s1 + $0x90] sm:$0xff]  ;;  %v35_v28 = vld [vmem:[%s348_s1 + $0x88] sm:$0xff] }
   0xa   :  { %149 = vmatprep.subr.mxu0 %v45_v8  ;;  %183 = vmatprep.subr.mxu1 %v45_v8  ;;  %v21_v25 = vld [vmem:[%s348_s1 + $0x18] sm:$0xff]  ;;  %v20_v27 = vld [vmem:[%s348_s1 + $0x10] sm:$0xff]  ;;  %v19_v29 = vld [vmem:[%s348_s1 + $0x8] sm:$0xff] }
   0xb   :  { %150 = vmatpush3.msra.mxu0 %v29_v9  ;;  %199 = vmatpush3.msra.mxu1 %v29_v9  ;;  %v34_v30 = vld [vmem:[%s348_s1 + $0x80] sm:$0xff]  ;;  %v15_v32 = vld [vmem:[%s349_s0 + $0x8] sm:$0xff]  ;;  %v17_v33 = vld [vmem:[%s349_s0 + $0x18] sm:$0xf] }
   0xc   :  { %151 = vmatprep.subr.mxu0 %v44_v10  ;;  %184 = vmatprep.subr.mxu1 %v44_v10  ;;  %v18_v31 = vld [vmem:[%s348_s1] sm:$0xff]  ;;  %v16_v35 = vld [vmem:[%s349_s0 + $0x10] sm:$0xf] }
   0xd   :  { %152 = vmatpush3.msra.mxu0 %v28_v11  ;;  %200 = vmatpush3.msra.mxu1 %v28_v11  ;;  %v14_v34 = vld [vmem:[%s349_s0] sm:$0xff] }
   0xe   :  { %153 = vmatprep.subr.mxu0 %v43_v12  ;;  %185 = vmatprep.subr.mxu1 %v43_v12  ;;  %v140_v38 = vld [vmem:[%s350_s2] ss:$0 sm:$0xff] }
   0xf   :  { %154 = vmatpush3.msra.mxu0 %v27_v13  ;;  %201 = vmatpush3.msra.mxu1 %v27_v13 }
  0x10   :  { %155 = vmatprep.subr.mxu0 %v42_v14  ;;  %186 = vmatprep.subr.mxu1 %v42_v14 }
  0x11   :  { %156 = vmatpush3.msra.mxu0 %v26_v15  ;;  %202 = vmatpush3.msra.mxu1 %v26_v15 }
  0x12   :  { %157 = vmatprep.subr.mxu0 %v41_v16  ;;  %187 = vmatprep.subr.mxu1 %v41_v16 }
  0x13   :  { %158 = vmatpush3.msra.mxu0 %v25_v17  ;;  %203 = vmatpush3.msra.mxu1 %v25_v17 }
  0x14   :  { %159 = vmatprep.subr.mxu0 %v40_v18  ;;  %188 = vmatprep.subr.mxu1 %v40_v18 }
  0x15   :  { %160 = vmatpush3.msra.mxu0 %v24_v19  ;;  %204 = vmatpush3.msra.mxu1 %v24_v19 }
  0x16   :  { %161 = vmatprep.subr.mxu0 %v39_v20  ;;  %189 = vmatprep.subr.mxu1 %v39_v20 }
  0x17   :  { %162 = vmatpush3.msra.mxu0 %v23_v21  ;;  %205 = vmatpush3.msra.mxu1 %v23_v21 }
  0x18   :  { %163 = vmatprep.subr.mxu0 %v38_v22  ;;  %190 = vmatprep.subr.mxu1 %v38_v22 }
  0x19   :  { %164 = vmatpush3.msra.mxu0 %v22_v23  ;;  %206 = vmatpush3.msra.mxu1 %v22_v23 }
  0x1a   :  { %165 = vmatprep.subr.mxu0 %v37_v24  ;;  %191 = vmatprep.subr.mxu1 %v37_v24 }
  0x1b   :  { %166 = vmatpush3.msra.mxu0 %v21_v25  ;;  %207 = vmatpush3.msra.mxu1 %v21_v25 }
  0x1c   :  { %167 = vmatprep.subr.mxu0 %v36_v26  ;;  %192 = vmatprep.subr.mxu1 %v36_v26 }
  0x1d   :  { %168 = vmatpush3.msra.mxu0 %v20_v27  ;;  %208 = vmatpush3.msra.mxu1 %v20_v27 }
  0x1e   :  { %169 = vmatprep.subr.mxu0 %v35_v28  ;;  %193 = vmatprep.subr.mxu1 %v35_v28 }
  0x1f   :  { %170 = vmatpush3.msra.mxu0 %v19_v29  ;;  %209 = vmatpush3.msra.mxu1 %v19_v29 }
  0x20   :  { %171 = vmatprep.subr.mxu0 %v34_v30  ;;  %194 = vmatprep.subr.mxu1 %v34_v30 }
  0x21   :  { %172 = vmatpush3.msra.mxu0 %v18_v31  ;;  %210 = vmatpush3.msra.mxu1 %v18_v31 }
  0x22   :  { %121 = vmatprep.mubr.f32.mxu0 %v15_v32  ;;  %126 = vmatprep.mubr.f32.mxu1 %v17_v33 }
  0x23   :  { %122 = vmatmul.mubr.f32.vlgmr.msra.gmra.mxu0 %v14_v34  ;;  %127 = vmatmul.mubr.f32.vlgmr.msra.gmra.mxu1 %v16_v35 }
  0xe3   :  { %v173_v36 = vpop.f32.mrf.mxu0  ;;  %v176_v37 = vpop.f32.mrf.mxu1 }
  0xe5   :  { %v174_v39 = vpop.f32.mrf.mxu0  ;;  %v177_v40 = vpop.f32.mrf.mxu1 }
  0xe6   :  { %v175_v41 = vadd.f32 %v174_v39, %v173_v36  ;;  %v178_v42 = vadd.f32 %v177_v40, %v176_v37 }
  0xe8   :  { %v124_v43 = vadd.f32 %v175_v41, %v140_v38  ;;  %v129_v44 = vadd.f32 %v178_v42, %v140_v38 }
  0xea   :  { %v132_v45 = vmax.f32 %v124_v43, 0.0  ;;  %v133_v46 = vmax.f32 %v129_v44, 0.0 }
  0xec   :  { %134 = vst [vmem:[%s351_s3] sm:$0xff] %v132_v45  ;;  %135 = vst [vmem:[%s351_s3 + $0x8] sm:$0xf] %v133_v46 }

// kernel: loss_with_gan_ste_forward.20
= control target key start
LH: loop header
LB: loop body
LE: loop exit
PB: predicated region body
PF: predicated region fallthrough
CT: control target
= control target key end

     0   :  { %s1179_s21 = smov 0   ;;  %s1181_s22 = smov 0   ;;  %s1288_s0 = inlined_call_operand.vmem [shape: f32[3,2,16,16], index: 0, kind: input, shape index: {}, may-alias: {0,1,2}]   ;;  %s1289_s1 = inlined_call_operand.vmem [shape: f32[3,2,16,16], index: 1, kind: input, shape index: {}, may-alias: {0,1,2}]   ;;  %s1290_s2 = inlined_call_operand.vmem [shape: f32[3,2,16,16], index: 2, kind: input, shape index: {}, may-alias: {0,1,2}]   ;;  %s1291_s3 = inlined_call_operand.vmem [shape: f32[2,1,1], index: 3, kind: output, shape index: {0}]   ;;  %s1292_s4 = inlined_call_operand.vmem [shape: f32[2,1,1], index: 4, kind: output, shape index: {1}]   ;;  %s1293_s5 = inlined_call_operand.vmem [shape: f32[2,1,1], index: 5, kind: output, shape index: {2}]   ;;  %s1294_s6 = inlined_call_operand.vmem [shape: f32[2,1,1], index: 6, kind: output, shape index: {3}]  }
   0x1   :  { %s1183_s23 = smov 0  }
   0x2 LB: > { %s29_s24 = sadd.s32 1, %s1137_s22  ;;  %p1031_p0 = scmp.ge.s32.totalorder %s1141_s23, 1  ;;  %s1141_s23 = sphi %s1183_s23, %s17_s23   ;;  %s1137_s22 = sphi %s1181_s22, %s1296_s22   ;;  %s1133_s21 = sphi %s1179_s21, %s1295_s21  }
   0x3   : > { %p31_p1 = scmp.ge.s32.totalorder %s29_s24, 2  ;;  %p274_p2 = scmp.lt.s32.totalorder %s1141_s23, 3 }
   0x5   : > { %s1298_s24 = smov (%p31_p1, %s29_s24), 0  ;;  %p275_p3 = pnand %p1031_p0, %p274_p2 }
   0x6   : > { %p336_p4 = scmp.lt.s32.totalorder (!%p275_p3), %s1133_s21, 1 }
   0x7   : > { %278 = sbr.rel (%p275_p3) target bundleno = 573 (0x23d), region = 32 }
   0xc   : > { %s1300_s21 = smov (!%p336_p4, %s1133_s21), 1  ;;  %vm388_vm0 = vcmask 130048   ;;  %v1143_v6 = vmov 0.0   ;;  %vm383_vm1 = vcmask 0  }
   0xd   : > { %s1050_s25 = sshll.u32 %s1300_s21, 4  ;;  %390 = vst.msk [vmem:[#allocation2 + $0x8] sm:$0xff] %vm388_vm0, %v1143_v6  ;;  %389 = vst.msk [vmem:[#allocation2] sm:$0xff] %vm388_vm0, %v1143_v6  ;;  %s369_s13 = scalar_lea.vmem %s1291_s3, %s1300_s21 }
   0xe   : > { %s343_s28 = scalar_lea.vmem %s1288_s0, %s1050_s25  ;;  %s941_s7 = scalar_lea.vmem %s1289_s1, %s1050_s25  ;;  %391 = vst.msk [vmem:[#allocation3] sm:$0xff] %vm388_vm0, %v1143_v6  ;;  %392 = vst.msk [vmem:[#allocation3 + $0x8] sm:$0xff] %vm388_vm0, %v1143_v6 }
   0xf   : > { %v395_v0 = vld [vmem:[%s343_s28] sm:$0xff]  ;;  %v396_v2 = vld [vmem:[%s343_s28 + $0x8] sm:$0xff]  ;;  %s946_s10 = scalar_lea.vmem %s1290_s2, %s1050_s25  ;;  %393 = vst.msk [vmem:[#allocation4] sm:$0xff] %vm388_vm0, %v1143_v6  ;;  %394 = vst.msk [vmem:[#allocation4 + $0x8] sm:$0xff] %vm388_vm0, %v1143_v6  ;;  %s372_s16 = scalar_lea.vmem %s1292_s4, %s1300_s21 }
  0x10   : > { %v1038_v1 = vld [vmem:[%s941_s7 + $0x20] sm:$0xff]  ;;  %445 = vxpose.xlu0.b32.start [1/2] (short) (narrow) %v395_v0, 16  ;;  %v1039_v3 = vld [vmem:[%s941_s7 + $0x28] sm:$0xff]  ;;  %1065 = vmatprep.subr.mxu0 %v396_v2  ;;  %384 = vst.msk [vmem:[%s369_s13] sm:$0x1] %vm383_vm1, %v1143_v6  ;;  %s1257_s19 = scalar_lea.vmem %s1293_s5, %s1300_s21  ;;  %s1267_s27 = scalar_lea.vmem %s1294_s6, %s1300_s21 }
  0x11   : > { %564 = vxpose.xlu1.b32.start [1/2] (short) (narrow) %v1038_v1, 16  ;;  %1072 = vmatprep.subr.mxu1 %v1039_v3  ;;  %v1040_v4 = vld [vmem:[%s946_s10 + $0x40] sm:$0xff]  ;;  %v1041_v5 = vld [vmem:[%s946_s10 + $0x48] sm:$0xff]  ;;  %385 = vst.msk [vmem:[%s372_s16] sm:$0x1] %vm383_vm1, %v1143_v6 }
  0x12   : > { %1066 = vmatpush3.msra.mxu0 %v396_v2  ;;  %1073 = vmatpush3.msra.mxu1 %v1039_v3  ;;  %v402_v13 = vsub.f32 %v1038_v1, %v1040_v4  ;;  %v403_v14 = vsub.f32 %v1039_v3, %v1041_v5  ;;  %v424_v17 = vsub.f32 %v395_v0, %v1040_v4 }
  0x13   : > { %1067 = vmatprep.subr.mxu0 %v395_v0  ;;  %1074 = vmatprep.subr.mxu1 %v1038_v1  ;;  %v425_v18 = vsub.f32 %v396_v2, %v1041_v5  ;;  %386 = vst.msk [vmem:[%s1257_s19] sm:$0x1] %vm383_vm1, %v1143_v6  ;;  %387 = vst.msk [vmem:[%s1267_s27] sm:$0x1] %vm383_vm1, %v1143_v6 }
  0x14   : > { %446 = vxpose.xlu0.b32.end [2/2] (short) (narrow) %v396_v2, 16  ;;  %1068 = vmatpush3.msra.mxu0 %v395_v0  ;;  %v404_v15 = vand.u32 2147483647, %v402_v13  ;;  %v405_v16 = vand.u32 2147483647, %v403_v14  ;;  %v444_v27 = vld [vmem:[#allocation2 + $0x8] sm:$0xff] }
  0x15   : > { %565 = vxpose.xlu1.b32.end [2/2] (short) (narrow) %v1039_v3, 16  ;;  %1075 = vmatpush3.msra.mxu1 %v1038_v1  ;;  %v426_v21 = vand.u32 2147483647, %v424_v17  ;;  %v427_v22 = vand.u32 2147483647, %v425_v18  ;;  %v563_v28 = vld [vmem:[#allocation3 + $0x8] sm:$0xff] }
  0x16   : > { %1079 = vmatprep.subr.mxu0 %v1041_v5  ;;  %v407_v19 = vsel %vm388_vm0, %v404_v15, 0.0  ;;  %v408_v20 = vsel %vm388_vm0, %v405_v16, 0.0  ;;  %v443_v30 = vld [vmem:[#allocation2] sm:$0xff]  ;;  %v562_v32 = vld [vmem:[#allocation3] sm:$0xff]  ;;  %v682_v39 = vld [vmem:[#allocation4 + $0x8] sm:$0xff] }
  0x17   : > { %v409_v23 = vadd.f32 %v408_v20, %v407_v19  ;;  %v428_v24 = vsel %vm388_vm0, %v426_v21, 0.0  ;;  %v429_v25 = vsel %vm388_vm0, %v427_v22, 0.0  ;;  %v681_v41 = vld [vmem:[#allocation4] sm:$0xff] }
  0x18   : > { %683 = vxpose.xlu0.b32.start [1/2] (short) (narrow) %v1040_v4, 16  ;;  %v430_v26 = vadd.f32 %v429_v25, %v428_v24  ;;  %v401_v16 = vld [vmem:[%s369_s13] sm:$0x1] }
  0x19   : > { %v423_v19 = vld [vmem:[%s372_s16] sm:$0x1] }
  0x1c   : > { %684 = vxpose.xlu0.b32.end [2/2] (short) (narrow) %v1041_v5, 16 }
  0x3c   : > { %410 = vadd.xlane.f32.xlu1 %v409_v23 }
  0x49   : > { %431 = vadd.xlane.f32.xlu0 %v430_v26 }
  0x8c   : > { %v461_v7 = vpop.trf.xlu0 }
  0x8d   : > { %v580_v8 = vpop.trf.xlu1  ;;  %1069 = vmatprep.mubr.msk.f32.mxu0 %vm388_vm0, %v461_v7 }
  0x8e   : > { %1076 = vmatprep.mubr.msk.f32.mxu1 %vm388_vm0, %v580_v8 }
  0x90   : > { %v462_v9 = vpop.trf.xlu0 }
  0x91   : > { %v581_v10 = vpop.trf.xlu1  ;;  %1070 = vmatmul.mubr.msk.f32.vlgmr.msra.gmra.mxu0 %vm388_vm0, %v462_v9 }
  0x92   : > { %1077 = vmatmul.mubr.msk.f32.vlgmr.msra.gmra.mxu1 %vm388_vm0, %v581_v10  ;;  %1080 = vmatpush3.msra.mxu0 %v1041_v5 }
  0x93   : > { %1081 = vmatprep.subr.mxu0 %v1040_v4 }
  0x94   : > { %v699_v11 = vpop.trf.xlu0  ;;  %1082 = vmatpush3.msra.mxu0 %v1040_v4 }
  0x95   : > { %1083 = vmatprep.mubr.msk.f32.mxu0 %vm388_vm0, %v699_v11 }
  0x98   : > { %v700_v12 = vpop.trf.xlu0 }
  0x99   : > { %1084 = vmatmul.mubr.msk.f32.vlgmr.msra.gmra.mxu0 %vm388_vm0, %v700_v12 }
  0xc5   : > { %v411_v63 = vpop.xlane.xlu1 %410 }
  0xc6   : > { %v412_v0 = vrot.slane %v411_v63, 4 }
  0xc8   : > { %v413_v4 = vadd.f32 %v412_v0, %v411_v63 }
  0xca   : > { %v414_v7 = vrot.slane %v413_v4, 2 }
  0xcc   : > { %v415_v9 = vadd.f32 %v414_v7, %v413_v4 }
  0xce   : > { %v416_v11 = vrot.slane %v415_v9, 1 }
  0xd0   : > { %v417_v12 = vadd.f32 %v416_v11, %v415_v9 }
  0xd2   : > { %v432_v2 = vpop.xlane.xlu0 %431  ;;  %1086 = vpush %v417_v12 }
  0xd3   : > { %v433_v5 = vrot.slane %v432_v2, 4 }
  0xd5   : > { %v434_v8 = vadd.f32 %v433_v5, %v432_v2 }
  0xd7   : > { %v435_v10 = vrot.slane %v434_v8, 2 }
  0xd9   : > { %v436_v13 = vadd.f32 %v435_v10, %v434_v8 }
  0xdb   : > { %v437_v14 = vrot.slane %v436_v13, 1 }
  0xdd   : > { %v438_v15 = vadd.f32 %v437_v14, %v436_v13 }
  0xdf   : > { %1088 = vpush %v438_v15 }
 0x103   : > { %s1087_s20 = spop %1086 }
 0x104   : > { %v419_v17 = vstv %s1087_s20 }
 0x105   : > { %v420_v18 = vadd.f32 %v419_v17, %v401_v16 }
 0x107   : > { %422 = vst.msk [vmem:[%s369_s13] sm:$0x1] %vm383_vm1, %v420_v18 }
 0x110   : > { %s1089_s28 = spop %1088 }
 0x111   : > { %v440_v20 = vstv %s1089_s28 }
 0x112   : > { %v441_v21 = vadd.f32 %v440_v20, %v423_v19 }
 0x114   : > { %442 = vst.msk [vmem:[%s372_s16] sm:$0x1] %vm383_vm1, %v441_v21 }
 0x151   : > { %v1071_v29 = vpop.f32.mrf.mxu0 }
 0x152   : > { %v1078_v31 = vpop.f32.mrf.mxu1  ;;  %v559_v33 = vadd.f32 %v1071_v29, %v444_v27 }
 0x153   : > { %v678_v34 = vadd.f32 %v1078_v31, %v563_v28  ;;  %v549_v35 = vpop.f32.mrf.mxu0 }
 0x154   : > { %v668_v36 = vpop.f32.mrf.mxu1  ;;  %561 = vst.msk [vmem:[#allocation2 + $0x8] sm:$0xff] %vm388_vm0, %v559_v33  ;;  %v558_v37 = vadd.f32 %v549_v35, %v443_v30  ;;  %v805_v35 = vld [vmem:[%s1257_s19] sm:$0x1] }
 0x155   : > { %680 = vst.msk [vmem:[#allocation3 + $0x8] sm:$0xff] %vm388_vm0, %v678_v34  ;;  %v677_v38 = vadd.f32 %v668_v36, %v562_v32 }
 0x156   : > { %560 = vst.msk [vmem:[#allocation2] sm:$0xff] %vm388_vm0, %v558_v37 }
 0x157   : > { %679 = vst.msk [vmem:[#allocation3] sm:$0xff] %vm388_vm0, %v677_v38  ;;  %v827_v38 = vld [vmem:[%s1267_s27] sm:$0x1] }
 0x159   : > { %v1085_v40 = vpop.f32.mrf.mxu0 }
 0x15a   : > { %v797_v42 = vadd.f32 %v1085_v40, %v682_v39 }
 0x15b   : > { %v787_v43 = vpop.f32.mrf.mxu0  ;;  %v829_v48 = vld [vmem:[#allocation2 + $0x8] sm:$0xff] }
 0x15c   : > { %799 = vst.msk [vmem:[#allocation4 + $0x8] sm:$0xff] %vm388_vm0, %v797_v42  ;;  %v796_v44 = vadd.f32 %v787_v43, %v681_v41  ;;  %v807_v45 = vld [vmem:[#allocation3 + $0x8] sm:$0xff] }
 0x15d   : > { %v828_v51 = vld [vmem:[#allocation2] sm:$0xff] }
 0x15e   : > { %798 = vst.msk [vmem:[#allocation4] sm:$0xff] %vm388_vm0, %v796_v44  ;;  %v806_v50 = vld [vmem:[#allocation3] sm:$0xff] }
 0x163   : > { %v804_v46 = vld [vmem:[#allocation4 + $0x8] sm:$0xff] }
 0x164   : > { %v809_v47 = vsub.f32 %v807_v45, %v804_v46  ;;  %v831_v55 = vsub.f32 %v829_v48, %v804_v46 }
 0x165   : > { %v803_v49 = vld [vmem:[#allocation4] sm:$0xff] }
 0x166   : > { %v808_v52 = vsub.f32 %v806_v50, %v803_v49  ;;  %v811_v53 = vand.u32 2147483647, %v809_v47  ;;  %v830_v54 = vsub.f32 %v828_v51, %v803_v49  ;;  %v833_v60 = vand.u32 2147483647, %v831_v55 }
 0x168   : > { %v810_v56 = vand.u32 2147483647, %v808_v52  ;;  %v832_v57 = vand.u32 2147483647, %v830_v54  ;;  %v813_v59 = vsel %vm388_vm0, %v811_v53, 0.0  ;;  %v835_v1 = vsel %vm388_vm0, %v833_v60, 0.0 }
 0x16a   : > { %v812_v58 = vsel %vm388_vm0, %v810_v56, 0.0  ;;  %v834_v62 = vsel %vm388_vm0, %v832_v57, 0.0 }
 0x16b   : > { %v814_v61 = vadd.f32 %v813_v59, %v812_v58  ;;  %v836_v3 = vadd.f32 %v835_v1, %v834_v62 }
 0x16d   : > { %815 = vadd.xlane.f32.xlu1 %v814_v61 }
 0x171   : > { %837 = vadd.xlane.f32.xlu1 %v836_v3 }
 0x1f6   : > { %v816_v22 = vpop.xlane.xlu1 %815 }
 0x1f7   : > { %v817_v23 = vrot.slane %v816_v22, 4 }
 0x1f9   : > { %v818_v24 = vadd.f32 %v817_v23, %v816_v22 }
 0x1fa   : > { %v838_v25 = vpop.xlane.xlu1 %837 }
 0x1fb   : > { %v819_v26 = vrot.slane %v818_v24, 2  ;;  %v839_v27 = vrot.slane %v838_v25, 4 }
 0x1fd   : > { %v840_v28 = vadd.f32 %v839_v27, %v838_v25  ;;  %v820_v29 = vadd.f32 %v819_v26, %v818_v24 }
 0x1ff   : > { %v841_v30 = vrot.slane %v840_v28, 2  ;;  %v821_v31 = vrot.slane %v820_v29, 1 }
 0x201   : > { %v842_v32 = vadd.f32 %v841_v30, %v840_v28  ;;  %v822_v6 = vadd.f32 %v821_v31, %v820_v29 }
 0x203   : > { %1090 = vpush %v822_v6  ;;  %v843_v33 = vrot.slane %v842_v32, 1 }
 0x205   : > { %v844_v34 = vadd.f32 %v843_v33, %v842_v32 }
 0x207   : > { %1092 = vpush %v844_v34 }
 0x234   : > { %s1091_s21 = spop %1090 }
 0x235   : > { %v824_v36 = vstv %s1091_s21 }
 0x236   : > { %v825_v37 = vadd.f32 %v824_v36, %v805_v35 }
 0x238   : > { %826 = vst.msk [vmem:[%s1257_s19] sm:$0x1] %vm383_vm1, %v825_v37  ;;  %s1093_s29 = spop %1092 }
 0x239   : > { %v846_v39 = vstv %s1093_s29 }
 0x23a   : > { %v847_v40 = vadd.f32 %v846_v39, %v827_v38 }
 0x23c   : > { %848 = vst.msk [vmem:[%s1267_s27] sm:$0x1] %vm383_vm1, %v847_v40 }
 0x23d PF: > { %s17_s23 = sadd.s32 1, %s1141_s23   ;;  %s1295_s21 = smov %s1137_s22 }
 0x23e   : > { %p14_p5 = scmp.ge.s32.totalorder %s17_s23, 4   ;;  %s1296_s22 = smov %s1298_s24 }
 0x240   :  { %16 = sbr.rel (!%p14_p5) target bundleno = 2 (0x2), region = 112 }

// kernel: loss_with_gan_ste_forward.18
= control target key start
LH: loop header
LB: loop body
LE: loop exit
PB: predicated region body
PF: predicated region fallthrough
CT: control target
= control target key end

     0   :  { %s295_s1 = inlined_call_operand.vmem [shape: f32[256,128], index: 1, kind: input, shape index: {}]   ;;  %s296_s0 = inlined_call_operand.vmem [shape: f32[6,256], index: 0, kind: input, shape index: {}]   ;;  %s297_s2 = inlined_call_operand.vmem [shape: f32[1,128], index: 2, kind: input, shape index: {}]   ;;  %s298_s3 = inlined_call_operand.vmem [shape: f32[6,128], index: 3, kind: output, shape index: {}]  }
   0x1   :  { %v47_v0 = vld [vmem:[%s295_s1 + $0xf8] sm:$0xff]  ;;  %v46_v2 = vld [vmem:[%s295_s1 + $0xf0] sm:$0xff]  ;;  %v45_v4 = vld [vmem:[%s295_s1 + $0xe8] sm:$0xff] }
   0x2   :  { %v31_v1 = vld [vmem:[%s295_s1 + $0x78] sm:$0xff]  ;;  %132 = vmatprep.subr.mxu0 %v47_v0  ;;  %v30_v3 = vld [vmem:[%s295_s1 + $0x70] sm:$0xff]  ;;  %v29_v5 = vld [vmem:[%s295_s1 + $0x68] sm:$0xff] }
   0x3   :  { %133 = vmatpush3.msra.mxu0 %v31_v1  ;;  %v44_v6 = vld [vmem:[%s295_s1 + $0xe0] sm:$0xff]  ;;  %v43_v8 = vld [vmem:[%s295_s1 + $0xd8] sm:$0xff]  ;;  %v42_v10 = vld [vmem:[%s295_s1 + $0xd0] sm:$0xff] }
   0x4   :  { %134 = vmatprep.subr.mxu0 %v46_v2  ;;  %v28_v7 = vld [vmem:[%s295_s1 + $0x60] sm:$0xff]  ;;  %v27_v9 = vld [vmem:[%s295_s1 + $0x58] sm:$0xff]  ;;  %v26_v11 = vld [vmem:[%s295_s1 + $0x50] sm:$0xff] }
   0x5   :  { %135 = vmatpush3.msra.mxu0 %v30_v3  ;;  %v41_v12 = vld [vmem:[%s295_s1 + $0xc8] sm:$0xff]  ;;  %v40_v15 = vld [vmem:[%s295_s1 + $0xc0] sm:$0xff]  ;;  %v39_v17 = vld [vmem:[%s295_s1 + $0xb8] sm:$0xff] }
   0x6   :  { %136 = vmatprep.subr.mxu0 %v45_v4  ;;  %v15_v13 = vld [vmem:[%s296_s0 + $0x8] sm:$0x3f]  ;;  %v24_v16 = vld [vmem:[%s295_s1 + $0x40] sm:$0xff]  ;;  %v23_v18 = vld [vmem:[%s295_s1 + $0x38] sm:$0xff] }
   0x7   :  { %137 = vmatpush3.msra.mxu0 %v29_v5  ;;  %v25_v14 = vld [vmem:[%s295_s1 + $0x48] sm:$0xff]  ;;  %119 = vmatprep.mubr.f32.mxu0 %v15_v13  ;;  %v38_v19 = vld [vmem:[%s295_s1 + $0xb0] sm:$0xff]  ;;  %v36_v23 = vld [vmem:[%s295_s1 + $0xa0] sm:$0xff] }
   0x8   :  { %138 = vmatprep.subr.mxu0 %v44_v6  ;;  %v22_v20 = vld [vmem:[%s295_s1 + $0x30] sm:$0xff]  ;;  %v37_v21 = vld [vmem:[%s295_s1 + $0xa8] sm:$0xff]  ;;  %v20_v24 = vld [vmem:[%s295_s1 + $0x20] sm:$0xff] }
   0x9   :  { %139 = vmatpush3.msra.mxu0 %v28_v7  ;;  %v21_v22 = vld [vmem:[%s295_s1 + $0x28] sm:$0xff]  ;;  %v35_v25 = vld [vmem:[%s295_s1 + $0x98] sm:$0xff]  ;;  %v34_v27 = vld [vmem:[%s295_s1 + $0x90] sm:$0xff] }
   0xa   :  { %140 = vmatprep.subr.mxu0 %v43_v8  ;;  %v19_v26 = vld [vmem:[%s295_s1 + $0x18] sm:$0xff]  ;;  %v18_v28 = vld [vmem:[%s295_s1 + $0x10] sm:$0xff]  ;;  %v33_v29 = vld [vmem:[%s295_s1 + $0x88] sm:$0xff] }
   0xb   :  { %141 = vmatpush3.msra.mxu0 %v27_v9  ;;  %v17_v30 = vld [vmem:[%s295_s1 + $0x8] sm:$0xff]  ;;  %v32_v31 = vld [vmem:[%s295_s1 + $0x80] sm:$0xff] }
   0xc   :  { %142 = vmatprep.subr.mxu0 %v42_v10  ;;  %v16_v32 = vld [vmem:[%s295_s1] sm:$0xff] }
   0xd   :  { %143 = vmatpush3.msra.mxu0 %v26_v11  ;;  %v14_v33 = vld [vmem:[%s296_s0] sm:$0x3f] }
   0xe   :  { %144 = vmatprep.subr.mxu0 %v41_v12  ;;  %v131_v35 = vld [vmem:[%s297_s2] ss:$0 sm:$0xff] }
   0xf   :  { %145 = vmatpush3.msra.mxu0 %v25_v14 }
  0x10   :  { %146 = vmatprep.subr.mxu0 %v40_v15 }
  0x11   :  { %147 = vmatpush3.msra.mxu0 %v24_v16 }
  0x12   :  { %148 = vmatprep.subr.mxu0 %v39_v17 }
  0x13   :  { %149 = vmatpush3.msra.mxu0 %v23_v18 }
  0x14   :  { %150 = vmatprep.subr.mxu0 %v38_v19 }
  0x15   :  { %151 = vmatpush3.msra.mxu0 %v22_v20 }
  0x16   :  { %152 = vmatprep.subr.mxu0 %v37_v21 }
  0x17   :  { %153 = vmatpush3.msra.mxu0 %v21_v22 }
  0x18   :  { %154 = vmatprep.subr.mxu0 %v36_v23 }
  0x19   :  { %155 = vmatpush3.msra.mxu0 %v20_v24 }
  0x1a   :  { %156 = vmatprep.subr.mxu0 %v35_v25 }
  0x1b   :  { %157 = vmatpush3.msra.mxu0 %v19_v26 }
  0x1c   :  { %158 = vmatprep.subr.mxu0 %v34_v27 }
  0x1d   :  { %159 = vmatpush3.msra.mxu0 %v18_v28 }
  0x1e   :  { %160 = vmatprep.subr.mxu0 %v33_v29 }
  0x1f   :  { %161 = vmatpush3.msra.mxu0 %v17_v30 }
  0x20   :  { %162 = vmatprep.subr.mxu0 %v32_v31 }
  0x21   :  { %163 = vmatpush3.msra.mxu0 %v16_v32 }
  0x22   :  { %120 = vmatmul.mubr.f32.vlgmr.msra.gmra.mxu0 %v14_v33 }
  0xe2   :  { %v164_v34 = vpop.f32.mrf.mxu0 }
  0xe4   :  { %v165_v36 = vpop.f32.mrf.mxu0 }
  0xe5   :  { %v166_v37 = vadd.f32 %v165_v36, %v164_v34 }
  0xe7   :  { %v122_v38 = vadd.f32 %v166_v37, %v131_v35 }
  0xe9   :  { %v125_v39 = vmax.f32 %v122_v38, 0.0 }
  0xeb   :  { %126 = vst [vmem:[%s298_s3] sm:$0x3f] %v125_v39 }

// kernel: loss_with_gan_ste_forward.21
= control target key start
LH: loop header
LB: loop body
LE: loop exit
PB: predicated region body
PF: predicated region fallthrough
CT: control target
= control target key end

     0   :  { %s1250_s21 = smov 0   ;;  %s1252_s22 = smov 0   ;;  %s1391_s0 = inlined_call_operand.vmem [shape: f32[3,2,4,32], index: 0, kind: input, shape index: {}, may-alias: {0,1,2}]   ;;  %s1392_s1 = inlined_call_operand.vmem [shape: f32[3,2,4,32], index: 1, kind: input, shape index: {}, may-alias: {0,1,2}]   ;;  %s1393_s2 = inlined_call_operand.vmem [shape: f32[3,2,4,32], index: 2, kind: input, shape index: {}, may-alias: {0,1,2}]   ;;  %s1394_s3 = inlined_call_operand.vmem [shape: f32[2,1,1], index: 3, kind: output, shape index: {0}]   ;;  %s1395_s4 = inlined_call_operand.vmem [shape: f32[2,1,1], index: 4, kind: output, shape index: {1}]   ;;  %s1396_s5 = inlined_call_operand.vmem [shape: f32[2,1,1], index: 5, kind: output, shape index: {2}]   ;;  %s1397_s6 = inlined_call_operand.vmem [shape: f32[2,1,1], index: 6, kind: output, shape index: {3}]  }
   0x1   :  { %s1254_s23 = smov 0  }
   0x2 LB: > { %s29_s24 = sadd.s32 1, %s1208_s22  ;;  %p1093_p0 = scmp.ge.s32.totalorder %s1212_s23, 1  ;;  %s1212_s23 = sphi %s1254_s23, %s17_s23   ;;  %s1208_s22 = sphi %s1252_s22, %s1399_s22   ;;  %s1204_s21 = sphi %s1250_s21, %s1398_s21  }
   0x3   : > { %p31_p1 = scmp.ge.s32.totalorder %s29_s24, 2  ;;  %p265_p2 = scmp.lt.s32.totalorder %s1212_s23, 3 }
   0x5   : > { %s1401_s24 = smov (%p31_p1, %s29_s24), 0  ;;  %p266_p3 = pnand %p1093_p0, %p265_p2 }
   0x6   : > { %p320_p4 = scmp.lt.s32.totalorder (!%p266_p3), %s1204_s21, 1 }
   0x7   : > { %269 = sbr.rel (%p266_p3) target bundleno = 591 (0x24f), region = 32 }
   0xc   : > { %s1403_s21 = smov (!%p320_p4, %s1204_s21), 1  ;;  %vm463_vm0 = vcmask 1043456   ;;  %vm364_vm1 = vcmask 261120   ;;  %v1214_v3 = vmov 0.0   ;;  %vm450_vm2 = vcmask 31744  }
   0xd   : > { %s1094_s25 = sshll.u32 %s1403_s21, 2  ;;  %366 = vst.msk [vmem:[#allocation2 + $0x8] sm:$0xff] %vm364_vm1, %v1214_v3  ;;  %365 = vst.msk [vmem:[#allocation2] sm:$0xff] %vm364_vm1, %v1214_v3  ;;  %vm383_vm3 = vcmask 257024   ;;  %s345_s13 = scalar_lea.vmem %s1394_s3, %s1403_s21  ;;  %vm359_vm4 = vcmask 0  }
   0xe   : > { %s1008_s28 = scalar_lea.vmem %s1393_s2, %s1094_s25  ;;  %s326_s7 = scalar_lea.vmem %s1391_s0, %s1094_s25  ;;  %367 = vst.msk [vmem:[#allocation2 + $0x10] sm:$0xff] %vm364_vm1, %v1214_v3  ;;  %368 = vst.msk [vmem:[#allocation2 + $0x18] sm:$0xff] %vm364_vm1, %v1214_v3 }
   0xf   : > { %v1098_v0 = vld [vmem:[%s1008_s28 + $0x10] sm:$0xf]  ;;  %v377_v1 = vld [vmem:[%s326_s7] sm:$0xf]  ;;  %s1004_s10 = scalar_lea.vmem %s1392_s1, %s1094_s25  ;;  %369 = vst.msk [vmem:[#allocation3] sm:$0xff] %vm364_vm1, %v1214_v3  ;;  %370 = vst.msk [vmem:[#allocation3 + $0x8] sm:$0xff] %vm364_vm1, %v1214_v3  ;;  %s348_s16 = scalar_lea.vmem %s1395_s4, %s1403_s21 }
  0x10   : > { %709 = vxpose.xlu1.b32.start.end [1/1] (short) (narrow) %v1098_v0, 32  ;;  %418 = vxpose.xlu0.b32.start.end [1/1] (short) (narrow) %v377_v1, 32  ;;  %v1097_v2 = vld [vmem:[%s1004_s10 + $0x8] sm:$0xf]  ;;  %371 = vst.msk [vmem:[#allocation3 + $0x10] sm:$0xff] %vm364_vm1, %v1214_v3  ;;  %372 = vst.msk [vmem:[#allocation3 + $0x18] sm:$0xff] %vm364_vm1, %v1214_v3  ;;  %v399_v17 = vsub.f32 %v377_v1, %v1098_v0  ;;  %s1360_s19 = scalar_lea.vmem %s1396_s5, %s1403_s21  ;;  %s1370_s27 = scalar_lea.vmem %s1397_s6, %s1403_s21 }
  0x11   : > { %1131 = vmatprep.subr.msk.mxu0 %vm463_vm0, %v377_v1  ;;  %1155 = vmatprep.subr.msk.mxu1 %vm463_vm0, %v377_v1  ;;  %373 = vst.msk [vmem:[#allocation4] sm:$0xff] %vm364_vm1, %v1214_v3  ;;  %374 = vst.msk [vmem:[#allocation4 + $0x8] sm:$0xff] %vm364_vm1, %v1214_v3  ;;  %v381_v16 = vsub.f32 %v1097_v2, %v1098_v0 }
  0x12   : > { %1132 = vmatpush3.msk.msra.mxu0 %vm463_vm0, %v377_v1  ;;  %1156 = vmatpush3.msk.msra.mxu1 %vm463_vm0, %v377_v1  ;;  %375 = vst.msk [vmem:[#allocation4 + $0x10] sm:$0xff] %vm364_vm1, %v1214_v3  ;;  %376 = vst.msk [vmem:[#allocation4 + $0x18] sm:$0xff] %vm364_vm1, %v1214_v3  ;;  %v400_v19 = vand.u32 2147483647, %v399_v17 }
  0x13   : > { %1147 = vmatprep.subr.msk.mxu0 %vm463_vm0, %v1098_v0  ;;  %1139 = vmatprep.subr.msk.mxu1 %vm463_vm0, %v1097_v2  ;;  %v382_v18 = vand.u32 2147483647, %v381_v16  ;;  %360 = vst.msk [vmem:[%s345_s13] sm:$0x1] %vm359_vm4, %v1214_v3  ;;  %361 = vst.msk [vmem:[%s348_s16] sm:$0x1] %vm359_vm4, %v1214_v3 }
  0x14   : > { %v401_v21 = vsel %vm383_vm3, %v400_v19, 0.0  ;;  %v415_v22 = vld [vmem:[#allocation2 + $0x8] sm:$0xff]  ;;  %v414_v24 = vld [vmem:[#allocation2] sm:$0xff]  ;;  %362 = vst.msk [vmem:[%s1360_s19] sm:$0x1] %vm359_vm4, %v1214_v3 }
  0x15   : > { %v384_v20 = vsel %vm383_vm3, %v382_v18, 0.0  ;;  %v417_v33 = vld [vmem:[#allocation2 + $0x18] sm:$0xff]  ;;  %v416_v38 = vld [vmem:[#allocation2 + $0x10] sm:$0xff]  ;;  %363 = vst.msk [vmem:[%s1370_s27] sm:$0x1] %vm359_vm4, %v1214_v3 }
  0x16   : > { %v562_v46 = vld [vmem:[#allocation3 + $0x8] sm:$0xff]  ;;  %v561_v48 = vld [vmem:[#allocation3] sm:$0xff] }
  0x17   : > { %v564_v52 = vld [vmem:[#allocation3 + $0x18] sm:$0xff]  ;;  %v563_v54 = vld [vmem:[#allocation3 + $0x10] sm:$0xff] }
  0x18   : > { %v706_v27 = vld [vmem:[#allocation4 + $0x8] sm:$0xff]  ;;  %v705_v30 = vld [vmem:[#allocation4] sm:$0xff] }
  0x19   : > { %v708_v34 = vld [vmem:[#allocation4 + $0x18] sm:$0xff]  ;;  %v707_v39 = vld [vmem:[#allocation4 + $0x10] sm:$0xff] }
  0x1d   : > { %565 = vxpose.xlu0.b32.start.end [1/1] (short) (narrow) %v1097_v2, 32 }
  0x43   : > { %385 = vadd.xlane.f32.xlu1 %v384_v20 }
  0x56   : > { %402 = vadd.xlane.f32.xlu0 %v401_v21 }
  0x8c   : > { %v725_v4 = vpop.trf.xlu1  ;;  %v434_v5 = vpop.trf.xlu0 }
  0x8d   : > { %1133 = vmatprep.mubr.msk.f32.mxu0 %vm450_vm2, %v434_v5 }
  0x90   : > { %v726_v6 = vpop.trf.xlu1  ;;  %v435_v7 = vpop.trf.xlu0 }
  0x91   : > { %1134 = vmatmul.mubr.msk.f32.vlgmr.msra.gmra.mxu0 %vm450_vm2, %v435_v7 }
  0x92   : > { %1148 = vmatpush3.msk.msra.mxu0 %vm463_vm0, %v1098_v0  ;;  %1149 = vmatprep.mubr.msk.f32.mxu0 %vm450_vm2, %v725_v4 }
  0x94   : > { %v727_v8 = vpop.trf.xlu1  ;;  %v436_v9 = vpop.trf.xlu0 }
  0x95   : > { %1136 = vmatprep.mubr.msk.f32.mxu1 %vm450_vm2, %v436_v9  ;;  %1150 = vmatmul.mubr.msk.f32.vlgmr.msra.gmra.mxu0 %vm450_vm2, %v726_v6 }
  0x96   : > { %1152 = vmatprep.mubr.msk.f32.mxu0 %vm450_vm2, %v727_v8 }
  0x98   : > { %v728_v10 = vpop.trf.xlu1  ;;  %v437_v11 = vpop.trf.xlu0 }
  0x99   : > { %1137 = vmatmul.mubr.msk.f32.vlgmr.msra.gmra.mxu1 %vm450_vm2, %v437_v11  ;;  %1153 = vmatmul.mubr.msk.f32.gmra.mxu0 %vm450_vm2, %v728_v10 }
  0x9a   : > { %1140 = vmatpush3.msk.msra.mxu1 %vm463_vm0, %v1097_v2 }
  0x9c   : > { %v581_v12 = vpop.trf.xlu0 }
  0x9d   : > { %1141 = vmatprep.mubr.msk.f32.mxu1 %vm450_vm2, %v581_v12 }
  0xa0   : > { %v582_v13 = vpop.trf.xlu0 }
  0xa1   : > { %1142 = vmatmul.mubr.msk.f32.vlgmr.msra.gmra.mxu1 %vm450_vm2, %v582_v13 }
  0xa4   : > { %v583_v14 = vpop.trf.xlu0 }
  0xa5   : > { %1144 = vmatprep.mubr.msk.f32.mxu1 %vm450_vm2, %v583_v14 }
  0xa8   : > { %v584_v15 = vpop.trf.xlu0 }
  0xa9   : > { %1145 = vmatmul.mubr.msk.f32.gmra.mxu1 %vm450_vm2, %v584_v15 }
 0x151   : > { %v1135_v23 = vpop.f32.mrf.mxu0 }
 0x152   : > { %v553_v25 = vadd.f32 %v1135_v23, %v415_v22 }
 0x153   : > { %v533_v26 = vpop.f32.mrf.mxu0 }
 0x154   : > { %558 = vst.msk [vmem:[#allocation2 + $0x8] sm:$0xff] %vm364_vm1, %v553_v25  ;;  %v552_v28 = vadd.f32 %v533_v26, %v414_v24 }
 0x155   : > { %v1151_v29 = vpop.f32.mrf.mxu0 }
 0x156   : > { %557 = vst.msk [vmem:[#allocation2] sm:$0xff] %vm364_vm1, %v552_v28  ;;  %v842_v31 = vadd.f32 %v1151_v29, %v706_v27 }
 0x157   : > { %v822_v32 = vpop.f32.mrf.mxu0 }
 0x158   : > { %846 = vst.msk [vmem:[#allocation4 + $0x8] sm:$0xff] %vm364_vm1, %v842_v31  ;;  %v841_v35 = vadd.f32 %v822_v32, %v705_v30 }
 0x159   : > { %v1138_v36 = vpop.f32.mrf.mxu1  ;;  %v1154_v37 = vpop.f32.mrf.mxu0 }
 0x15a   : > { %845 = vst.msk [vmem:[#allocation4] sm:$0xff] %vm364_vm1, %v841_v35  ;;  %v555_v40 = vadd.f32 %v1138_v36, %v417_v33  ;;  %v844_v41 = vadd.f32 %v1154_v37, %v708_v34  ;;  %v386_v33 = vpop.xlane.xlu1 %385  ;;  %v403_v34 = vpop.xlane.xlu0 %402 }
 0x15b   : > { %v543_v42 = vpop.f32.mrf.mxu1  ;;  %v832_v43 = vpop.f32.mrf.mxu0  ;;  %v890_v5 = vld [vmem:[#allocation2 + $0x8] sm:$0xff]  ;;  %v387_v37 = vrot.slane %v386_v33, 4 }
 0x15c   : > { %560 = vst.msk [vmem:[#allocation2 + $0x18] sm:$0xff] %vm364_vm1, %v555_v40  ;;  %848 = vst.msk [vmem:[#allocation4 + $0x18] sm:$0xff] %vm364_vm1, %v844_v41  ;;  %v554_v44 = vadd.f32 %v543_v42, %v416_v38  ;;  %v843_v45 = vadd.f32 %v832_v43, %v707_v39  ;;  %v404_v39 = vrot.slane %v403_v34, 4 }
 0x15d   : > { %v889_v62 = vld [vmem:[#allocation2] sm:$0xff]  ;;  %v388_v38 = vadd.f32 %v387_v37, %v386_v33 }
 0x15e   : > { %559 = vst.msk [vmem:[#allocation2 + $0x10] sm:$0xff] %vm364_vm1, %v554_v44  ;;  %847 = vst.msk [vmem:[#allocation4 + $0x10] sm:$0xff] %vm364_vm1, %v843_v45  ;;  %v405_v43 = vadd.f32 %v404_v39, %v403_v34 }
 0x15f   : > { %v853_v63 = vld [vmem:[#allocation4 + $0x8] sm:$0xff]  ;;  %v389_v42 = vrot.slane %v388_v38, 2 }
 0x160   : > { %v894_v7 = vsub.f32 %v890_v5, %v853_v63  ;;  %v406_v45 = vrot.slane %v405_v43, 2 }
 0x161   : > { %v1143_v47 = vpop.f32.mrf.mxu1  ;;  %v852_v58 = vld [vmem:[#allocation4] sm:$0xff]  ;;  %v390_v44 = vadd.f32 %v389_v42, %v388_v38 }
 0x162   : > { %v698_v49 = vadd.f32 %v1143_v47, %v562_v46  ;;  %v893_v4 = vsub.f32 %v889_v62, %v852_v58  ;;  %v898_v18 = vand.u32 2147483647, %v894_v7  ;;  %v856_v7 = vld [vmem:[%s1360_s19] sm:$0x1] }
 0x163   : > { %v678_v50 = vpop.f32.mrf.mxu1  ;;  %v855_v9 = vld [vmem:[#allocation4 + $0x18] sm:$0xff]  ;;  %v391_v46 = vrot.slane %v390_v44, 1 }
 0x164   : > { %702 = vst.msk [vmem:[#allocation3 + $0x8] sm:$0xff] %vm364_vm1, %v698_v49  ;;  %v697_v51 = vadd.f32 %v678_v50, %v561_v48  ;;  %v892_v13 = vld [vmem:[#allocation2 + $0x18] sm:$0xff]  ;;  %v897_v14 = vand.u32 2147483647, %v893_v4  ;;  %v902_v27 = vsel %vm364_vm1, %v898_v18, 0.0  ;;  %v407_v48 = vadd.f32 %v406_v45, %v405_v43 }
 0x165   : > { %v854_v0 = vld [vmem:[#allocation4 + $0x10] sm:$0xff]  ;;  %v896_v20 = vsub.f32 %v892_v13, %v855_v9  ;;  %v392_v47 = vadd.f32 %v391_v46, %v390_v44 }
 0x166   : > { %701 = vst.msk [vmem:[#allocation3] sm:$0xff] %vm364_vm1, %v697_v51  ;;  %v891_v1 = vld [vmem:[#allocation2 + $0x10] sm:$0xff]  ;;  %v901_v24 = vsel %vm364_vm1, %v897_v14, 0.0  ;;  %v408_v49 = vrot.slane %v407_v48, 1  ;;  %v380_v51 = vld [vmem:[%s345_s13] sm:$0x1] }
 0x167   : > { %v895_v8 = vsub.f32 %v891_v1, %v854_v0  ;;  %v903_v30 = vadd.f32 %v902_v27, %v901_v24  ;;  %v900_v32 = vand.u32 2147483647, %v896_v20  ;;  %1157 = vpush %v392_v47 }
 0x168   : > { %v409_v50 = vadd.f32 %v408_v49, %v407_v48 }
 0x169   : > { %v1146_v53 = vpop.f32.mrf.mxu1  ;;  %v899_v19 = vand.u32 2147483647, %v895_v8  ;;  %v906_v40 = vsel %vm364_vm1, %v900_v32, 0.0 }
 0x16a   : > { %v700_v55 = vadd.f32 %v1146_v53, %v564_v52  ;;  %1159 = vpush %v409_v50 }
 0x16b   : > { %v688_v56 = vpop.f32.mrf.mxu1  ;;  %v858_v60 = vld [vmem:[#allocation3 + $0x8] sm:$0xff]  ;;  %v904_v28 = vsel %vm364_vm1, %v899_v19, 0.0 }
 0x16c   : > { %704 = vst.msk [vmem:[#allocation3 + $0x18] sm:$0xff] %vm364_vm1, %v700_v55  ;;  %v699_v57 = vadd.f32 %v688_v56, %v563_v54  ;;  %v862_v2 = vsub.f32 %v858_v60, %v853_v63  ;;  %v905_v36 = vadd.f32 %v904_v28, %v903_v30  ;;  %v398_v54 = vld [vmem:[%s348_s16] sm:$0x1] }
 0x16d   : > { %v857_v59 = vld [vmem:[#allocation3] sm:$0xff] }
 0x16e   : > { %703 = vst.msk [vmem:[#allocation3 + $0x10] sm:$0xff] %vm364_vm1, %v699_v57  ;;  %v861_v61 = vsub.f32 %v857_v59, %v852_v58  ;;  %v866_v12 = vand.u32 2147483647, %v862_v2  ;;  %v907_v41 = vadd.f32 %v906_v40, %v905_v36 }
 0x170   : > { %v865_v6 = vand.u32 2147483647, %v861_v61  ;;  %v870_v23 = vsel %vm364_vm1, %v866_v12, 0.0 }
 0x172   : > { %v869_v17 = vsel %vm364_vm1, %v865_v6, 0.0 }
 0x173   : > { %v860_v10 = vld [vmem:[#allocation3 + $0x18] sm:$0xff]  ;;  %v871_v25 = vadd.f32 %v870_v23, %v869_v17 }
 0x174   : > { %v864_v11 = vsub.f32 %v860_v10, %v855_v9  ;;  %v888_v10 = vld [vmem:[%s1370_s27] sm:$0x1] }
 0x175   : > { %v859_v15 = vld [vmem:[#allocation3 + $0x10] sm:$0xff] }
 0x176   : > { %v863_v16 = vsub.f32 %v859_v15, %v854_v0  ;;  %v868_v22 = vand.u32 2147483647, %v864_v11 }
 0x178   : > { %v867_v21 = vand.u32 2147483647, %v863_v16  ;;  %v874_v31 = vsel %vm364_vm1, %v868_v22, 0.0 }
 0x17a   : > { %v872_v26 = vsel %vm364_vm1, %v867_v21, 0.0 }
 0x17b   : > { %v873_v29 = vadd.f32 %v872_v26, %v871_v25 }
 0x17d   : > { %v875_v35 = vadd.f32 %v874_v31, %v873_v29 }
 0x17f   : > { %876 = vadd.xlane.f32.xlu1 %v875_v35 }
 0x183   : > { %908 = vadd.xlane.f32.xlu1 %v907_v41 }
 0x198   : > { %s1158_s20 = spop %1157 }
 0x199   : > { %v394_v52 = vstv %s1158_s20 }
 0x19a   : > { %v395_v53 = vadd.f32 %v394_v52, %v380_v51 }
 0x19b   : > { %s1160_s28 = spop %1159 }
 0x19c   : > { %397 = vst.msk [vmem:[%s345_s13] sm:$0x1] %vm359_vm4, %v395_v53  ;;  %v411_v55 = vstv %s1160_s28 }
 0x19d   : > { %v412_v56 = vadd.f32 %v411_v55, %v398_v54 }
 0x19f   : > { %413 = vst.msk [vmem:[%s348_s16] sm:$0x1] %vm359_vm4, %v412_v56 }
 0x208   : > { %v877_v57 = vpop.xlane.xlu1 %876 }
 0x209   : > { %v878_v58 = vrot.slane %v877_v57, 4 }
 0x20b   : > { %v879_v59 = vadd.f32 %v878_v58, %v877_v57 }
 0x20c   : > { %v909_v60 = vpop.xlane.xlu1 %908 }
 0x20d   : > { %v880_v61 = vrot.slane %v879_v59, 2  ;;  %v910_v62 = vrot.slane %v909_v60, 4 }
 0x20f   : > { %v911_v63 = vadd.f32 %v910_v62, %v909_v60  ;;  %v881_v0 = vadd.f32 %v880_v61, %v879_v59 }
 0x211   : > { %v912_v1 = vrot.slane %v911_v63, 2  ;;  %v882_v2 = vrot.slane %v881_v0, 1 }
 0x213   : > { %v913_v4 = vadd.f32 %v912_v1, %v911_v63  ;;  %v883_v3 = vadd.f32 %v882_v2, %v881_v0 }
 0x215   : > { %1161 = vpush %v883_v3  ;;  %v914_v5 = vrot.slane %v913_v4, 1 }
 0x217   : > { %v915_v6 = vadd.f32 %v914_v5, %v913_v4 }
 0x219   : > { %1163 = vpush %v915_v6 }
 0x246   : > { %s1162_s21 = spop %1161 }
 0x247   : > { %v885_v8 = vstv %s1162_s21 }
 0x248   : > { %v886_v9 = vadd.f32 %v885_v8, %v856_v7 }
 0x24a   : > { %887 = vst.msk [vmem:[%s1360_s19] sm:$0x1] %vm359_vm4, %v886_v9  ;;  %s1164_s29 = spop %1163 }
 0x24b   : > { %v917_v11 = vstv %s1164_s29 }
 0x24c   : > { %v918_v12 = vadd.f32 %v917_v11, %v888_v10 }
 0x24e   : > { %919 = vst.msk [vmem:[%s1370_s27] sm:$0x1] %vm359_vm4, %v918_v12 }
 0x24f PF: > { %s17_s23 = sadd.s32 1, %s1212_s23   ;;  %s1398_s21 = smov %s1208_s22 }
 0x250   : > { %p14_p5 = scmp.ge.s32.totalorder %s17_s23, 4   ;;  %s1399_s22 = smov %s1401_s24 }
 0x252   :  { %16 = sbr.rel (!%p14_p5) target bundleno = 2 (0x2), region = 112 }

// kernel: loss_with_gan_ste_forward.12
= control target key start
LH: loop header
LB: loop body
LE: loop exit
PB: predicated region body
PF: predicated region fallthrough
CT: control target
= control target key end

     0   :  { %v132_v0 = vmov 0.0   ;;  %vm46_vm0 = vcmask 1041408   ;;  %s230_s2 = inlined_call_operand.vmem [shape: f32[2,1,128], index: 2, kind: output, shape index: {0}]   ;;  %s231_s3 = inlined_call_operand.vmem [shape: f32[2,1,128], index: 3, kind: output, shape index: {1}]   ;;  %s232_s4 = inlined_call_operand.vmem [shape: f32[2,1,128], index: 4, kind: output, shape index: {2}]   ;;  %s233_s0 = inlined_call_operand.vmem [shape: f32[2,2,128], index: 0, kind: input, shape index: {}]   ;;  %s234_s1 = inlined_call_operand.vmem [shape: f32[2,2,128], index: 1, kind: input, shape index: {}]  }
   0x1   :  { %18 = vst [vmem:[%s230_s2] sm:$0x1] %v132_v0  ;;  %19 = vst [vmem:[%s230_s2 + $0x1] sm:$0x1] %v132_v0  ;;  %v24_v1 = vld [vmem:[%s233_s0] sm:$0x3] }
   0x2   :  { %20 = vst [vmem:[%s231_s3] sm:$0x1] %v132_v0  ;;  %21 = vst [vmem:[%s231_s3 + $0x1] sm:$0x1] %v132_v0  ;;  %v38_v2 = vld [vmem:[%s234_s1] sm:$0x3] }
   0x3   :  { %22 = vst [vmem:[%s232_s4] sm:$0x1] %v132_v0  ;;  %23 = vst [vmem:[%s232_s4 + $0x1] sm:$0x1] %v132_v0  ;;  %v25_v3 = vld [vmem:[%s233_s0 + $0x2] sm:$0x3]  ;;  %v40_v5 = vsub.f32 1.0, %v38_v2 }
   0x4   :  { %v121_v4 = vmul.f32 -1.442695, %v24_v1  ;;  %v122_v6 = vmul.f32 -1.442695, %v25_v3  ;;  %v39_v7 = vld [vmem:[%s234_s1 + $0x2] sm:$0x3] }
   0x5   :  { %v41_v8 = vsub.f32 1.0, %v39_v7  ;;  %v89_v9 = vmul.f32 %v40_v5, %v40_v5 }
   0x6   :  { %124 = vpow2.f32 %v121_v4 }
   0x7   :  { %126 = vpow2.f32 %v122_v6  ;;  %v91_v10 = vsel %vm46_vm0, %v89_v9, 0.0  ;;  %v90_v11 = vmul.f32 %v41_v8, %v41_v8 }
   0x8   :  { %v92_v12 = vrot.slane %v91_v10, 4  ;;  %v42_v61 = vld [vmem:[%s230_s2] sm:$0x1]  ;;  %v43_v2 = vld [vmem:[%s230_s2 + $0x1] sm:$0x1] }
   0x9   :  { %v98_v14 = vsel %vm46_vm0, %v90_v11, 0.0  ;;  %v65_v63 = vld [vmem:[%s231_s3] sm:$0x1]  ;;  %v66_v4 = vld [vmem:[%s231_s3 + $0x1] sm:$0x1] }
   0xa   :  { %v93_v13 = vadd.f32 %v92_v12, %v91_v10  ;;  %v99_v16 = vrot.slane %v98_v14, 4  ;;  %v87_v21 = vld [vmem:[%s232_s4] sm:$0x1]  ;;  %v88_v30 = vld [vmem:[%s232_s4 + $0x1] sm:$0x1] }
   0xc   :  { %v94_v15 = vrot.slane %v93_v13, 2  ;;  %v100_v18 = vadd.f32 %v99_v16, %v98_v14 }
   0xe   :  { %v95_v17 = vadd.f32 %v94_v15, %v93_v13  ;;  %v101_v20 = vrot.slane %v100_v18, 2 }
  0x10   :  { %v96_v19 = vrot.slane %v95_v17, 1  ;;  %v102_v24 = vadd.f32 %v101_v20, %v100_v18 }
  0x12   :  { %v97_v23 = vadd.f32 %v96_v19, %v95_v17  ;;  %v103_v29 = vrot.slane %v102_v24, 1 }
  0x13   :  { %v125_v22 = vpop.eup %124 }
  0x14   :  { %v127_v25 = vpop.eup %126  ;;  %v32_v26 = vadd.f32 1.0, %v125_v22  ;;  %v105_v28 = vadd.f32 %v97_v23, %v87_v21  ;;  %v104_v31 = vadd.f32 %v103_v29, %v102_v24 }
  0x15   :  { %v33_v27 = vadd.f32 1.0, %v127_v25 }
  0x16   :  { %128 = vrcp.f32 %v32_v26  ;;  %107 = vst [vmem:[%s232_s4] sm:$0x1] %v105_v28  ;;  %v106_v32 = vadd.f32 %v104_v31, %v88_v30 }
  0x17   :  { %130 = vrcp.f32 %v33_v27 }
  0x18   :  { %108 = vst [vmem:[%s232_s4 + $0x1] sm:$0x1] %v106_v32 }
  0x23   :  { %v129_v33 = vpop.eup %128 }
  0x24   :  { %v131_v34 = vpop.eup %130  ;;  %v44_v35 = vmul.f32 %v129_v33, %v40_v5  ;;  %v67_v36 = vmul.f32 %v129_v33, %v129_v33 }
  0x25   :  { %v45_v37 = vmul.f32 %v131_v34, %v41_v8  ;;  %v68_v38 = vmul.f32 %v131_v34, %v131_v34 }
  0x26   :  { %v47_v39 = vsel %vm46_vm0, %v44_v35, 0.0  ;;  %v69_v40 = vsel %vm46_vm0, %v67_v36, 0.0 }
  0x27   :  { %v48_v41 = vrot.slane %v47_v39, 4  ;;  %v54_v42 = vsel %vm46_vm0, %v45_v37, 0.0  ;;  %v70_v43 = vrot.slane %v69_v40, 4  ;;  %v76_v44 = vsel %vm46_vm0, %v68_v38, 0.0 }
  0x28   :  { %v55_v45 = vrot.slane %v54_v42, 4  ;;  %v77_v46 = vrot.slane %v76_v44, 4 }
  0x29   :  { %v49_v47 = vadd.f32 %v48_v41, %v47_v39  ;;  %v71_v48 = vadd.f32 %v70_v43, %v69_v40 }
  0x2a   :  { %v56_v49 = vadd.f32 %v55_v45, %v54_v42  ;;  %v78_v50 = vadd.f32 %v77_v46, %v76_v44 }
  0x2b   :  { %v50_v51 = vrot.slane %v49_v47, 2  ;;  %v72_v52 = vrot.slane %v71_v48, 2 }
  0x2c   :  { %v57_v53 = vrot.slane %v56_v49, 2  ;;  %v79_v54 = vrot.slane %v78_v50, 2 }
  0x2d   :  { %v51_v55 = vadd.f32 %v50_v51, %v49_v47  ;;  %v73_v56 = vadd.f32 %v72_v52, %v71_v48 }
  0x2e   :  { %v58_v57 = vadd.f32 %v57_v53, %v56_v49  ;;  %v80_v58 = vadd.f32 %v79_v54, %v78_v50 }
  0x2f   :  { %v52_v59 = vrot.slane %v51_v55, 1  ;;  %v74_v60 = vrot.slane %v73_v56, 1 }
  0x30   :  { %v59_v62 = vrot.slane %v58_v57, 1  ;;  %v81_v0 = vrot.slane %v80_v58, 1 }
  0x31   :  { %v53_v1 = vadd.f32 %v52_v59, %v51_v55  ;;  %v75_v3 = vadd.f32 %v74_v60, %v73_v56 }
  0x32   :  { %v60_v5 = vadd.f32 %v59_v62, %v58_v57  ;;  %v82_v6 = vadd.f32 %v81_v0, %v80_v58 }
  0x33   :  { %v61_v7 = vadd.f32 %v53_v1, %v42_v61  ;;  %v83_v8 = vadd.f32 %v75_v3, %v65_v63 }
  0x34   :  { %v62_v9 = vadd.f32 %v60_v5, %v43_v2  ;;  %v84_v10 = vadd.f32 %v82_v6, %v66_v4 }
  0x35   :  { %63 = vst [vmem:[%s230_s2] sm:$0x1] %v61_v7  ;;  %85 = vst [vmem:[%s231_s3] sm:$0x1] %v83_v8 }
  0x36   :  { %64 = vst [vmem:[%s230_s2 + $0x1] sm:$0x1] %v62_v9  ;;  %86 = vst [vmem:[%s231_s3 + $0x1] sm:$0x1] %v84_v10 }

// kernel: loss_with_gan_ste_forward.15
= control target key start
LH: loop header
LB: loop body
LE: loop exit
PB: predicated region body
PF: predicated region fallthrough
CT: control target
= control target key end

     0   :  { %s889_s27 = smov 0   ;;  %s891_s28 = smov 0   ;;  %s1141_s0 = inlined_call_operand.vmem [shape: f32[16,192], index: 0, kind: input, shape index: {}]   ;;  %s1142_s1 = inlined_call_operand.vmem [shape: f32[192,128], index: 1, kind: input, shape index: {}]   ;;  %s1143_s2 = inlined_call_operand.vmem [shape: f32[1,128], index: 2, kind: input, shape index: {}]   ;;  %s1144_s3 = inlined_call_operand.vmem [shape: f32[128,64], index: 3, kind: input, shape index: {}]   ;;  %s1145_s4 = inlined_call_operand.vmem [shape: f32[1,64], index: 4, kind: input, shape index: {}]   ;;  %s1146_s5 = inlined_call_operand.vmem [shape: f32[64,16], index: 5, kind: input, shape index: {}]   ;;  %s1147_s6 = inlined_call_operand.vmem [shape: f32[1,16], index: 6, kind: input, shape index: {}]   ;;  %s1148_s7 = inlined_call_operand.vmem [shape: f32[1,16], index: 7, kind: input, shape index: {}]   ;;  %s1149_s8 = inlined_call_operand.vmem [shape: f32[2,1,1], index: 8, kind: output, shape index: {}]  }
   0x1   :  { %s893_s29 = smov 0  }
   0x2 LB: > { %s30_s30 = sadd.s32 1, %s836_s28  ;;  %p701_p0 = scmp.ge.s32.totalorder %s840_s29, 1  ;;  %s840_s29 = sphi %s893_s29, %s18_s29   ;;  %s836_s28 = sphi %s891_s28, %s1151_s28   ;;  %s832_s27 = sphi %s889_s27, %s1150_s27  }
   0x3   : > { %p32_p1 = scmp.ge.s32.totalorder %s30_s30, 2  ;;  %p278_p2 = scmp.lt.s32.totalorder %s840_s29, 3 }
   0x5   : > { %s1153_s30 = smov (%p32_p1, %s30_s30), 0  ;;  %p279_p3 = pnand %p701_p0, %p278_p2 }
   0x6   : > { %p312_p4 = scmp.lt.s32.totalorder (!%p279_p3), %s832_s27, 1 }
   0x7   : > { %282 = sbr.rel (%p279_p3) target bundleno = 812 (0x32c), region = 52 }
   0xc   : > { %v344_v0 = vld [vmem:[%s1142_s1 + $0x78] sm:$0xff]  ;;  %v842_v1 = vmov 0.0   ;;  %v343_v2 = vld [vmem:[%s1142_s1 + $0x70] sm:$0xff]  ;;  %s1155_s27 = smov (!%p312_p4, %s832_s27), 1  ;;  %v342_v3 = vld [vmem:[%s1142_s1 + $0x68] sm:$0xff]  ;;  %vm360_vm0 = vcmask 523264  }
   0xd   : > { %364 = vmatprep.subr.mxu0 %v842_v1  ;;  %738 = vmatprep.subr.mxu1 %v842_v1  ;;  %s711_s15 = sshll.u32 %s1155_s27, 4  ;;  %v341_v4 = vld [vmem:[%s1142_s1 + $0x60] sm:$0xff]  ;;  %v340_v5 = vld [vmem:[%s1142_s1 + $0x58] sm:$0xff]  ;;  %v339_v8 = vld [vmem:[%s1142_s1 + $0x50] sm:$0xff]  ;;  %vm843_vm1 = vmmov 0   ;;  %s320_s10 = scalar_lea.vmem %s1149_s8, %s1155_s27  ;;  %vm325_vm4 = vcmask 0  }
   0xe   : > { %365 = vmatpush1.msra.mxu0 %v344_v0  ;;  %s929_s20 = scalar_lea.vmem %s1141_s0, %s711_s15  ;;  %v452_v7 = vld [vmem:[%s1144_s3 + $0x78] sm:$0xff]  ;;  %v451_v9 = vld [vmem:[%s1144_s3 + $0x70] sm:$0xff]  ;;  %v338_v10 = vld [vmem:[%s1142_s1 + $0x48] sm:$0xff]  ;;  %770 = vmatprep.mubr.msk.f32.mxu1 %vm843_vm1, %v842_v1  ;;  %326 = vst.msk [vmem:[%s320_s10] sm:$0x1] %vm325_vm4, %v842_v1  ;;  %vm624_vm6 = vcmask 130048  }
   0xf   : > { %366 = vmatprep.subr.mxu0 %v842_v1  ;;  %v328_v6 = vld [vmem:[%s929_s20 + $0x8] sm:$0xff]  ;;  %739 = vmatpush3.msra.mxu1 %v452_v7  ;;  %v337_v12 = vld [vmem:[%s1142_s1 + $0x40] sm:$0xff]  ;;  %v336_v14 = vld [vmem:[%s1142_s1 + $0x38] sm:$0xff]  ;;  %vm634_vm7 = vcmask 122880  }
  0x10   : > { %367 = vmatpush1.msra.mxu0 %v343_v2  ;;  %705 = vmatprep.mubr.msk.f32.mxu0 %vm360_vm0, %v328_v6  ;;  %v450_v11 = vld [vmem:[%s1144_s3 + $0x68] sm:$0xff]  ;;  %v449_v13 = vld [vmem:[%s1144_s3 + $0x60] sm:$0xff]  ;;  %v448_v15 = vld [vmem:[%s1144_s3 + $0x58] sm:$0xff] }
  0x11   : > { %368 = vmatprep.subr.mxu0 %v842_v1  ;;  %740 = vmatprep.subr.mxu1 %v842_v1  ;;  %v335_v16 = vld [vmem:[%s1142_s1 + $0x30] sm:$0xff]  ;;  %v334_v18 = vld [vmem:[%s1142_s1 + $0x28] sm:$0xff]  ;;  %v333_v20 = vld [vmem:[%s1142_s1 + $0x20] sm:$0xff] }
  0x12   : > { %369 = vmatpush1.msra.mxu0 %v342_v3  ;;  %741 = vmatpush3.msra.mxu1 %v451_v9  ;;  %v447_v17 = vld [vmem:[%s1144_s3 + $0x50] sm:$0xff]  ;;  %v446_v19 = vld [vmem:[%s1144_s3 + $0x48] sm:$0xff]  ;;  %v445_v21 = vld [vmem:[%s1144_s3 + $0x40] sm:$0xff] }
  0x13   : > { %370 = vmatprep.subr.mxu0 %v842_v1  ;;  %742 = vmatprep.subr.mxu1 %v842_v1  ;;  %v332_v22 = vld [vmem:[%s1142_s1 + $0x18] sm:$0xff]  ;;  %v331_v24 = vld [vmem:[%s1142_s1 + $0x10] sm:$0xff]  ;;  %v330_v26 = vld [vmem:[%s1142_s1 + $0x8] sm:$0xff] }
  0x14   : > { %371 = vmatpush1.msra.mxu0 %v341_v4  ;;  %743 = vmatpush3.msra.mxu1 %v450_v11  ;;  %v444_v23 = vld [vmem:[%s1144_s3 + $0x38] sm:$0xff]  ;;  %v443_v25 = vld [vmem:[%s1144_s3 + $0x30] sm:$0xff]  ;;  %v442_v27 = vld [vmem:[%s1144_s3 + $0x28] sm:$0xff] }
  0x15   : > { %372 = vmatprep.subr.mxu0 %v842_v1  ;;  %744 = vmatprep.subr.mxu1 %v842_v1  ;;  %v329_v28 = vld [vmem:[%s1142_s1] sm:$0xff]  ;;  %v352_v30 = vld [vmem:[%s1142_s1 + $0xb8] sm:$0xff]  ;;  %v351_v32 = vld [vmem:[%s1142_s1 + $0xb0] sm:$0xff] }
  0x16   : > { %373 = vmatpush1.msra.mxu0 %v340_v5  ;;  %745 = vmatpush3.msra.mxu1 %v449_v13  ;;  %v441_v29 = vld [vmem:[%s1144_s3 + $0x20] sm:$0xff]  ;;  %v440_v31 = vld [vmem:[%s1144_s3 + $0x18] sm:$0xff]  ;;  %v350_v33 = vld [vmem:[%s1142_s1 + $0xa8] sm:$0xff] }
  0x17   : > { %374 = vmatprep.subr.mxu0 %v842_v1  ;;  %746 = vmatprep.subr.mxu1 %v842_v1  ;;  %v349_v34 = vld [vmem:[%s1142_s1 + $0xa0] sm:$0xff]  ;;  %v348_v35 = vld [vmem:[%s1142_s1 + $0x98] sm:$0xff]  ;;  %v347_v36 = vld [vmem:[%s1142_s1 + $0x90] sm:$0xff] }
  0x18   : > { %375 = vmatpush1.msra.mxu0 %v339_v8  ;;  %747 = vmatpush3.msra.mxu1 %v448_v15  ;;  %v346_v37 = vld [vmem:[%s1142_s1 + $0x88] sm:$0xff]  ;;  %v345_v38 = vld [vmem:[%s1142_s1 + $0x80] sm:$0xff]  ;;  %v439_v40 = vld [vmem:[%s1144_s3 + $0x10] sm:$0xff] }
  0x19   : > { %376 = vmatprep.subr.mxu0 %v842_v1  ;;  %748 = vmatprep.subr.mxu1 %v842_v1  ;;  %v327_v39 = vld [vmem:[%s929_s20] sm:$0xff]  ;;  %v438_v41 = vld [vmem:[%s1144_s3 + $0x8] sm:$0xff]  ;;  %v540_v48 = vld [vmem:[%s1146_s5 + $0x38] sm:$0xff] }
  0x1a   : > { %377 = vmatpush1.msra.mxu0 %v338_v10  ;;  %749 = vmatpush3.msra.mxu1 %v447_v17  ;;  %v437_v42 = vld [vmem:[%s1144_s3] sm:$0xff]  ;;  %v539_v50 = vld [vmem:[%s1146_s5 + $0x30] sm:$0xff]  ;;  %v538_v51 = vld [vmem:[%s1146_s5 + $0x28] sm:$0xff] }
  0x1b   : > { %378 = vmatprep.subr.mxu0 %v842_v1  ;;  %750 = vmatprep.subr.mxu1 %v842_v1  ;;  %v704_v43 = vld [vmem:[%s1143_s2] ss:$0 sm:$0xff]  ;;  %v536_v53 = vld [vmem:[%s1146_s5 + $0x18] sm:$0xff]  ;;  %v535_v54 = vld [vmem:[%s1146_s5 + $0x10] sm:$0xff] }
  0x1c   : > { %379 = vmatpush1.msra.mxu0 %v337_v12  ;;  %751 = vmatpush3.msra.mxu1 %v446_v19  ;;  %v537_v52 = vld [vmem:[%s1146_s5 + $0x20] sm:$0xff]  ;;  %v534_v55 = vld [vmem:[%s1146_s5 + $0x8] sm:$0xff] }
  0x1d   : > { %380 = vmatprep.subr.mxu0 %v842_v1  ;;  %752 = vmatprep.subr.mxu1 %v842_v1  ;;  %v533_v56 = vld [vmem:[%s1146_s5] sm:$0xff] }
  0x1e   : > { %381 = vmatpush1.msra.mxu0 %v336_v14  ;;  %753 = vmatpush3.msra.mxu1 %v445_v21  ;;  %v706_v57 = vld [vmem:[%s1145_s4] ss:$0 sm:$0xff] }
  0x1f   : > { %382 = vmatprep.subr.mxu0 %v842_v1  ;;  %754 = vmatprep.subr.mxu1 %v842_v1  ;;  %v707_v63 = vld [vmem:[%s1147_s6] ss:$0 sm:$0xff] }
  0x20   : > { %383 = vmatpush1.msra.mxu0 %v335_v16  ;;  %755 = vmatpush3.msra.mxu1 %v444_v23  ;;  %v638_v15 = vld [vmem:[%s320_s10] sm:$0x1] }
  0x21   : > { %384 = vmatprep.subr.mxu0 %v842_v1  ;;  %756 = vmatprep.subr.mxu1 %v842_v1 }
  0x22   : > { %385 = vmatpush1.msra.mxu0 %v334_v18  ;;  %757 = vmatpush3.msra.mxu1 %v443_v25 }
  0x23   : > { %386 = vmatprep.subr.mxu0 %v842_v1  ;;  %758 = vmatprep.subr.mxu1 %v842_v1 }
  0x24   : > { %387 = vmatpush1.msra.mxu0 %v333_v20  ;;  %759 = vmatpush3.msra.mxu1 %v442_v27 }
  0x25   : > { %388 = vmatprep.subr.mxu0 %v842_v1  ;;  %760 = vmatprep.subr.mxu1 %v842_v1 }
  0x26   : > { %389 = vmatpush1.msra.mxu0 %v332_v22  ;;  %761 = vmatpush3.msra.mxu1 %v441_v29 }
  0x27   : > { %390 = vmatprep.subr.mxu0 %v842_v1  ;;  %762 = vmatprep.subr.mxu1 %v842_v1 }
  0x28   : > { %391 = vmatpush1.msra.mxu0 %v331_v24  ;;  %763 = vmatpush3.msra.mxu1 %v440_v31 }
  0x29   : > { %392 = vmatprep.subr.mxu0 %v842_v1  ;;  %764 = vmatprep.subr.mxu1 %v842_v1 }
  0x2a   : > { %393 = vmatpush1.msra.mxu0 %v330_v26  ;;  %765 = vmatpush3.msra.mxu1 %v439_v40 }
  0x2b   : > { %394 = vmatprep.subr.mxu0 %v842_v1  ;;  %766 = vmatprep.subr.mxu1 %v842_v1 }
  0x2c   : > { %395 = vmatpush1.msra.mxu0 %v329_v28  ;;  %767 = vmatpush3.msra.mxu1 %v438_v41 }
  0x2d   : > { %412 = vmatprep.subr.mxu0 %v842_v1  ;;  %768 = vmatprep.subr.mxu1 %v842_v1 }
  0x2e   : > { %413 = vmatpush2.msra.mxu0 %v352_v30  ;;  %769 = vmatpush3.msra.mxu1 %v437_v42 }
  0x2f   : > { %414 = vmatprep.subr.mxu0 %v842_v1  ;;  %773 = vmatprep.subr.mxu1 %v842_v1 }
  0x30   : > { %415 = vmatpush2.msra.mxu0 %v351_v32 }
  0x31   : > { %416 = vmatprep.subr.mxu0 %v842_v1 }
  0x32   : > { %417 = vmatpush2.msra.mxu0 %v350_v33 }
  0x33   : > { %418 = vmatprep.subr.mxu0 %v842_v1 }
  0x34   : > { %419 = vmatpush2.msra.mxu0 %v349_v34 }
  0x35   : > { %420 = vmatprep.subr.mxu0 %v842_v1 }
  0x36   : > { %421 = vmatpush2.msra.mxu0 %v348_v35 }
  0x37   : > { %422 = vmatprep.subr.mxu0 %v842_v1 }
  0x38   : > { %423 = vmatpush2.msra.mxu0 %v347_v36 }
  0x39   : > { %424 = vmatprep.subr.mxu0 %v842_v1 }
  0x3a   : > { %425 = vmatpush2.msra.mxu0 %v346_v37 }
  0x3b   : > { %426 = vmatprep.subr.mxu0 %v842_v1 }
  0x3c   : > { %427 = vmatpush2.msra.mxu0 %v345_v38 }
  0x3d   : > { %429 = vmatmul.mubr.f32.vlgmr.msra.gmra.mxu0 %v327_v39 }
  0xfd   : > { %v430_v44 = vpop.f32.mrf.mxu0 }
  0xfe   : > { %v431_v45 = vadd.f32 %v704_v43, %v430_v44 }
  0xff   : > { %v432_v46 = vpop.f32.mrf.mxu0 }
 0x100   : > { %v435_v47 = vmul.f32 0.2, %v431_v45  ;;  %vm434_vm2 = vcmp.gt.f32.partialorder %v431_v45, 0.0 }
 0x102   : > { %v436_v49 = vsel %vm434_vm2, %v431_v45, %v435_v47 }
 0x103   : > { %771 = vmatmul.mubr.f32.vlgmr.msra.gmra.mxu1 %v436_v49 }
 0x104   : > { %774 = vmatpush3.msra.mxu1 %v540_v48  ;;  %789 = vmatprep.mubr.msk.f32.mxu1 %vm843_vm1, %v842_v1 }
 0x105   : > { %775 = vmatprep.subr.mxu1 %v842_v1 }
 0x106   : > { %776 = vmatpush3.msra.mxu1 %v539_v50 }
 0x107   : > { %777 = vmatprep.subr.mxu1 %v842_v1 }
 0x108   : > { %778 = vmatpush3.msra.mxu1 %v538_v51 }
 0x109   : > { %779 = vmatprep.subr.mxu1 %v842_v1 }
 0x10a   : > { %780 = vmatpush3.msra.mxu1 %v537_v52 }
 0x10b   : > { %781 = vmatprep.subr.mxu1 %v842_v1 }
 0x10c   : > { %782 = vmatpush3.msra.mxu1 %v536_v53 }
 0x10d   : > { %783 = vmatprep.subr.mxu1 %v842_v1 }
 0x10e   : > { %784 = vmatpush3.msra.mxu1 %v535_v54 }
 0x10f   : > { %785 = vmatprep.subr.mxu1 %v842_v1 }
 0x110   : > { %786 = vmatpush3.msra.mxu1 %v534_v55 }
 0x111   : > { %787 = vmatprep.subr.mxu1 %v842_v1  ;;  %v632_v1 = vld [vmem:[%s1148_s7] sm:$0x1] }
 0x112   : > { %788 = vmatpush3.msra.mxu1 %v533_v56 }
 0x1c3   : > { %v526_v58 = vpop.f32.mrf.mxu1 }
 0x1c4   : > { %v527_v59 = vadd.f32 %v706_v57, %v526_v58 }
 0x1c5   : > { %v772_v60 = vpop.f32.mrf.mxu1 }
 0x1c6   : > { %vm530_vm3 = vcmp.gt.f32.partialorder %v527_v59, 0.0  ;;  %v531_v61 = vmul.f32 0.2, %v527_v59 }
 0x1c8   : > { %v532_v62 = vsel %vm530_vm3, %v527_v59, %v531_v61 }
 0x1c9   : > { %790 = vmatmul.mubr.msk.f32.vlgmr.msra.gmra.mxu1 %vm360_vm0, %v532_v62 }
 0x289   : > { %v617_v0 = vpop.f32.mrf.mxu1 }
 0x28a   : > { %v618_v2 = vadd.f32 %v707_v63, %v617_v0 }
 0x28b   : > { %v791_v3 = vpop.f32.mrf.mxu1 }
 0x28c   : > { %vm621_vm5 = vcmp.gt.f32.partialorder %v618_v2, 0.0  ;;  %v622_v4 = vmul.f32 0.2, %v618_v2 }
 0x28e   : > { %v623_v5 = vsel %vm621_vm5, %v618_v2, %v622_v4 }
 0x28f   : > { %v625_v6 = vsel %vm624_vm6, %v623_v5, 0.0 }
 0x290   : > { %v626_v7 = vrot.slane %v625_v6, 4 }
 0x292   : > { %v627_v8 = vadd.f32 %v626_v7, %v625_v6 }
 0x294   : > { %v628_v9 = vrot.slane %v627_v8, 2 }
 0x296   : > { %v629_v10 = vadd.f32 %v628_v9, %v627_v8 }
 0x298   : > { %v630_v11 = vrot.slane %v629_v10, 1 }
 0x29a   : > { %v631_v12 = vadd.f32 %v630_v11, %v629_v10 }
 0x29c   : > { %v633_v13 = vmul.f32 %v632_v1, %v631_v12 }
 0x29e   : > { %v635_v14 = vsel %vm634_vm7, %v633_v13, 0.0 }
 0x29f   : > { %636 = vadd.xlane.f32.xlu0 %v635_v14 }
 0x328   : > { %v637_v16 = vpop.xlane.xlu0 %636 }
 0x329   : > { %v639_v17 = vadd.f32 %v638_v15, %v637_v16 }
 0x32b   : > { %641 = vst.msk [vmem:[%s320_s10] sm:$0x1] %vm325_vm4, %v639_v17 }
 0x32c PF: > { %s18_s29 = sadd.s32 1, %s840_s29   ;;  %s1150_s27 = smov %s836_s28 }
 0x32d   : > { %p15_p5 = scmp.ge.s32.totalorder %s18_s29, 4   ;;  %s1151_s28 = smov %s1153_s30 }
 0x32f   :  { %17 = sbr.rel (!%p15_p5) target bundleno = 2 (0x2), region = 86 }

</bundles_post_ra>
